<compile_context>
chip_gen: v5e
topology: v5e:2x2
jax: 0.10.0
libtpu: 0.0.40
codegen_flags: <defaults>
</compile_context>

<pallas_src>
import functools

import numpy as np
import jax
import jax.numpy as jnp
from jax.experimental import pallas as pl
from jax.experimental.pallas import tpu as pltpu


MXU_DTYPE = jnp.bfloat16     # MXU operand dtype (accumulation is always f32)
GELU_TANH = True             # tanh-approx GELU (EUP); False -> exact-erf parity path

_KSIZE = 3
_BN_EPS = 1e-5
_SQRT_HALF = 0.7071067811865476
_SQRT_2_OVER_PI = 0.7978845608028654


def _erf(x):
    # Abramowitz & Stegun 7.1.26 (|err| <= 1.5e-7), only guaranteed-lowering ops.
    p = 0.3275911
    a1, a2, a3, a4, a5 = (0.254829592, -0.284496736, 1.421413741,
                          -1.453152027, 1.061405429)
    ax = jnp.abs(x)
    t = 1.0 / (1.0 + p * ax)
    poly = ((((a5 * t + a4) * t + a3) * t + a2) * t + a1) * t
    y = 1.0 - poly * jnp.exp(-ax * ax)
    return jnp.where(x < 0.0, -y, y)


def _gelu(x):
    if GELU_TANH:
        # tanh lands on the otherwise-idle EUP slot; ~1e-3 rel. drift vs exact erf.
        return 0.5 * x * (1.0 + jnp.tanh(_SQRT_2_OVER_PI * (x + 0.044715 * x * x * x)))
    return 0.5 * x * (1.0 + _erf(x * _SQRT_HALF))   # exact F.gelu


def _round8(n):
    return -(-n // 8) * 8


def _block_meta(hidden_dims, output_dims, depth):
    """Static (python-only) structure of the TS2Vec DilatedConvEncoder."""
    channels = [hidden_dims] * depth + [output_dims]
    meta, in_c = [], hidden_dims
    for i, out_c in enumerate(channels):
        final = i == len(channels) - 1
        meta.append(dict(dilation=2 ** i, cin=in_c, cout=out_c,
                         has_proj=(in_c != out_c) or final))
        in_c = out_c
    return tuple(meta)


# ----------------------------------------------------------------------------
# Host-side parameter packing: two resident slabs instead of ~27 tiny DMAs
# ----------------------------------------------------------------------------

def _build_plan(meta, hidden_dims, output_dims, p_hidden_dims, po_pad):
    """Static row offsets of every parameter inside the two packed slabs."""
    couts = [b["cout"] for b in meta]
    plan = {
        "w_width": max(couts + [p_hidden_dims, po_pad]),
        "v_width": max(couts + [hidden_dims, output_dims, p_hidden_dims, po_pad]),
    }
    state = {"w": 0, "v": 0}

    def take_w(rows):
        off = state["w"]
        state["w"] += _round8(rows)      # keep every matmul operand 8-row aligned
        return off

    def take_v():
        row = state["v"]
        state["v"] += 1
        return row

    plan["fc_w"], plan["fc_b"] = take_v(), take_v()
    blocks = []
    for b in meta:
        cin, cout = b["cin"], b["cout"]
        bp = {"w1": take_w(3 * cin), "b1": take_v(),
              "w2": take_w(3 * cout), "b2": take_v()}
        if b["has_proj"]:
            bp["wp"], bp["bp"] = take_w(cin), take_v()
        blocks.append(bp)
    plan["blocks"] = tuple(blocks)
    plan["p_w1"], plan["p_b1"] = take_w(output_dims), take_v()
    plan["bn_g"], plan["bn_b"] = take_v(), take_v()
    plan["bn_m"], plan["bn_v"] = take_v(), take_v()
    plan["p_w2"], plan["p_b2"] = take_w(p_hidden_dims), take_v()
    plan["w_rows"], plan["v_rows"] = _round8(state["w"]), _round8(state["v"])
    return plan


def _pack_slabs(params, meta, plan):
    """bf16 matmul-weight slab + f32 bias/BN vector slab (zero padded columns)."""
    wslab = jnp.zeros((plan["w_rows"], plan["w_width"]), MXU_DTYPE)
    vslab = jnp.zeros((plan["v_rows"], plan["v_width"]), jnp.float32)

    def put_w(slab, off, a):
        r, c = a.shape
        return slab.at[off:off + r, :c].set(a.astype(MXU_DTYPE))

    def put_v(slab, row, a):
        a = jnp.reshape(a, (1, -1)).astype(jnp.float32)
        return slab.at[row:row + 1, :a.shape[1]].set(a)

    vslab = put_v(vslab, plan["fc_w"], params["fc_w"])
    vslab = put_v(vslab, plan["fc_b"], params["fc_b"])
    for b, bp, blk in zip(meta, plan["blocks"], params["blocks"]):
        cin, cout = b["cin"], b["cout"]
        # (K, cin, cout) -> (K*cin, cout): row k*cin+i == tap-k weight row i.
        wslab = put_w(wslab, bp["w1"], blk["w1"].reshape(3 * cin, cout))
        wslab = put_w(wslab, bp["w2"], blk["w2"].reshape(3 * cout, cout))
        vslab = put_v(vslab, bp["b1"], blk["b1"])
        vslab = put_v(vslab, bp["b2"], blk["b2"])
        if b["has_proj"]:
            wslab = put_w(wslab, bp["wp"], blk["wp"])
            vslab = put_v(vslab, bp["bp"], blk["bp"])
    wslab = put_w(wslab, plan["p_w1"], params["p_w1"])
    wslab = put_w(wslab, plan["p_w2"], params["p_w2"])     # zero-padded to po_pad lanes
    for name in ("p_b1", "bn_g", "bn_b", "bn_m", "bn_v", "p_b2"):
        vslab = put_v(vslab, plan[name], params[name])
    return wslab, vslab


# ----------------------------------------------------------------------------
# Fused kernel
# ----------------------------------------------------------------------------

def _make_fused_kernel(*, meta, plan, T, Tpad, halo, num_feat, bs, c_scr,
                       hidden_dims, output_dims, p_hidden_dims, p_output_dims,
                       po_pad):
    K = _KSIZE
    M = bs * num_feat * Tpad          # flat activation rows per grid step
    L = M + 2 * halo                  # staging rows (incl. zero halo)
    mdt = MXU_DTYPE

    def kernel(x_ref, w_ref, v_ref, o_ref, scr):
        # In-kernel validity mask: 1.0 on real timesteps, 0.0 on the inter-feature
        # gap rows that double as the convs' "same" zero padding.
        ridx = jax.lax.broadcasted_iota(jnp.int32, (M, 1), 0)
        valid = (ridx % Tpad < T).astype(jnp.float32)

        def vec(row, n):                       # (1, n) f32 parameter vector
            return v_ref[row:row + 1, :n]

        def wmat(off, rows, cols):             # (rows, cols) bf16 matmul operand
            return w_ref[off:off + rows, :cols]

        # Zero ONLY the halo rows (data rows are rewritten before every conv).
        # Done unconditionally every step (megacore-safe: each core has its own scratch).
        scr[0:halo, :] = jnp.zeros((halo, c_scr * K), jnp.float32)
        scr[halo + M:L, :] = jnp.zeros((halo, c_scr * K), jnp.float32)

        def conv(xact, w_off, b_row, d, cin, cout):
            # Tap-fused dilated "same" conv: stage the masked activation once in the
            # centre column block, copy its +/-d row-shifted views (shift via
            # shifted READS, aligned WRITES) into the side column blocks, then issue
            # ONE MXU matmul (M, 3*cin) @ (3*cin, cout) against the packed weight.
            scr[halo:halo + M, cin:2 * cin] = xact * valid            # tap k=1 (centre)
            left = scr[halo - d:halo - d + M, cin:2 * cin]            # x[r-d]
            right = scr[halo + d:halo + d + M, cin:2 * cin]           # x[r+d]
            scr[halo:halo + M, 0:cin] = left                          # tap k=0
            scr[halo:halo + M, 2 * cin:3 * cin] = right               # tap k=2
            s = scr[halo:halo + M, 0:3 * cin].astype(mdt)             # (M, 3*cin)
            y = jnp.dot(s, wmat(w_off, K * cin, cout),
                        preferred_element_type=jnp.float32)
            return y + vec(b_row, cout)

        # TSEncoder.input_fc = Linear(1, hidden); mask='all_true' & eval dropout: no-ops.
        h = (x_ref[...] * vec(plan["fc_w"], hidden_dims)
             + vec(plan["fc_b"], hidden_dims))                        # (M, H) f32

        # DilatedConvEncoder: block i = gelu -> conv(d=2^i) -> gelu -> conv(d=2^i)
        # (+ residual; 1x1 projector on channel change / final block).
        for b, bp in zip(meta, plan["blocks"]):
            d, cin, cout = b["dilation"], b["cin"], b["cout"]
            if b["has_proj"]:
                residual = (jnp.dot(h.astype(mdt), wmat(bp["wp"], cin, cout),
                                    preferred_element_type=jnp.float32)
                            + vec(bp["bp"], cout))
            else:
                residual = h
            u = conv(_gelu(h), bp["w1"], bp["b1"], d, cin, cout)
            v2 = conv(_gelu(u), bp["w2"], bp["b2"], d, cout, cout)
            h = v2 + residual                                          # (M, cout)

        # pool=True: max over the full time axis per (batch, feature) row block,
        # then FTClassifier's sum over features.  bs*F <= 8 here, so a small
        # unrolled loop; gap rows are excluded by construction.
        rows_per_b = num_feat * Tpad
        pooled_rows = []
        for bi in range(bs):
            acc = None
            for f in range(num_feat):
                base = bi * rows_per_b + f * Tpad
                m = jnp.max(h[base:base + T, :], axis=0, keepdims=True)
                acc = m if acc is None else acc + m
            pooled_rows.append(acc)
        pooled = pooled_rows[0] if bs == 1 else jnp.concatenate(pooled_rows, axis=0)

        # ProjectionHead: Linear -> BatchNorm1d(eval) -> ReLU -> Linear (dropout=id).
        ph = p_hidden_dims
        z = (jnp.dot(pooled.astype(mdt), wmat(plan["p_w1"], output_dims, ph),
                     preferred_element_type=jnp.float32) + vec(plan["p_b1"], ph))
        z = ((z - vec(plan["bn_m"], ph))
             * jax.lax.rsqrt(vec(plan["bn_v"], ph) + _BN_EPS)
             * vec(plan["bn_g"], ph) + vec(plan["bn_b"], ph))
        z = jnp.maximum(z, 0.0)
        # p_w2 / p_b2 are zero-padded to po_pad lanes host-side -> lane-dense store.
        y = (jnp.dot(z.astype(mdt), wmat(plan["p_w2"], ph, po_pad),
                     preferred_element_type=jnp.float32) + vec(plan["p_b2"], po_pad))
        if p_output_dims == 2:
            # Reference applies sigmoid twice for output_dims == 2: once inside
            # ProjectionHead.forward and once more in FTClassifier.forward.
            y = jax.nn.sigmoid(jax.nn.sigmoid(y))
        o_ref[0] = y                                                   # (bs, po_pad)

    return kernel


# ----------------------------------------------------------------------------
# Parameters & wrapper
# ----------------------------------------------------------------------------

def init_params(key, *, output_dims, depth, hidden_dims, p_hidden_dims,
                p_output_dims):
    keys = iter(jax.random.split(key, 128))

    def nrm(shape, scale=0.1):
        return (scale * jax.random.normal(next(keys), shape)).astype(jnp.float32)

    params = {
        "fc_w": nrm((1, hidden_dims)),          # Linear(1, hidden)
        "fc_b": nrm((1, hidden_dims)),
    }
    blocks = []
    for b in _block_meta(hidden_dims, output_dims, depth):
        cin, cout = b["cin"], b["cout"]
        blk = {"w1": nrm((_KSIZE, cin, cout)), "b1": nrm((1, cout)),
               "w2": nrm((_KSIZE, cout, cout)), "b2": nrm((1, cout))}
        if b["has_proj"]:                        # 1x1 residual projector
            blk["wp"] = nrm((cin, cout))
            blk["bp"] = nrm((1, cout))
        blocks.append(blk)
    params["blocks"] = blocks

    params["p_w1"] = nrm((output_dims, p_hidden_dims))
    params["p_b1"] = nrm((1, p_hidden_dims))
    params["bn_g"] = 1.0 + nrm((1, p_hidden_dims))
    params["bn_b"] = nrm((1, p_hidden_dims))
    params["bn_m"] = nrm((1, p_hidden_dims))
    params["bn_v"] = 1.0 + jnp.abs(nrm((1, p_hidden_dims)))
    params["p_w2"] = nrm((p_hidden_dims, p_output_dims))
    params["p_b2"] = nrm((1, p_output_dims))
    return params


def ft_classifier_forward(params, x, *, hidden_dims, output_dims, depth,
                          p_hidden_dims, p_output_dims, batch_per_step=1):
    """FTClassifier.forward (eval mode); x: (B, T, F) -> (B, p_output_dims).

    batch_per_step: batch elements folded into one grid step.  1 keeps grid=(B,)
    (keeps both v7x TensorCores busy at small B); 2 gives M~=192 rows/step which
    better fills v6e/v7x's 256-wide MXU and amortizes per-step overhead.
    """
    B, T, F = x.shape
    bs = batch_per_step
    assert B % bs == 0, "batch must be divisible by batch_per_step"

    meta = _block_meta(hidden_dims, output_dims, depth)
    pad_max = max(b["dilation"] for b in meta)             # static python int
    # Inter-feature gap only needs >= pad_max rows: it is simultaneously the right
    # zero-pad of feature f and the left zero-pad of feature f+1.
    Tpad = _round8(T + pad_max)
    assert Tpad - T >= pad_max                              # zero-padding invariant
    halo = _round8(pad_max)                                 # 8-aligned scratch halo
    M = bs * F * Tpad                                       # flat rows per grid step
    L = M + 2 * halo
    c_scr = max(max(b["cin"], b["cout"]) for b in meta)     # max conv channel width
    po_pad = max(128, -(-p_output_dims // 128) * 128)       # lane-dense output width
    G = B // bs

    plan = _build_plan(meta, hidden_dims, output_dims, p_hidden_dims, po_pad)
    wslab, vslab = _pack_slabs(params, meta, plan)          # 2 resident slabs

    # (B, T, F) -> (B, F, T) -> right-pad time to Tpad -> flat (B*F*Tpad, 1).
    # One static pad of the tiny raw input; all per-layer "same" padding happens
    # in VMEM inside the kernel.
    xr = jnp.transpose(x.astype(jnp.float32), (0, 2, 1))
    xr = jnp.pad(xr, ((0, 0), (0, 0), (0, Tpad - T)))
    x_flat = xr.reshape(B * F * Tpad, 1)

    kernel = _make_fused_kernel(meta=meta, plan=plan, T=T, Tpad=Tpad, halo=halo,
                                num_feat=F, bs=bs, c_scr=c_scr,
                                hidden_dims=hidden_dims, output_dims=output_dims,
                                p_hidden_dims=p_hidden_dims,
                                p_output_dims=p_output_dims, po_pad=po_pad)

    out = pl.pallas_call(
        kernel,
        out_shape=jax.ShapeDtypeStruct((G, bs, po_pad), jnp.float32),
        grid=(G,),
        in_specs=[
            pl.BlockSpec((M, 1), lambda g: (g, 0)),         # this step's batch slice
            pl.BlockSpec(wslab.shape, lambda g: (0, 0)),    # resident bf16 weight slab
            pl.BlockSpec(vslab.shape, lambda g: (0, 0)),    # resident f32 vector slab
        ],
        out_specs=pl.BlockSpec((1, bs, po_pad), lambda g: (g, 0, 0)),
        scratch_shapes=[pltpu.VMEM((L, _KSIZE * c_scr), jnp.float32)],
        compiler_params=pltpu.CompilerParams(
            dimension_semantics=("parallel",)),             # megacore-shardable grid
    )(x_flat, wslab, vslab)

    return out.reshape(B, po_pad)[:, :p_output_dims]


# ----------------------------------------------------------------------------

if __name__ == "__main__":
    # FTClassifier(input_dims=1, output_dims=32, depth=3, p_output_dims=4,
    #              hidden_dims=32, p_hidden_dims=64), batch=2, seq=16, features=4.
    B, T, F = 2, 16, 4
    output_dims, depth = 32, 3
    hidden_dims, p_hidden_dims, p_output_dims = 32, 64, 4

    key = jax.random.PRNGKey(0)
    kx, kp = jax.random.split(key)
    x = jax.random.normal(kx, (B, T, F), dtype=jnp.float32)

    params = init_params(kp, output_dims=output_dims, depth=depth,
                         hidden_dims=hidden_dims, p_hidden_dims=p_hidden_dims,
                         p_output_dims=p_output_dims)

    fwd = jax.jit(functools.partial(
        ft_classifier_forward, hidden_dims=hidden_dims, output_dims=output_dims,
        depth=depth, p_hidden_dims=p_hidden_dims, p_output_dims=p_output_dims,
        batch_per_step=1))

    y = fwd(params, x)
    jax.block_until_ready(y)
    assert y.shape == (B, p_output_dims)
    assert bool(jnp.all(jnp.isfinite(y)))
    print("KERNEL_OK")
</pallas_src>

<mosaic_0001>
module attributes {stable_mosaic.version = 11 : i64} {
  func.func @kernel(%arg0: i32, %arg1: memref<96x1xf32, #tpu.memory_space<vmem>>, %arg2: memref<896x128xbf16, #tpu.memory_space<vmem>>, %arg3: memref<24x128xf32, #tpu.memory_space<vmem>>, %arg4: memref<1x1x128xf32, #tpu.memory_space<vmem>>, %arg5: memref<112x96xf32, #tpu.memory_space<vmem>>) attributes {dimension_semantics = [#tpu.dimension_semantics<parallel>], iteration_bounds = array<i64: 2>, scalar_prefetch = 0 : i64, scratch_operands = 1 : i64, tpu.core_type = #tpu.core_type<tc>, window_params = [{transform_indices = @transform_0, window_bounds = array<i64: 96, 1>}, {pipeline_mode = #tpu.pipeline_mode<synchronous>, transform_indices = @transform_1, window_bounds = array<i64: 896, 128>}, {pipeline_mode = #tpu.pipeline_mode<synchronous>, transform_indices = @transform_2, window_bounds = array<i64: 24, 128>}, {transform_indices = @transform_3, window_bounds = array<i64: 1, 1, 128>}]} {
    %0 = tpu.iota {dimensions = array<i32: 0>} : vector<96x1xi32>
    %c24_i32 = arith.constant 24 : i32
    %c0_i32 = arith.constant 0 : i32
    %1 = arith.cmpi eq, %c24_i32, %c0_i32 : i32
    %c1_i32 = arith.constant 1 : i32
    %2 = arith.select %1, %c1_i32, %c24_i32 : i32
    %3 = vector.broadcast %2 : i32 to vector<96x1xi32>
    %4 = arith.remsi %0, %3 : vector<96x1xi32>
    %c0_i32_0 = arith.constant 0 : i32
    %5 = vector.broadcast %c0_i32_0 : i32 to vector<96x1xi32>
    %6 = arith.cmpi ne, %4, %5 : vector<96x1xi32>
    %c0_i32_1 = arith.constant 0 : i32
    %7 = vector.broadcast %c0_i32_1 : i32 to vector<96x1xi32>
    %8 = arith.cmpi slt, %4, %7 : vector<96x1xi32>
    %c0_i32_2 = arith.constant 0 : i32
    %9 = arith.cmpi slt, %2, %c0_i32_2 : i32
    %10 = vector.broadcast %9 : i1 to vector<96x1xi1>
    %11 = vector.broadcast %10 : vector<96x1xi1> to vector<96x1xi1>
    %12 = arith.xori %8, %11 : vector<96x1xi1>
    %13 = arith.andi %12, %6 : vector<96x1xi1>
    %14 = vector.broadcast %2 : i32 to vector<96x1xi32>
    %15 = arith.addi %4, %14 : vector<96x1xi32>
    %16 = arith.select %13, %15, %4 : vector<96x1xi1>, vector<96x1xi32>
    %c16_i32 = arith.constant 16 : i32
    %17 = vector.broadcast %c16_i32 : i32 to vector<96x1xi32>
    %18 = arith.cmpi slt, %16, %17 : vector<96x1xi32>
    %19 = arith.extui %18 : vector<96x1xi1> to vector<96x1xi32>
    %20 = arith.sitofp %19 : vector<96x1xi32> to vector<96x1xf32>
    %cst = arith.constant 0.000000e+00 : f32
    %21 = vector.broadcast %cst : f32 to vector<8x96xf32>
    %c0 = arith.constant 0 : index
    %c0_3 = arith.constant 0 : index
    %22 = vector.load %arg5[%c0, %c0_3] : memref<112x96xf32, #tpu.memory_space<vmem>>, vector<8x96xf32>
    tpu.vector_store %arg5[%c0, %c0_3], %21 {strides = array<i32>} : memref<112x96xf32, #tpu.memory_space<vmem>>, vector<8x96xf32>,
    %cst_4 = arith.constant 0.000000e+00 : f32
    %23 = vector.broadcast %cst_4 : f32 to vector<8x96xf32>
    %c104 = arith.constant 104 : index
    %c0_5 = arith.constant 0 : index
    %24 = vector.load %arg5[%c104, %c0_5] : memref<112x96xf32, #tpu.memory_space<vmem>>, vector<8x96xf32>
    tpu.vector_store %arg5[%c104, %c0_5], %23 {strides = array<i32>} : memref<112x96xf32, #tpu.memory_space<vmem>>, vector<8x96xf32>,
    %c0_6 = arith.constant 0 : index
    %c0_7 = arith.constant 0 : index
    %25 = vector.load %arg1[%c0_6, %c0_7] : memref<96x1xf32, #tpu.memory_space<vmem>>, vector<96x1xf32>
    %c0_8 = arith.constant 0 : index
    %c0_9 = arith.constant 0 : index
    %26 = vector.load %arg3[%c0_8, %c0_9] : memref<24x128xf32, #tpu.memory_space<vmem>>, vector<1x32xf32>
    %27 = vector.broadcast %25 : vector<96x1xf32> to vector<96x32xf32>
    %28 = vector.broadcast %26 : vector<1x32xf32> to vector<96x32xf32>
    %29 = arith.mulf %27, %28 : vector<96x32xf32>
    %c1 = arith.constant 1 : index
    %c0_10 = arith.constant 0 : index
    %30 = vector.load %arg3[%c1, %c0_10] : memref<24x128xf32, #tpu.memory_space<vmem>>, vector<1x32xf32>
    %31 = vector.broadcast %30 : vector<1x32xf32> to vector<96x32xf32>
    %32 = arith.addf %29, %31 : vector<96x32xf32>
    %cst_11 = arith.constant 5.000000e-01 : f32
    %33 = vector.broadcast %cst_11 : f32 to vector<96x32xf32>
    %34 = arith.mulf %33, %32 : vector<96x32xf32>
    %cst_12 = arith.constant 4.471500e-02 : f32
    %35 = vector.broadcast %cst_12 : f32 to vector<96x32xf32>
    %36 = arith.mulf %35, %32 : vector<96x32xf32>
    %37 = arith.mulf %36, %32 : vector<96x32xf32>
    %38 = arith.mulf %37, %32 : vector<96x32xf32>
    %39 = arith.addf %32, %38 : vector<96x32xf32>
    %cst_13 = arith.constant 0.797884583 : f32
    %40 = vector.broadcast %cst_13 : f32 to vector<96x32xf32>
    %41 = arith.mulf %40, %39 : vector<96x32xf32>
    %42 = math.tanh %41 : vector<96x32xf32>
    %cst_14 = arith.constant 1.000000e+00 : f32
    %43 = vector.broadcast %cst_14 : f32 to vector<96x32xf32>
    %44 = arith.addf %43, %42 : vector<96x32xf32>
    %45 = arith.mulf %34, %44 : vector<96x32xf32>
    %46 = vector.broadcast %20 : vector<96x1xf32> to vector<96x32xf32>
    %47 = arith.mulf %45, %46 : vector<96x32xf32>
    %c8 = arith.constant 8 : index
    %c32 = arith.constant 32 : index
    %48 = vector.load %arg5[%c8, %c32] : memref<112x96xf32, #tpu.memory_space<vmem>>, vector<96x32xf32>
    tpu.vector_store %arg5[%c8, %c32], %47 {strides = array<i32>} : memref<112x96xf32, #tpu.memory_space<vmem>>, vector<96x32xf32>,
    %c7 = arith.constant 7 : index
    %c32_15 = arith.constant 32 : index
    %49 = vector.load %arg5[%c7, %c32_15] : memref<112x96xf32, #tpu.memory_space<vmem>>, vector<96x32xf32>
    %c9 = arith.constant 9 : index
    %c32_16 = arith.constant 32 : index
    %50 = vector.load %arg5[%c9, %c32_16] : memref<112x96xf32, #tpu.memory_space<vmem>>, vector<96x32xf32>
    %c8_17 = arith.constant 8 : index
    %c0_18 = arith.constant 0 : index
    %51 = vector.load %arg5[%c8_17, %c0_18] : memref<112x96xf32, #tpu.memory_space<vmem>>, vector<96x32xf32>
    tpu.vector_store %arg5[%c8_17, %c0_18], %49 {strides = array<i32>} : memref<112x96xf32, #tpu.memory_space<vmem>>, vector<96x32xf32>,
    %c8_19 = arith.constant 8 : index
    %c64 = arith.constant 64 : index
    %52 = vector.load %arg5[%c8_19, %c64] : memref<112x96xf32, #tpu.memory_space<vmem>>, vector<96x32xf32>
    tpu.vector_store %arg5[%c8_19, %c64], %50 {strides = array<i32>} : memref<112x96xf32, #tpu.memory_space<vmem>>, vector<96x32xf32>,
    %c8_20 = arith.constant 8 : index
    %c0_21 = arith.constant 0 : index
    %53 = vector.load %arg5[%c8_20, %c0_21] : memref<112x96xf32, #tpu.memory_space<vmem>>, vector<96x96xf32>
    %54 = arith.truncf %53 : vector<96x96xf32> to vector<96x96xbf16>
    %c0_22 = arith.constant 0 : index
    %c0_23 = arith.constant 0 : index
    %55 = vector.load %arg2[%c0_22, %c0_23] : memref<896x128xbf16, #tpu.memory_space<vmem>>, vector<96x32xbf16>
    %cst_24 = arith.constant dense<0.000000e+00> : vector<96x32xf32>
    %56 = tpu.matmul %54, %55, %cst_24 {dimension_numbers = #tpu.dot_dimension_numbers<[1], [0], [0], [1], [0, 0, 1, 1], [], []>} : vector<96x96xbf16>, vector<96x32xbf16>, vector<96x32xf32> -> vector<96x32xf32>
    %c2 = arith.constant 2 : index
    %c0_25 = arith.constant 0 : index
    %57 = vector.load %arg3[%c2, %c0_25] : memref<24x128xf32, #tpu.memory_space<vmem>>, vector<1x32xf32>
    %58 = vector.broadcast %57 : vector<1x32xf32> to vector<96x32xf32>
    %59 = arith.addf %56, %58 : vector<96x32xf32>
    %cst_26 = arith.constant 5.000000e-01 : f32
    %60 = vector.broadcast %cst_26 : f32 to vector<96x32xf32>
    %61 = arith.mulf %60, %59 : vector<96x32xf32>
    %cst_27 = arith.constant 4.471500e-02 : f32
    %62 = vector.broadcast %cst_27 : f32 to vector<96x32xf32>
    %63 = arith.mulf %62, %59 : vector<96x32xf32>
    %64 = arith.mulf %63, %59 : vector<96x32xf32>
    %65 = arith.mulf %64, %59 : vector<96x32xf32>
    %66 = arith.addf %59, %65 : vector<96x32xf32>
    %cst_28 = arith.constant 0.797884583 : f32
    %67 = vector.broadcast %cst_28 : f32 to vector<96x32xf32>
    %68 = arith.mulf %67, %66 : vector<96x32xf32>
    %69 = math.tanh %68 : vector<96x32xf32>
    %cst_29 = arith.constant 1.000000e+00 : f32
    %70 = vector.broadcast %cst_29 : f32 to vector<96x32xf32>
    %71 = arith.addf %70, %69 : vector<96x32xf32>
    %72 = arith.mulf %61, %71 : vector<96x32xf32>
    %73 = vector.broadcast %20 : vector<96x1xf32> to vector<96x32xf32>
    %74 = arith.mulf %72, %73 : vector<96x32xf32>
    %c8_30 = arith.constant 8 : index
    %c32_31 = arith.constant 32 : index
    %75 = vector.load %arg5[%c8_30, %c32_31] : memref<112x96xf32, #tpu.memory_space<vmem>>, vector<96x32xf32>
    tpu.vector_store %arg5[%c8_30, %c32_31], %74 {strides = array<i32>} : memref<112x96xf32, #tpu.memory_space<vmem>>, vector<96x32xf32>,
    %c7_32 = arith.constant 7 : index
    %c32_33 = arith.constant 32 : index
    %76 = vector.load %arg5[%c7_32, %c32_33] : memref<112x96xf32, #tpu.memory_space<vmem>>, vector<96x32xf32>
    %c9_34 = arith.constant 9 : index
    %c32_35 = arith.constant 32 : index
    %77 = vector.load %arg5[%c9_34, %c32_35] : memref<112x96xf32, #tpu.memory_space<vmem>>, vector<96x32xf32>
    %c8_36 = arith.constant 8 : index
    %c0_37 = arith.constant 0 : index
    %78 = vector.load %arg5[%c8_36, %c0_37] : memref<112x96xf32, #tpu.memory_space<vmem>>, vector<96x32xf32>
    tpu.vector_store %arg5[%c8_36, %c0_37], %76 {strides = array<i32>} : memref<112x96xf32, #tpu.memory_space<vmem>>, vector<96x32xf32>,
    %c8_38 = arith.constant 8 : index
    %c64_39 = arith.constant 64 : index
    %79 = vector.load %arg5[%c8_38, %c64_39] : memref<112x96xf32, #tpu.memory_space<vmem>>, vector<96x32xf32>
    tpu.vector_store %arg5[%c8_38, %c64_39], %77 {strides = array<i32>} : memref<112x96xf32, #tpu.memory_space<vmem>>, vector<96x32xf32>,
    %c8_40 = arith.constant 8 : index
    %c0_41 = arith.constant 0 : index
    %80 = vector.load %arg5[%c8_40, %c0_41] : memref<112x96xf32, #tpu.memory_space<vmem>>, vector<96x96xf32>
    %81 = arith.truncf %80 : vector<96x96xf32> to vector<96x96xbf16>
    %c96 = arith.constant 96 : index
    %c0_42 = arith.constant 0 : index
    %82 = vector.load %arg2[%c96, %c0_42] : memref<896x128xbf16, #tpu.memory_space<vmem>>, vector<96x32xbf16>
    %cst_43 = arith.constant dense<0.000000e+00> : vector<96x32xf32>
    %83 = tpu.matmul %81, %82, %cst_43 {dimension_numbers = #tpu.dot_dimension_numbers<[1], [0], [0], [1], [0, 0, 1, 1], [], []>} : vector<96x96xbf16>, vector<96x32xbf16>, vector<96x32xf32> -> vector<96x32xf32>
    %c3 = arith.constant 3 : index
    %c0_44 = arith.constant 0 : index
    %84 = vector.load %arg3[%c3, %c0_44] : memref<24x128xf32, #tpu.memory_space<vmem>>, vector<1x32xf32>
    %85 = vector.broadcast %84 : vector<1x32xf32> to vector<96x32xf32>
    %86 = arith.addf %83, %85 : vector<96x32xf32>
    %87 = arith.addf %86, %32 : vector<96x32xf32>
    %cst_45 = arith.constant 5.000000e-01 : f32
    %88 = vector.broadcast %cst_45 : f32 to vector<96x32xf32>
    %89 = arith.mulf %88, %87 : vector<96x32xf32>
    %cst_46 = arith.constant 4.471500e-02 : f32
    %90 = vector.broadcast %cst_46 : f32 to vector<96x32xf32>
    %91 = arith.mulf %90, %87 : vector<96x32xf32>
    %92 = arith.mulf %91, %87 : vector<96x32xf32>
    %93 = arith.mulf %92, %87 : vector<96x32xf32>
    %94 = arith.addf %87, %93 : vector<96x32xf32>
    %cst_47 = arith.constant 0.797884583 : f32
    %95 = vector.broadcast %cst_47 : f32 to vector<96x32xf32>
    %96 = arith.mulf %95, %94 : vector<96x32xf32>
    %97 = math.tanh %96 : vector<96x32xf32>
    %cst_48 = arith.constant 1.000000e+00 : f32
    %98 = vector.broadcast %cst_48 : f32 to vector<96x32xf32>
    %99 = arith.addf %98, %97 : vector<96x32xf32>
    %100 = arith.mulf %89, %99 : vector<96x32xf32>
    %101 = vector.broadcast %20 : vector<96x1xf32> to vector<96x32xf32>
    %102 = arith.mulf %100, %101 : vector<96x32xf32>
    %c8_49 = arith.constant 8 : index
    %c32_50 = arith.constant 32 : index
    %103 = vector.load %arg5[%c8_49, %c32_50] : memref<112x96xf32, #tpu.memory_space<vmem>>, vector<96x32xf32>
    tpu.vector_store %arg5[%c8_49, %c32_50], %102 {strides = array<i32>} : memref<112x96xf32, #tpu.memory_space<vmem>>, vector<96x32xf32>,
    %c6 = arith.constant 6 : index
    %c32_51 = arith.constant 32 : index
    %104 = vector.load %arg5[%c6, %c32_51] : memref<112x96xf32, #tpu.memory_space<vmem>>, vector<96x32xf32>
    %c10 = arith.constant 10 : index
    %c32_52 = arith.constant 32 : index
    %105 = vector.load %arg5[%c10, %c32_52] : memref<112x96xf32, #tpu.memory_space<vmem>>, vector<96x32xf32>
    %c8_53 = arith.constant 8 : index
    %c0_54 = arith.constant 0 : index
    %106 = vector.load %arg5[%c8_53, %c0_54] : memref<112x96xf32, #tpu.memory_space<vmem>>, vector<96x32xf32>
    tpu.vector_store %arg5[%c8_53, %c0_54], %104 {strides = array<i32>} : memref<112x96xf32, #tpu.memory_space<vmem>>, vector<96x32xf32>,
    %c8_55 = arith.constant 8 : index
    %c64_56 = arith.constant 64 : index
    %107 = vector.load %arg5[%c8_55, %c64_56] : memref<112x96xf32, #tpu.memory_space<vmem>>, vector<96x32xf32>
    tpu.vector_store %arg5[%c8_55, %c64_56], %105 {strides = array<i32>} : memref<112x96xf32, #tpu.memory_space<vmem>>, vector<96x32xf32>,
    %c8_57 = arith.constant 8 : index
    %c0_58 = arith.constant 0 : index
    %108 = vector.load %arg5[%c8_57, %c0_58] : memref<112x96xf32, #tpu.memory_space<vmem>>, vector<96x96xf32>
    %109 = arith.truncf %108 : vector<96x96xf32> to vector<96x96xbf16>
    %c192 = arith.constant 192 : index
    %c0_59 = arith.constant 0 : index
    %110 = vector.load %arg2[%c192, %c0_59] : memref<896x128xbf16, #tpu.memory_space<vmem>>, vector<96x32xbf16>
    %cst_60 = arith.constant dense<0.000000e+00> : vector<96x32xf32>
    %111 = tpu.matmul %109, %110, %cst_60 {dimension_numbers = #tpu.dot_dimension_numbers<[1], [0], [0], [1], [0, 0, 1, 1], [], []>} : vector<96x96xbf16>, vector<96x32xbf16>, vector<96x32xf32> -> vector<96x32xf32>
    %c4 = arith.constant 4 : index
    %c0_61 = arith.constant 0 : index
    %112 = vector.load %arg3[%c4, %c0_61] : memref<24x128xf32, #tpu.memory_space<vmem>>, vector<1x32xf32>
    %113 = vector.broadcast %112 : vector<1x32xf32> to vector<96x32xf32>
    %114 = arith.addf %111, %113 : vector<96x32xf32>
    %cst_62 = arith.constant 5.000000e-01 : f32
    %115 = vector.broadcast %cst_62 : f32 to vector<96x32xf32>
    %116 = arith.mulf %115, %114 : vector<96x32xf32>
    %cst_63 = arith.constant 4.471500e-02 : f32
    %117 = vector.broadcast %cst_63 : f32 to vector<96x32xf32>
    %118 = arith.mulf %117, %114 : vector<96x32xf32>
    %119 = arith.mulf %118, %114 : vector<96x32xf32>
    %120 = arith.mulf %119, %114 : vector<96x32xf32>
    %121 = arith.addf %114, %120 : vector<96x32xf32>
    %cst_64 = arith.constant 0.797884583 : f32
    %122 = vector.broadcast %cst_64 : f32 to vector<96x32xf32>
    %123 = arith.mulf %122, %121 : vector<96x32xf32>
    %124 = math.tanh %123 : vector<96x32xf32>
    %cst_65 = arith.constant 1.000000e+00 : f32
    %125 = vector.broadcast %cst_65 : f32 to vector<96x32xf32>
    %126 = arith.addf %125, %124 : vector<96x32xf32>
    %127 = arith.mulf %116, %126 : vector<96x32xf32>
    %128 = vector.broadcast %20 : vector<96x1xf32> to vector<96x32xf32>
    %129 = arith.mulf %127, %128 : vector<96x32xf32>
    %c8_66 = arith.constant 8 : index
    %c32_67 = arith.constant 32 : index
    %130 = vector.load %arg5[%c8_66, %c32_67] : memref<112x96xf32, #tpu.memory_space<vmem>>, vector<96x32xf32>
    tpu.vector_store %arg5[%c8_66, %c32_67], %129 {strides = array<i32>} : memref<112x96xf32, #tpu.memory_space<vmem>>, vector<96x32xf32>,
    %c6_68 = arith.constant 6 : index
    %c32_69 = arith.constant 32 : index
    %131 = vector.load %arg5[%c6_68, %c32_69] : memref<112x96xf32, #tpu.memory_space<vmem>>, vector<96x32xf32>
    %c10_70 = arith.constant 10 : index
    %c32_71 = arith.constant 32 : index
    %132 = vector.load %arg5[%c10_70, %c32_71] : memref<112x96xf32, #tpu.memory_space<vmem>>, vector<96x32xf32>
    %c8_72 = arith.constant 8 : index
    %c0_73 = arith.constant 0 : index
    %133 = vector.load %arg5[%c8_72, %c0_73] : memref<112x96xf32, #tpu.memory_space<vmem>>, vector<96x32xf32>
    tpu.vector_store %arg5[%c8_72, %c0_73], %131 {strides = array<i32>} : memref<112x96xf32, #tpu.memory_space<vmem>>, vector<96x32xf32>,
    %c8_74 = arith.constant 8 : index
    %c64_75 = arith.constant 64 : index
    %134 = vector.load %arg5[%c8_74, %c64_75] : memref<112x96xf32, #tpu.memory_space<vmem>>, vector<96x32xf32>
    tpu.vector_store %arg5[%c8_74, %c64_75], %132 {strides = array<i32>} : memref<112x96xf32, #tpu.memory_space<vmem>>, vector<96x32xf32>,
    %c8_76 = arith.constant 8 : index
    %c0_77 = arith.constant 0 : index
    %135 = vector.load %arg5[%c8_76, %c0_77] : memref<112x96xf32, #tpu.memory_space<vmem>>, vector<96x96xf32>
    %136 = arith.truncf %135 : vector<96x96xf32> to vector<96x96xbf16>
    %c288 = arith.constant 288 : index
    %c0_78 = arith.constant 0 : index
    %137 = vector.load %arg2[%c288, %c0_78] : memref<896x128xbf16, #tpu.memory_space<vmem>>, vector<96x32xbf16>
    %cst_79 = arith.constant dense<0.000000e+00> : vector<96x32xf32>
    %138 = tpu.matmul %136, %137, %cst_79 {dimension_numbers = #tpu.dot_dimension_numbers<[1], [0], [0], [1], [0, 0, 1, 1], [], []>} : vector<96x96xbf16>, vector<96x32xbf16>, vector<96x32xf32> -> vector<96x32xf32>
    %c5 = arith.constant 5 : index
    %c0_80 = arith.constant 0 : index
    %139 = vector.load %arg3[%c5, %c0_80] : memref<24x128xf32, #tpu.memory_space<vmem>>, vector<1x32xf32>
    %140 = vector.broadcast %139 : vector<1x32xf32> to vector<96x32xf32>
    %141 = arith.addf %138, %140 : vector<96x32xf32>
    %142 = arith.addf %141, %87 : vector<96x32xf32>
    %cst_81 = arith.constant 5.000000e-01 : f32
    %143 = vector.broadcast %cst_81 : f32 to vector<96x32xf32>
    %144 = arith.mulf %143, %142 : vector<96x32xf32>
    %cst_82 = arith.constant 4.471500e-02 : f32
    %145 = vector.broadcast %cst_82 : f32 to vector<96x32xf32>
    %146 = arith.mulf %145, %142 : vector<96x32xf32>
    %147 = arith.mulf %146, %142 : vector<96x32xf32>
    %148 = arith.mulf %147, %142 : vector<96x32xf32>
    %149 = arith.addf %142, %148 : vector<96x32xf32>
    %cst_83 = arith.constant 0.797884583 : f32
    %150 = vector.broadcast %cst_83 : f32 to vector<96x32xf32>
    %151 = arith.mulf %150, %149 : vector<96x32xf32>
    %152 = math.tanh %151 : vector<96x32xf32>
    %cst_84 = arith.constant 1.000000e+00 : f32
    %153 = vector.broadcast %cst_84 : f32 to vector<96x32xf32>
    %154 = arith.addf %153, %152 : vector<96x32xf32>
    %155 = arith.mulf %144, %154 : vector<96x32xf32>
    %156 = vector.broadcast %20 : vector<96x1xf32> to vector<96x32xf32>
    %157 = arith.mulf %155, %156 : vector<96x32xf32>
    %c8_85 = arith.constant 8 : index
    %c32_86 = arith.constant 32 : index
    %158 = vector.load %arg5[%c8_85, %c32_86] : memref<112x96xf32, #tpu.memory_space<vmem>>, vector<96x32xf32>
    tpu.vector_store %arg5[%c8_85, %c32_86], %157 {strides = array<i32>} : memref<112x96xf32, #tpu.memory_space<vmem>>, vector<96x32xf32>,
    %c4_87 = arith.constant 4 : index
    %c32_88 = arith.constant 32 : index
    %159 = vector.load %arg5[%c4_87, %c32_88] : memref<112x96xf32, #tpu.memory_space<vmem>>, vector<96x32xf32>
    %c12 = arith.constant 12 : index
    %c32_89 = arith.constant 32 : index
    %160 = vector.load %arg5[%c12, %c32_89] : memref<112x96xf32, #tpu.memory_space<vmem>>, vector<96x32xf32>
    %c8_90 = arith.constant 8 : index
    %c0_91 = arith.constant 0 : index
    %161 = vector.load %arg5[%c8_90, %c0_91] : memref<112x96xf32, #tpu.memory_space<vmem>>, vector<96x32xf32>
    tpu.vector_store %arg5[%c8_90, %c0_91], %159 {strides = array<i32>} : memref<112x96xf32, #tpu.memory_space<vmem>>, vector<96x32xf32>,
    %c8_92 = arith.constant 8 : index
    %c64_93 = arith.constant 64 : index
    %162 = vector.load %arg5[%c8_92, %c64_93] : memref<112x96xf32, #tpu.memory_space<vmem>>, vector<96x32xf32>
    tpu.vector_store %arg5[%c8_92, %c64_93], %160 {strides = array<i32>} : memref<112x96xf32, #tpu.memory_space<vmem>>, vector<96x32xf32>,
    %c8_94 = arith.constant 8 : index
    %c0_95 = arith.constant 0 : index
    %163 = vector.load %arg5[%c8_94, %c0_95] : memref<112x96xf32, #tpu.memory_space<vmem>>, vector<96x96xf32>
    %164 = arith.truncf %163 : vector<96x96xf32> to vector<96x96xbf16>
    %c384 = arith.constant 384 : index
    %c0_96 = arith.constant 0 : index
    %165 = vector.load %arg2[%c384, %c0_96] : memref<896x128xbf16, #tpu.memory_space<vmem>>, vector<96x32xbf16>
    %cst_97 = arith.constant dense<0.000000e+00> : vector<96x32xf32>
    %166 = tpu.matmul %164, %165, %cst_97 {dimension_numbers = #tpu.dot_dimension_numbers<[1], [0], [0], [1], [0, 0, 1, 1], [], []>} : vector<96x96xbf16>, vector<96x32xbf16>, vector<96x32xf32> -> vector<96x32xf32>
    %c6_98 = arith.constant 6 : index
    %c0_99 = arith.constant 0 : index
    %167 = vector.load %arg3[%c6_98, %c0_99] : memref<24x128xf32, #tpu.memory_space<vmem>>, vector<1x32xf32>
    %168 = vector.broadcast %167 : vector<1x32xf32> to vector<96x32xf32>
    %169 = arith.addf %166, %168 : vector<96x32xf32>
    %cst_100 = arith.constant 5.000000e-01 : f32
    %170 = vector.broadcast %cst_100 : f32 to vector<96x32xf32>
    %171 = arith.mulf %170, %169 : vector<96x32xf32>
    %cst_101 = arith.constant 4.471500e-02 : f32
    %172 = vector.broadcast %cst_101 : f32 to vector<96x32xf32>
    %173 = arith.mulf %172, %169 : vector<96x32xf32>
    %174 = arith.mulf %173, %169 : vector<96x32xf32>
    %175 = arith.mulf %174, %169 : vector<96x32xf32>
    %176 = arith.addf %169, %175 : vector<96x32xf32>
    %cst_102 = arith.constant 0.797884583 : f32
    %177 = vector.broadcast %cst_102 : f32 to vector<96x32xf32>
    %178 = arith.mulf %177, %176 : vector<96x32xf32>
    %179 = math.tanh %178 : vector<96x32xf32>
    %cst_103 = arith.constant 1.000000e+00 : f32
    %180 = vector.broadcast %cst_103 : f32 to vector<96x32xf32>
    %181 = arith.addf %180, %179 : vector<96x32xf32>
    %182 = arith.mulf %171, %181 : vector<96x32xf32>
    %183 = vector.broadcast %20 : vector<96x1xf32> to vector<96x32xf32>
    %184 = arith.mulf %182, %183 : vector<96x32xf32>
    %c8_104 = arith.constant 8 : index
    %c32_105 = arith.constant 32 : index
    %185 = vector.load %arg5[%c8_104, %c32_105] : memref<112x96xf32, #tpu.memory_space<vmem>>, vector<96x32xf32>
    tpu.vector_store %arg5[%c8_104, %c32_105], %184 {strides = array<i32>} : memref<112x96xf32, #tpu.memory_space<vmem>>, vector<96x32xf32>,
    %c4_106 = arith.constant 4 : index
    %c32_107 = arith.constant 32 : index
    %186 = vector.load %arg5[%c4_106, %c32_107] : memref<112x96xf32, #tpu.memory_space<vmem>>, vector<96x32xf32>
    %c12_108 = arith.constant 12 : index
    %c32_109 = arith.constant 32 : index
    %187 = vector.load %arg5[%c12_108, %c32_109] : memref<112x96xf32, #tpu.memory_space<vmem>>, vector<96x32xf32>
    %c8_110 = arith.constant 8 : index
    %c0_111 = arith.constant 0 : index
    %188 = vector.load %arg5[%c8_110, %c0_111] : memref<112x96xf32, #tpu.memory_space<vmem>>, vector<96x32xf32>
    tpu.vector_store %arg5[%c8_110, %c0_111], %186 {strides = array<i32>} : memref<112x96xf32, #tpu.memory_space<vmem>>, vector<96x32xf32>,
    %c8_112 = arith.constant 8 : index
    %c64_113 = arith.constant 64 : index
    %189 = vector.load %arg5[%c8_112, %c64_113] : memref<112x96xf32, #tpu.memory_space<vmem>>, vector<96x32xf32>
    tpu.vector_store %arg5[%c8_112, %c64_113], %187 {strides = array<i32>} : memref<112x96xf32, #tpu.memory_space<vmem>>, vector<96x32xf32>,
    %c8_114 = arith.constant 8 : index
    %c0_115 = arith.constant 0 : index
    %190 = vector.load %arg5[%c8_114, %c0_115] : memref<112x96xf32, #tpu.memory_space<vmem>>, vector<96x96xf32>
    %191 = arith.truncf %190 : vector<96x96xf32> to vector<96x96xbf16>
    %c480 = arith.constant 480 : index
    %c0_116 = arith.constant 0 : index
    %192 = vector.load %arg2[%c480, %c0_116] : memref<896x128xbf16, #tpu.memory_space<vmem>>, vector<96x32xbf16>
    %cst_117 = arith.constant dense<0.000000e+00> : vector<96x32xf32>
    %193 = tpu.matmul %191, %192, %cst_117 {dimension_numbers = #tpu.dot_dimension_numbers<[1], [0], [0], [1], [0, 0, 1, 1], [], []>} : vector<96x96xbf16>, vector<96x32xbf16>, vector<96x32xf32> -> vector<96x32xf32>
    %c7_118 = arith.constant 7 : index
    %c0_119 = arith.constant 0 : index
    %194 = vector.load %arg3[%c7_118, %c0_119] : memref<24x128xf32, #tpu.memory_space<vmem>>, vector<1x32xf32>
    %195 = vector.broadcast %194 : vector<1x32xf32> to vector<96x32xf32>
    %196 = arith.addf %193, %195 : vector<96x32xf32>
    %197 = arith.addf %196, %142 : vector<96x32xf32>
    %198 = arith.truncf %197 : vector<96x32xf32> to vector<96x32xbf16>
    %c768 = arith.constant 768 : index
    %c0_120 = arith.constant 0 : index
    %199 = vector.load %arg2[%c768, %c0_120] : memref<896x128xbf16, #tpu.memory_space<vmem>>, vector<32x32xbf16>
    %cst_121 = arith.constant dense<0.000000e+00> : vector<96x32xf32>
    %200 = tpu.matmul %198, %199, %cst_121 {dimension_numbers = #tpu.dot_dimension_numbers<[1], [0], [0], [1], [0, 0, 1, 1], [], []>} : vector<96x32xbf16>, vector<32x32xbf16>, vector<96x32xf32> -> vector<96x32xf32>
    %c10_122 = arith.constant 10 : index
    %c0_123 = arith.constant 0 : index
    %201 = vector.load %arg3[%c10_122, %c0_123] : memref<24x128xf32, #tpu.memory_space<vmem>>, vector<1x32xf32>
    %202 = vector.broadcast %201 : vector<1x32xf32> to vector<96x32xf32>
    %203 = arith.addf %200, %202 : vector<96x32xf32>
    %cst_124 = arith.constant 5.000000e-01 : f32
    %204 = vector.broadcast %cst_124 : f32 to vector<96x32xf32>
    %205 = arith.mulf %204, %197 : vector<96x32xf32>
    %cst_125 = arith.constant 4.471500e-02 : f32
    %206 = vector.broadcast %cst_125 : f32 to vector<96x32xf32>
    %207 = arith.mulf %206, %197 : vector<96x32xf32>
    %208 = arith.mulf %207, %197 : vector<96x32xf32>
    %209 = arith.mulf %208, %197 : vector<96x32xf32>
    %210 = arith.addf %197, %209 : vector<96x32xf32>
    %cst_126 = arith.constant 0.797884583 : f32
    %211 = vector.broadcast %cst_126 : f32 to vector<96x32xf32>
    %212 = arith.mulf %211, %210 : vector<96x32xf32>
    %213 = math.tanh %212 : vector<96x32xf32>
    %cst_127 = arith.constant 1.000000e+00 : f32
    %214 = vector.broadcast %cst_127 : f32 to vector<96x32xf32>
    %215 = arith.addf %214, %213 : vector<96x32xf32>
    %216 = arith.mulf %205, %215 : vector<96x32xf32>
    %217 = vector.broadcast %20 : vector<96x1xf32> to vector<96x32xf32>
    %218 = arith.mulf %216, %217 : vector<96x32xf32>
    %c8_128 = arith.constant 8 : index
    %c32_129 = arith.constant 32 : index
    %219 = vector.load %arg5[%c8_128, %c32_129] : memref<112x96xf32, #tpu.memory_space<vmem>>, vector<96x32xf32>
    tpu.vector_store %arg5[%c8_128, %c32_129], %218 {strides = array<i32>} : memref<112x96xf32, #tpu.memory_space<vmem>>, vector<96x32xf32>,
    %c0_130 = arith.constant 0 : index
    %c32_131 = arith.constant 32 : index
    %220 = vector.load %arg5[%c0_130, %c32_131] : memref<112x96xf32, #tpu.memory_space<vmem>>, vector<96x32xf32>
    %c16 = arith.constant 16 : index
    %c32_132 = arith.constant 32 : index
    %221 = vector.load %arg5[%c16, %c32_132] : memref<112x96xf32, #tpu.memory_space<vmem>>, vector<96x32xf32>
    %c8_133 = arith.constant 8 : index
    %c0_134 = arith.constant 0 : index
    %222 = vector.load %arg5[%c8_133, %c0_134] : memref<112x96xf32, #tpu.memory_space<vmem>>, vector<96x32xf32>
    tpu.vector_store %arg5[%c8_133, %c0_134], %220 {strides = array<i32>} : memref<112x96xf32, #tpu.memory_space<vmem>>, vector<96x32xf32>,
    %c8_135 = arith.constant 8 : index
    %c64_136 = arith.constant 64 : index
    %223 = vector.load %arg5[%c8_135, %c64_136] : memref<112x96xf32, #tpu.memory_space<vmem>>, vector<96x32xf32>
    tpu.vector_store %arg5[%c8_135, %c64_136], %221 {strides = array<i32>} : memref<112x96xf32, #tpu.memory_space<vmem>>, vector<96x32xf32>,
    %c8_137 = arith.constant 8 : index
    %c0_138 = arith.constant 0 : index
    %224 = vector.load %arg5[%c8_137, %c0_138] : memref<112x96xf32, #tpu.memory_space<vmem>>, vector<96x96xf32>
    %225 = arith.truncf %224 : vector<96x96xf32> to vector<96x96xbf16>
    %c576 = arith.constant 576 : index
    %c0_139 = arith.constant 0 : index
    %226 = vector.load %arg2[%c576, %c0_139] : memref<896x128xbf16, #tpu.memory_space<vmem>>, vector<96x32xbf16>
    %cst_140 = arith.constant dense<0.000000e+00> : vector<96x32xf32>
    %227 = tpu.matmul %225, %226, %cst_140 {dimension_numbers = #tpu.dot_dimension_numbers<[1], [0], [0], [1], [0, 0, 1, 1], [], []>} : vector<96x96xbf16>, vector<96x32xbf16>, vector<96x32xf32> -> vector<96x32xf32>
    %c8_141 = arith.constant 8 : index
    %c0_142 = arith.constant 0 : index
    %228 = vector.load %arg3[%c8_141, %c0_142] : memref<24x128xf32, #tpu.memory_space<vmem>>, vector<1x32xf32>
    %229 = vector.broadcast %228 : vector<1x32xf32> to vector<96x32xf32>
    %230 = arith.addf %227, %229 : vector<96x32xf32>
    %cst_143 = arith.constant 5.000000e-01 : f32
    %231 = vector.broadcast %cst_143 : f32 to vector<96x32xf32>
    %232 = arith.mulf %231, %230 : vector<96x32xf32>
    %cst_144 = arith.constant 4.471500e-02 : f32
    %233 = vector.broadcast %cst_144 : f32 to vector<96x32xf32>
    %234 = arith.mulf %233, %230 : vector<96x32xf32>
    %235 = arith.mulf %234, %230 : vector<96x32xf32>
    %236 = arith.mulf %235, %230 : vector<96x32xf32>
    %237 = arith.addf %230, %236 : vector<96x32xf32>
    %cst_145 = arith.constant 0.797884583 : f32
    %238 = vector.broadcast %cst_145 : f32 to vector<96x32xf32>
    %239 = arith.mulf %238, %237 : vector<96x32xf32>
    %240 = math.tanh %239 : vector<96x32xf32>
    %cst_146 = arith.constant 1.000000e+00 : f32
    %241 = vector.broadcast %cst_146 : f32 to vector<96x32xf32>
    %242 = arith.addf %241, %240 : vector<96x32xf32>
    %243 = arith.mulf %232, %242 : vector<96x32xf32>
    %244 = vector.broadcast %20 : vector<96x1xf32> to vector<96x32xf32>
    %245 = arith.mulf %243, %244 : vector<96x32xf32>
    %c8_147 = arith.constant 8 : index
    %c32_148 = arith.constant 32 : index
    %246 = vector.load %arg5[%c8_147, %c32_148] : memref<112x96xf32, #tpu.memory_space<vmem>>, vector<96x32xf32>
    tpu.vector_store %arg5[%c8_147, %c32_148], %245 {strides = array<i32>} : memref<112x96xf32, #tpu.memory_space<vmem>>, vector<96x32xf32>,
    %c0_149 = arith.constant 0 : index
    %c32_150 = arith.constant 32 : index
    %247 = vector.load %arg5[%c0_149, %c32_150] : memref<112x96xf32, #tpu.memory_space<vmem>>, vector<96x32xf32>
    %c16_151 = arith.constant 16 : index
    %c32_152 = arith.constant 32 : index
    %248 = vector.load %arg5[%c16_151, %c32_152] : memref<112x96xf32, #tpu.memory_space<vmem>>, vector<96x32xf32>
    %c8_153 = arith.constant 8 : index
    %c0_154 = arith.constant 0 : index
    %249 = vector.load %arg5[%c8_153, %c0_154] : memref<112x96xf32, #tpu.memory_space<vmem>>, vector<96x32xf32>
    tpu.vector_store %arg5[%c8_153, %c0_154], %247 {strides = array<i32>} : memref<112x96xf32, #tpu.memory_space<vmem>>, vector<96x32xf32>,
    %c8_155 = arith.constant 8 : index
    %c64_156 = arith.constant 64 : index
    %250 = vector.load %arg5[%c8_155, %c64_156] : memref<112x96xf32, #tpu.memory_space<vmem>>, vector<96x32xf32>
    tpu.vector_store %arg5[%c8_155, %c64_156], %248 {strides = array<i32>} : memref<112x96xf32, #tpu.memory_space<vmem>>, vector<96x32xf32>,
    %c8_157 = arith.constant 8 : index
    %c0_158 = arith.constant 0 : index
    %251 = vector.load %arg5[%c8_157, %c0_158] : memref<112x96xf32, #tpu.memory_space<vmem>>, vector<96x96xf32>
    %252 = arith.truncf %251 : vector<96x96xf32> to vector<96x96xbf16>
    %c672 = arith.constant 672 : index
    %c0_159 = arith.constant 0 : index
    %253 = vector.load %arg2[%c672, %c0_159] : memref<896x128xbf16, #tpu.memory_space<vmem>>, vector<96x32xbf16>
    %cst_160 = arith.constant dense<0.000000e+00> : vector<96x32xf32>
    %254 = tpu.matmul %252, %253, %cst_160 {dimension_numbers = #tpu.dot_dimension_numbers<[1], [0], [0], [1], [0, 0, 1, 1], [], []>} : vector<96x96xbf16>, vector<96x32xbf16>, vector<96x32xf32> -> vector<96x32xf32>
    %c9_161 = arith.constant 9 : index
    %c0_162 = arith.constant 0 : index
    %255 = vector.load %arg3[%c9_161, %c0_162] : memref<24x128xf32, #tpu.memory_space<vmem>>, vector<1x32xf32>
    %256 = vector.broadcast %255 : vector<1x32xf32> to vector<96x32xf32>
    %257 = arith.addf %254, %256 : vector<96x32xf32>
    %258 = arith.addf %257, %203 : vector<96x32xf32>
    %259 = vector.extract_strided_slice %258 {offsets = [0, 0], sizes = [16, 32], strides = [1, 1]} : vector<96x32xf32> to vector<16x32xf32>
    %cst_163 = arith.constant dense<0xFF800000> : vector<32xf32>
    %260 = vector.multi_reduction <maximumf>, %259, %cst_163 [0] : vector<16x32xf32> to vector<32xf32>
    %261 = vector.shape_cast %260 : vector<32xf32> to vector<1x32xf32>
    %262 = vector.extract_strided_slice %258 {offsets = [24, 0], sizes = [16, 32], strides = [1, 1]} : vector<96x32xf32> to vector<16x32xf32>
    %cst_164 = arith.constant dense<0xFF800000> : vector<32xf32>
    %263 = vector.multi_reduction <maximumf>, %262, %cst_164 [0] : vector<16x32xf32> to vector<32xf32>
    %264 = vector.shape_cast %263 : vector<32xf32> to vector<1x32xf32>
    %265 = arith.addf %261, %264 : vector<1x32xf32>
    %266 = vector.extract_strided_slice %258 {offsets = [48, 0], sizes = [16, 32], strides = [1, 1]} : vector<96x32xf32> to vector<16x32xf32>
    %cst_165 = arith.constant dense<0xFF800000> : vector<32xf32>
    %267 = vector.multi_reduction <maximumf>, %266, %cst_165 [0] : vector<16x32xf32> to vector<32xf32>
    %268 = vector.shape_cast %267 : vector<32xf32> to vector<1x32xf32>
    %269 = arith.addf %265, %268 : vector<1x32xf32>
    %270 = vector.extract_strided_slice %258 {offsets = [72, 0], sizes = [16, 32], strides = [1, 1]} : vector<96x32xf32> to vector<16x32xf32>
    %cst_166 = arith.constant dense<0xFF800000> : vector<32xf32>
    %271 = vector.multi_reduction <maximumf>, %270, %cst_166 [0] : vector<16x32xf32> to vector<32xf32>
    %272 = vector.shape_cast %271 : vector<32xf32> to vector<1x32xf32>
    %273 = arith.addf %269, %272 : vector<1x32xf32>
    %274 = arith.truncf %273 : vector<1x32xf32> to vector<1x32xbf16>
    %c800 = arith.constant 800 : index
    %c0_167 = arith.constant 0 : index
    %275 = vector.load %arg2[%c800, %c0_167] : memref<896x128xbf16, #tpu.memory_space<vmem>>, vector<32x64xbf16>
    %cst_168 = arith.constant dense<0.000000e+00> : vector<1x64xf32>
    %276 = tpu.matmul %274, %275, %cst_168 {dimension_numbers = #tpu.dot_dimension_numbers<[1], [0], [0], [1], [0, 0, 1, 1], [], []>} : vector<1x32xbf16>, vector<32x64xbf16>, vector<1x64xf32> -> vector<1x64xf32>
    %c11 = arith.constant 11 : index
    %c0_169 = arith.constant 0 : index
    %277 = vector.load %arg3[%c11, %c0_169] : memref<24x128xf32, #tpu.memory_space<vmem>>, vector<1x64xf32>
    %278 = arith.addf %276, %277 : vector<1x64xf32>
    %c14 = arith.constant 14 : index
    %c0_170 = arith.constant 0 : index
    %279 = vector.load %arg3[%c14, %c0_170] : memref<24x128xf32, #tpu.memory_space<vmem>>, vector<1x64xf32>
    %280 = arith.subf %278, %279 : vector<1x64xf32>
    %c15 = arith.constant 15 : index
    %c0_171 = arith.constant 0 : index
    %281 = vector.load %arg3[%c15, %c0_171] : memref<24x128xf32, #tpu.memory_space<vmem>>, vector<1x64xf32>
    %cst_172 = arith.constant 9.99999974E-6 : f32
    %282 = vector.broadcast %cst_172 : f32 to vector<1x64xf32>
    %283 = arith.addf %281, %282 : vector<1x64xf32>
    %284 = math.rsqrt %283 : vector<1x64xf32>
    %285 = arith.mulf %280, %284 : vector<1x64xf32>
    %c12_173 = arith.constant 12 : index
    %c0_174 = arith.constant 0 : index
    %286 = vector.load %arg3[%c12_173, %c0_174] : memref<24x128xf32, #tpu.memory_space<vmem>>, vector<1x64xf32>
    %287 = arith.mulf %285, %286 : vector<1x64xf32>
    %c13 = arith.constant 13 : index
    %c0_175 = arith.constant 0 : index
    %288 = vector.load %arg3[%c13, %c0_175] : memref<24x128xf32, #tpu.memory_space<vmem>>, vector<1x64xf32>
    %289 = arith.addf %287, %288 : vector<1x64xf32>
    %cst_176 = arith.constant 0.000000e+00 : f32
    %290 = vector.broadcast %cst_176 : f32 to vector<1x64xf32>
    %291 = arith.maximumf %289, %290 : vector<1x64xf32>
    %292 = arith.truncf %291 : vector<1x64xf32> to vector<1x64xbf16>
    %c832 = arith.constant 832 : index
    %c0_177 = arith.constant 0 : index
    %293 = vector.load %arg2[%c832, %c0_177] : memref<896x128xbf16, #tpu.memory_space<vmem>>, vector<64x128xbf16>
    %cst_178 = arith.constant dense<0.000000e+00> : vector<1x128xf32>
    %294 = tpu.matmul %292, %293, %cst_178 {dimension_numbers = #tpu.dot_dimension_numbers<[1], [0], [0], [1], [0, 0, 1, 1], [], []>} : vector<1x64xbf16>, vector<64x128xbf16>, vector<1x128xf32> -> vector<1x128xf32>
    %c16_179 = arith.constant 16 : index
    %c0_180 = arith.constant 0 : index
    %295 = vector.load %arg3[%c16_179, %c0_180] : memref<24x128xf32, #tpu.memory_space<vmem>>, vector<1x128xf32>
    %296 = arith.addf %294, %295 : vector<1x128xf32>
    %c0_181 = arith.constant 0 : index
    %c0_182 = arith.constant 0 : index
    %c0_183 = arith.constant 0 : index
    %297 = vector.load %arg4[%c0_181, %c0_182, %c0_183] : memref<1x1x128xf32, #tpu.memory_space<vmem>>, vector<1x1x128xf32>
    %298 = vector.shape_cast %297 : vector<1x1x128xf32> to vector<1x128xf32>
    %299 = vector.shape_cast %296 : vector<1x128xf32> to vector<1x1x128xf32>
    tpu.vector_store %arg4[%c0_181, %c0_182, %c0_183], %299 {strides = array<i32>} : memref<1x1x128xf32, #tpu.memory_space<vmem>>, vector<1x1x128xf32>,
    return
  }
  func.func @transform_0(%arg0: i32) -> (i32, i32) {
    %c0_i32 = arith.constant 0 : i32
    %c0_i32_0 = arith.constant 0 : i32
    return %arg0, %c0_i32 : i32, i32
  }
  func.func @transform_1(%arg0: i32) -> (i32, i32) {
    %c0_i32 = arith.constant 0 : i32
    %c0_i32_0 = arith.constant 0 : i32
    %c0_i32_1 = arith.constant 0 : i32
    return %c0_i32, %c0_i32_0 : i32, i32
  }
  func.func @transform_2(%arg0: i32) -> (i32, i32) {
    %c0_i32 = arith.constant 0 : i32
    %c0_i32_0 = arith.constant 0 : i32
    %c0_i32_1 = arith.constant 0 : i32
    return %c0_i32, %c0_i32_0 : i32, i32
  }
  func.func @transform_3(%arg0: i32) -> (i32, i32, i32) {
    %c0_i32 = arith.constant 0 : i32
    %c0_i32_0 = arith.constant 0 : i32
    %c0_i32_1 = arith.constant 0 : i32
    return %arg0, %c0_i32, %c0_i32_0 : i32, i32, i32
  }
}

</mosaic_0001>

<bundles_post_ra>
// kernel: ft_classifier_forward.1
= control target key start
LH: loop header
LB: loop body
LE: loop exit
PB: predicated region body
PF: predicated region fallthrough
CT: control target
= control target key end

     0   :  { %8 = vsyncpa [#allocation4], 0  ;;  %s7037_s0 = inlined_call_operand.vmem [shape: f32[192,1], index: 0, kind: input, shape index: {}]   ;;  %s7038_s1 = inlined_call_operand.vmem [shape: bf16[896,128], index: 1, kind: input, shape index: {}]   ;;  %s7039_s2 = inlined_call_operand.vmem [shape: f32[24,128], index: 2, kind: input, shape index: {}]   ;;  %s7040_s3 = inlined_call_operand.hbm [shape: f32[2,1,128], index: 3, kind: output, shape index: {}]  }
   0x1   :  { %10 = vsyncpa [#allocation4 + $0x1], 0  ;;  %s5284_s12 = smov 0   ;;  %s5286_s13 = smov 0  }
   0x2   :  { %s5288_s14 = smov 0   ;;  %s5290_s15 = smov 0  }
   0x3 LB: > { %s5305_s16 = sadd.s32 4294967295, %s5258_s15   ;;  %s4572_s17 = sadd.s32 4294967294, %s5258_s15   ;;  %s5258_s15 = sphi %s5290_s15, %s7064_s15   ;;  %s5254_s14 = sphi %s5288_s14, %s7063_s14   ;;  %s5250_s13 = sphi %s5286_s13, %s7062_s13   ;;  %s5246_s12 = sphi %s5284_s12, %s7061_s12  }
   0x4   : > { %s5309_s18 = sadd.s32 1, %s5258_s15   ;;  %s91_s19 = sadd.s32 1, %s5254_s14 }
   0x5   : > { %s88_s20 = ssub.s32 %s5258_s15, %s5309_s18  ;;  %p101_p0 = scmp.ne.s32.totalorder %s5254_s14, %s5250_s13 }
   0x6   : > { %p89_p1 = scmp.eq.s32.totalorder %s88_s20, 0  ;;  %p102_p2 = scmp.eq.s32.totalorder %s5305_s16, 1 }
   0x7   : > { %p107_p3 = scmp.ne.s32.totalorder %s5250_s13, %s5246_s12  ;;  %p108_p4 = scmp.eq.s32.totalorder %s4572_s17, 1 }
   0x8   : > { %s5320_s21 = scalar_select %p89_p1, %s5254_s14, %s91_s19  }
   0x9   : > { %p5322_p5 = por %p102_p2, %p101_p0  ;;  %p5326_p6 = por %p108_p4, %p107_p3 }
   0xa   : > { %p4575_p7 = scmp.ge.s32.totalorder %s5258_s15, 1  ;;  %p141_p8 = scmp.lt.s32.totalorder %s5258_s15, 3 }
   0xc   : > { %p142_p9 = pnand %p4575_p7, %p141_p8 }
   0xd   : > { %s164_s24 = smul.u32 (!%p142_p9), 12, %s5305_s16  ;;  %s5262_s6 = smov (!%p142_p9), 32  }
   0xe   : > { %145 = sbr.rel (%p142_p9) target bundleno = 3991 (0xf97), region = 32  ;;  %s5263_s7 = smov (!%p142_p9), 96  }
   0xf   : > { %p165_p10 = scmp.lt.s32.totalorder (!%p142_p9), %s164_s24, 23  ;;  %s5216_s11 = scalar_lea.hbm (!%p142_p9), %s7040_s3, 2 }
  0x13   : > { %v5260_v0 = vmov 0   ;;  %s7066_s24 = smov (!%p165_p10, %s164_s24), 23  ;;  %v171_v12 = vlaneseq  ;;  %v5376_v56 = vld [vmem:[%s7039_s2] ss:$0 sm:$0xff]  ;;  %vm628_vm12 = vcmask 785408  }
  0x14   : > { %4989 = vset.pattern.permute.xlu1 %v5260_v0  ;;  %4988 = vset.pattern.permute.xlu0 %v5260_v0  ;;  %s4576_s25 = sshll.u32 %s7066_s24, 3 }
  0x15   : > { %4990 = vset.pattern.permute.xlu2 %v5260_v0  ;;  %s5339_s28 = scalar_lea.vmem %s7037_s0, %s4576_s25  ;;  %v5352_v13 = vshrl.u32 %v171_v12, 7  ;;  %s162_s25 = sand.u32 1, %s5250_s13  }
  0x16   : > { %v633_v1 = vld [vmem:[%s5339_s28 + $0x10] sm:$0xff]  ;;  %v631_v2 = vld [vmem:[%s5339_s28] sm:$0xff]  ;;  %v634_v4 = vld [vmem:[%s5339_s28 + $0x18] sm:$0xff]  ;;  %s163_s4 = scalar_lea.vmem [#allocation3], %s162_s25  ;;  %s4505_s9 = scalar_lea.sflag [#allocation4], %s162_s25 }
  0x17   : > { %656 = vperm.xlu1 %4989, %v633_v1   ;;  %646 = vperm.xlu0 %4988, %v631_v2   ;;  %v635_v3 = vld [vmem:[%s5339_s28 + $0x20] sm:$0xff]  ;;  %v632_v5 = vld [vmem:[%s5339_s28 + $0x8] sm:$0xff]  ;;  %v638_v7 = vld [vmem:[%s5339_s28 + $0x38] sm:$0xff]  ;;  %v5355_v14 = vadd.s32 16, %v5352_v13  ;;  %v187_v16 = vand.u32 65535, %v5352_v13  ;;  %v188_v19 = vshrl.u32 %v5352_v13, 16 }
  0x18   : > { %666 = vperm.xlu2 %4990, %v635_v3   ;;  %v636_v6 = vld [vmem:[%s5339_s28 + $0x28] sm:$0xff]  ;;  %v637_v8 = vld [vmem:[%s5339_s28 + $0x30] sm:$0xff]  ;;  %v639_v9 = vld [vmem:[%s5339_s28 + $0x40] sm:$0xff]  ;;  %v5365_v38 = vadd.s32 8, %v5352_v13  ;;  %v5371_v45 = vadd.s32 24, %v5352_v13  ;;  %v5379_v62 = vadd.s32 32, %v5352_v13 }
  0x19   : > { %v641_v10 = vld [vmem:[%s5339_s28 + $0x50] sm:$0xff]  ;;  %v640_v11 = vld [vmem:[%s5339_s28 + $0x48] sm:$0xff]  ;;  %v245_v15 = vand.u32 65535, %v5355_v14  ;;  %v246_v17 = vshrl.u32 %v5355_v14, 16  ;;  %v191_v20 = vmul.u32 43690, %v187_v16  ;;  %v190_v24 = vmul.u32 43691, %v187_v16 }
  0x1a   : > { %v192_v25 = vmul.u32 43691, %v188_v19  ;;  %v193_v31 = vmul.u32 43690, %v188_v19  ;;  %v216_v43 = vand.u32 65535, %v5365_v38  ;;  %v217_v44 = vshrl.u32 %v5365_v38, 16  ;;  %s4515_s5 = sshll.u32 %s163_s4, 4  ;;  %s4516_s5 = int_to_ptr.vmem [resolvable:$true] %s4515_s5 }
  0x1b   : > { %v249_v18 = vmul.u32 43690, %v245_v15  ;;  %v248_v21 = vmul.u32 43691, %v245_v15  ;;  %v250_v22 = vmul.u32 43691, %v246_v17  ;;  %v194_v26 = vshll.u32 %v191_v20, 16 }
  0x1c   : > { %v251_v27 = vmul.u32 43690, %v246_v17  ;;  %v196_v32 = vshll.u32 %v192_v25, 16  ;;  %v195_v41 = vshrl.u32 %v191_v20, 16  ;;  %v197_v48 = vshrl.u32 %v192_v25, 16  ;;  %v5394_v17 = vld [vmem:[%s7039_s2 + $0x1] ss:$0 sm:$0xff] }
  0x1d   : > { %v252_v23 = vshll.u32 %v249_v18, 16  ;;  %v254_v28 = vshll.u32 %v250_v22, 16  ;;  %vm198_vm1 = vc.u32 %v190_v24, %v194_v26  ;;  %v200_v35 = vadd.s32 %v194_v26, %v190_v24 }
  0x1e   : > { %v199_v34 = vsel %vm198_vm1, 1, %v5260_v0  ;;  %v253_v39 = vshrl.u32 %v249_v18, 16  ;;  %v255_v46 = vshrl.u32 %v250_v22, 16  ;;  %v219_v50 = vmul.u32 43691, %v216_v43 }
  0x1f   : > { %661 = vperm.xlu1 %4989, %v634_v4   ;;  %651 = vperm.xlu0 %4988, %v632_v5   ;;  %vm256_vm0 = vc.u32 %v248_v21, %v252_v23  ;;  %v258_v29 = vadd.s32 %v252_v23, %v248_v21  ;;  %v201_v37 = vadd.s32 %v199_v34, %v193_v31  ;;  %v220_v51 = vmul.u32 43690, %v216_v43 }
  0x20   : > { %671 = vperm.xlu2 %4990, %v636_v6   ;;  %v257_v30 = vsel %vm256_vm0, 1, %v5260_v0  ;;  %vm202_vm3 = vc.u32 %v200_v35, %v196_v32  ;;  %v221_v52 = vmul.u32 43691, %v217_v44  ;;  %v222_v57 = vmul.u32 43690, %v217_v44 }
  0x21   : > { %v259_v33 = vadd.s32 %v257_v30, %v251_v27  ;;  %vm260_vm2 = vc.u32 %v258_v29, %v254_v28  ;;  %v203_v42 = vsel %vm202_vm3, 1, %v5260_v0  ;;  %v223_v58 = vshll.u32 %v220_v51, 16 }
  0x22   : > { %v261_v36 = vsel %vm260_vm2, 1, %v5260_v0  ;;  %v205_v49 = vadd.s32 %v203_v42, %v201_v37  ;;  %v225_v59 = vshll.u32 %v221_v52, 16  ;;  %v274_v63 = vand.u32 65535, %v5371_v45 }
  0x23   : > { %v263_v40 = vadd.s32 %v261_v36, %v259_v33  ;;  %vm227_vm4 = vc.u32 %v219_v50, %v223_v58  ;;  %v229_v2 = vadd.s32 %v223_v58, %v219_v50  ;;  %v275_v3 = vshrl.u32 %v5371_v45, 16 }
  0x24   : > { %v206_v55 = vadd.s32 %v205_v49, %v195_v41  ;;  %v228_v6 = vsel %vm227_vm4, 1, %v5260_v0  ;;  %v226_v18 = vshrl.u32 %v221_v52, 16  ;;  %v277_v23 = vmul.u32 43691, %v274_v63 }
  0x25   : > { %v264_v47 = vadd.s32 %v263_v40, %v253_v39  ;;  %vm231_vm5 = vc.u32 %v229_v2, %v225_v59  ;;  %v5401_v28 = vmul.u32 43690, %v274_v63  ;;  %v5403_v29 = vmul.u32 43691, %v275_v3 }
  0x26   : > { %v207_v61 = vadd.s32 %v206_v55, %v197_v48  ;;  %v232_v15 = vsel %vm231_vm5, 1, %v5260_v0  ;;  %v5261_v41 = vmov 0.0   ;;  %v280_v50 = vmul.u32 43690, %v275_v3 }
  0x27   : > { %681 = vperm.xlu1 %4989, %v638_v7   ;;  %676 = vperm.xlu0 %4988, %v637_v8   ;;  %v265_v54 = vadd.s32 %v264_v47, %v255_v46  ;;  %v303_v7 = vand.u32 65535, %v5379_v62  ;;  %v224_v8 = vshrl.u32 %v220_v51, 16  ;;  %629 = vst.msk [vmem:[#allocation2] sm:$0xff] %vm628_vm12, %v5261_v41  ;;  %v281_v46 = vshll.u32 %v5401_v28, 16 }
  0x28   : > { %686 = vperm.xlu2 %4990, %v639_v9   ;;  %v208_v5 = vshrl.u32 %v207_v61, 4  ;;  %v230_v9 = vadd.s32 %v228_v6, %v222_v57  ;;  %630 = vst.msk [vmem:[#allocation2 + $0x68] sm:$0xff] %vm628_vm12, %v5261_v41 }
  0x29   : > { %v266_v60 = vshrl.u32 %v265_v54, 4  ;;  %v307_v16 = vmul.u32 43690, %v303_v7  ;;  %v306_v20 = vmul.u32 43691, %v303_v7  ;;  %vm285_vm15 = vc.u32 %v277_v23, %v281_v46 }
  0x2a   : > { %v209_v12 = vmul.u32 24, %v208_v5  ;;  %v234_v19 = vadd.s32 %v232_v15, %v230_v9  ;;  %v287_v59 = vadd.s32 %v281_v46, %v277_v23  ;;  %v5454_v15 = vadd.s32 48, %v5352_v13 }
  0x2b   : > { %v267_v4 = vmul.u32 24, %v266_v60  ;;  %v310_v26 = vshll.u32 %v307_v16, 16  ;;  %v311_v39 = vshrl.u32 %v307_v16, 16  ;;  %v284_v23 = vshrl.u32 %v5403_v29, 16 }
  0x2c   : > { %v210_v22 = vsub.s32 %v5352_v13, %v209_v12 }
  0x2d   : > { %vm314_vm8 = vc.u32 %v306_v20, %v310_v26  ;;  %v316_v33 = vadd.s32 %v310_v26, %v306_v20 }
  0x2e   : > { %vm532_vm9 = vcmp.ne.s32.totalorder %v210_v22, 0  ;;  %vm544_vm10 = vcmp.lt.s32.totalorder %v210_v22, 0  ;;  %v315_v32 = vsel %vm314_vm8, 1, %v5260_v0  ;;  %v568_v34 = vadd.s32 24, %v210_v22 }
  0x2f   : > { %696 = vperm.xlu1 %4989, %v641_v10   ;;  %691 = vperm.xlu0 %4988, %v640_v11   ;;  %v304_v10 = vshrl.u32 %v5379_v62, 16  ;;  %v5388_v11 = vsub.s32 %v5355_v14, %v267_v4  ;;  %v235_v14 = vadd.s32 %v234_v19, %v224_v8  ;;  %vm5417_vm14 = vmand %vm544_vm10, %vm532_vm9 }
  0x30   : > { %v580_v54 = vsel %vm5417_vm14, %v568_v34, %v210_v22  ;;  %v282_v22 = vshrl.u32 %v5401_v28, 16  ;;  %v362_v28 = vshrl.u32 %v5454_v15, 16 }
  0x31   : > { %v308_v21 = vmul.u32 43691, %v304_v10  ;;  %v309_v25 = vmul.u32 43690, %v304_v10  ;;  %vm534_vm6 = vcmp.ne.s32.totalorder %v5388_v11, 0  ;;  %vm546_vm7 = vcmp.lt.s32.totalorder %v5388_v11, 0 }
  0x32   : > { %v570_v30 = vadd.s32 24, %v5388_v11  ;;  %v236_v31 = vadd.s32 %v235_v14, %v226_v18  ;;  %vm5410_vm11 = vmand %vm546_vm7, %vm534_vm6  ;;  %vm592_vm4 = vcmp.lt.s32.totalorder %v580_v54, 16 }
  0x33   : > { %v312_v27 = vshll.u32 %v308_v21, 16  ;;  %v317_v36 = vadd.s32 %v315_v32, %v309_v25  ;;  %v313_v47 = vshrl.u32 %v308_v21, 16  ;;  %v5462_v20 = vsel %vm592_vm4, 1.0, %v5261_v41 }
  0x34   : > { %v237_v35 = vshrl.u32 %v236_v31, 4  ;;  %v582_v51 = vsel %vm5410_vm11, %v570_v30, %v5388_v11 }
  0x35   : > { %vm318_vm13 = vc.u32 %v316_v33, %v312_v27  ;;  %vm594_vm3 = vcmp.lt.s32.totalorder %v582_v51, 16  ;;  %v361_v33 = vand.u32 65535, %v5454_v15 }
  0x36   : > { %v238_v43 = vmul.u32 24, %v237_v35  ;;  %v319_v44 = vsel %vm318_vm13, 1, %v5260_v0  ;;  %v5457_v16 = vsel %vm594_vm3, 1.0, %v5261_v41 }
  0x37   : > { %v321_v48 = vadd.s32 %v319_v44, %v317_v36 }
  0x38   : > { %v239_v52 = vsub.s32 %v5365_v38, %v238_v43 }
  0x39   : > { %v322_v57 = vadd.s32 %v321_v48, %v311_v39 }
  0x3a   : > { %vm533_vm0 = vcmp.ne.s32.totalorder %v239_v52, 0  ;;  %vm545_vm1 = vcmp.lt.s32.totalorder %v239_v52, 0  ;;  %v569_v63 = vadd.s32 24, %v239_v52 }
  0x3b   : > { %vm5439_vm2 = vmand %vm545_vm1, %vm533_vm0  ;;  %v323_v4 = vadd.s32 %v322_v57, %v313_v47 }
  0x3c   : > { %v581_v10 = vsel %vm5439_vm2, %v569_v63, %v239_v52  ;;  %v5500_v63 = vmul.u32 43691, %v362_v28 }
  0x3d   : > { %v324_v8 = vshrl.u32 %v323_v4, 4  ;;  %vm5468_vm6 = vcmp.lt.s32.totalorder %v581_v10, 16 }
  0x3e   : > { %v5490_v46 = vsel %vm5468_vm6, 1.0, %v5261_v41 }
  0x3f   : > { %v325_v21 = vmul.u32 24, %v324_v8 }
  0x41   : > { %v326_v32 = vsub.s32 %v5379_v62, %v325_v21 }
  0x43   : > { %vm536_vm7 = vcmp.ne.s32.totalorder %v326_v32, 0  ;;  %vm548_vm8 = vcmp.lt.s32.totalorder %v326_v32, 0  ;;  %v572_v39 = vadd.s32 24, %v326_v32 }
  0x44   : > { %vm560_vm9 = vmand %vm548_vm8, %vm536_vm7 }
  0x45   : > { %v584_v48 = vsel %vm560_vm9, %v572_v39, %v326_v32 }
  0x46   : > { %vm596_vm10 = vcmp.lt.s32.totalorder %v584_v48, 16 }
  0x72   : > { %v667_v53 = vpop.permute.xlu2 %666 }
  0x73   : > { %v709_v1 = vmul.f32 %v5376_v56, %v667_v53  ;;  %v283_v53 = vshll.u32 %v5403_v29, 16 }
  0x75   : > { %v5398_v24 = vadd.f32 %v5394_v17, %v709_v1  ;;  %v286_v1 = vsel %vm285_vm15, 1, %v5260_v0  ;;  %vm289_vm5 = vc.u32 %v287_v59, %v283_v53  ;;  %v5494_v53 = vmul.u32 43690, %v361_v33 }
  0x76   : > { %v288_v9 = vadd.s32 %v286_v1, %v280_v50  ;;  %v290_v12 = vsel %vm289_vm5, 1, %v5260_v0 }
  0x77   : > { %v747_v40 = vmul.f32 0.044715, %v5398_v24  ;;  %v735_v59 = vmul.f32 0.5, %v5398_v24  ;;  %v368_v10 = vshll.u32 %v5494_v53, 16 }
  0x78   : > { %v292_v27 = vadd.s32 %v290_v12, %v288_v9  ;;  %v364_v9 = vmul.u32 43691, %v361_v33  ;;  %v5511_v12 = vsel %vm596_vm10, 1.0, %v5261_v41 }
  0x79   : > { %v759_v49 = vmul.f32 %v747_v40, %v5398_v24 }
  0x7a   : > { %v5433_v55 = vpop.permute.xlu2 %671  ;;  %v293_v40 = vadd.s32 %v292_v27, %v282_v22  ;;  %vm372_vm15 = vc.u32 %v364_v9, %v368_v10  ;;  %v374_v32 = vadd.s32 %v368_v10, %v364_v9 }
  0x7b   : > { %v771_v58 = vmul.f32 %v759_v49, %v5398_v24 }
  0x7c   : > { %v294_v49 = vadd.s32 %v293_v40, %v284_v23 }
  0x7d   : > { %v783_v5 = vadd.f32 %v771_v58, %v5398_v24 }
  0x7f   : > { %v795_v11 = vmul.f32 0.7978846, %v783_v5 }
  0x81   : > { %5002 = vtanh.f32 %v795_v11 }
  0x82   : > { %v687_v37 = vpop.permute.xlu2 %686 }
  0x83   : > { %v713_v47 = vmul.f32 %v5376_v56, %v687_v37 }
  0x85   : > { %v5504_v3 = vadd.f32 %v5394_v17, %v713_v47 }
  0x87   : > { %v5003_v54 = vpop.eup %5002 }
  0x88   : > { %v819_v22 = vadd.f32 1.0, %v5003_v54 }
  0x89   : > { %v657_v60 = vpop.permute.xlu1 %656  ;;  %v647_v61 = vpop.permute.xlu0 %646 }
  0x8a   : > { %v707_v38 = vmul.f32 %v5376_v56, %v657_v60  ;;  %v705_v2 = vmul.f32 %v5376_v56, %v647_v61  ;;  %v295_v60 = vshrl.u32 %v294_v49, 4  ;;  %v831_v37 = vmul.f32 %v819_v22, %v735_v59 }
  0x8c   : > { %v5445_v6 = vadd.f32 %v5394_v17, %v707_v38  ;;  %v5448_v7 = vadd.f32 %v5394_v17, %v705_v2  ;;  %v296_v4 = vmul.u32 24, %v295_v60 }
  0x8e   : > { %v745_v18 = vmul.f32 0.044715, %v5445_v6  ;;  %v743_v19 = vmul.f32 0.044715, %v5448_v7  ;;  %v733_v50 = vmul.f32 0.5, %v5445_v6  ;;  %v731_v57 = vmul.f32 0.5, %v5448_v7 }
  0x90   : > { %v757_v14 = vmul.f32 %v745_v18, %v5445_v6  ;;  %v755_v25 = vmul.f32 %v743_v19, %v5448_v7  ;;  %v297_v18 = vsub.s32 %v5371_v45, %v296_v4  ;;  %v367_v19 = vmul.u32 43690, %v362_v28 }
  0x91   : > { %v662_v30 = vpop.permute.xlu1 %661  ;;  %v652_v31 = vpop.permute.xlu0 %651 }
  0x92   : > { %v708_v29 = vmul.f32 %v5376_v56, %v662_v30  ;;  %v706_v34 = vmul.f32 %v5376_v56, %v652_v31  ;;  %v769_v35 = vmul.f32 %v757_v14, %v5445_v6  ;;  %v767_v36 = vmul.f32 %v755_v25, %v5448_v7 }
  0x93   : > { %v370_v14 = vshll.u32 %v5500_v63, 16  ;;  %vm535_vm11 = vcmp.ne.s32.totalorder %v297_v18, 0  ;;  %vm547_vm13 = vcmp.lt.s32.totalorder %v297_v18, 0  ;;  %v571_v26 = vadd.s32 24, %v297_v18 }
  0x94   : > { %v5480_v62 = vadd.f32 %v5394_v17, %v708_v29  ;;  %v5483_v42 = vadd.f32 %v5394_v17, %v706_v34  ;;  %v781_v43 = vadd.f32 %v769_v35, %v5445_v6  ;;  %v779_v44 = vadd.f32 %v767_v36, %v5448_v7  ;;  %vm5521_vm14 = vmand %vm547_vm13, %vm535_vm11 }
  0x95   : > { %v583_v34 = vsel %vm5521_vm14, %v571_v26, %v297_v18  ;;  %v373_v35 = vsel %vm372_vm15, 1, %v5260_v0  ;;  %vm376_vm0 = vc.u32 %v374_v32, %v370_v14  ;;  %v5562_v14 = vadd.s32 64, %v5352_v13 }
  0x96   : > { %v793_v51 = vmul.f32 0.7978846, %v781_v43  ;;  %v791_v52 = vmul.f32 0.7978846, %v779_v44  ;;  %v744_v58 = vmul.f32 0.044715, %v5483_v42  ;;  %v375_v40 = vadd.s32 %v373_v35, %v367_v19 }
  0x97   : > { %v746_v61 = vmul.f32 0.044715, %v5480_v62  ;;  %v369_v44 = vshrl.u32 %v5494_v53, 16  ;;  %vm5533_vm1 = vcmp.lt.s32.totalorder %v583_v34, 16  ;;  %v734_v60 = vmul.f32 0.5, %v5480_v62 }
  0x98   : > { %5004 = vtanh.f32 %v793_v51  ;;  %v756_v2 = vmul.f32 %v744_v58, %v5483_v42  ;;  %v732_v58 = vmul.f32 0.5, %v5483_v42  ;;  %v751_v31 = vmul.f32 0.044715, %v5504_v3 }
  0x99   : > { %v682_v1 = vpop.permute.xlu1 %681  ;;  %v677_v38 = vpop.permute.xlu0 %676  ;;  %5006 = vtanh.f32 %v791_v52  ;;  %v758_v8 = vmul.f32 %v746_v61, %v5480_v62  ;;  %v377_v52 = vsel %vm376_vm0, 1, %v5260_v0 }
  0x9a   : > { %v711_v5 = vmul.f32 %v5376_v56, %v677_v38  ;;  %v768_v11 = vmul.f32 %v756_v2, %v5483_v42  ;;  %v712_v21 = vmul.f32 %v5376_v56, %v682_v1  ;;  %v379_v59 = vadd.s32 %v377_v52, %v375_v40 }
  0x9b   : > { %v770_v23 = vmul.f32 %v758_v8, %v5480_v62  ;;  %v843_v2 = vmul.f32 %v5511_v12, %v831_v37 }
  0x9c   : > { %v780_v25 = vadd.f32 %v768_v11, %v5483_v42  ;;  %v5519_v30 = vadd.f32 %v5394_v17, %v711_v5  ;;  %v5531_v47 = vadd.f32 %v5394_v17, %v712_v21  ;;  %v380_v4 = vadd.s32 %v379_v59, %v369_v44 }
  0x9d   : > { %v782_v45 = vadd.f32 %v770_v23, %v5480_v62  ;;  %v763_v59 = vmul.f32 %v751_v31, %v5504_v3 }
  0x9e   : > { %v5005_v27 = vpop.eup %5004  ;;  %v792_v29 = vmul.f32 0.7978846, %v780_v25  ;;  %v749_v54 = vmul.f32 0.044715, %v5519_v30  ;;  %v750_v5 = vmul.f32 0.044715, %v5531_v47 }
  0x9f   : > { %v5007_v33 = vpop.eup %5006  ;;  %v817_v28 = vadd.f32 1.0, %v5005_v27  ;;  %v794_v39 = vmul.f32 0.7978846, %v782_v45 }
  0xa0   : > { %v815_v36 = vadd.f32 1.0, %v5007_v33  ;;  %5008 = vtanh.f32 %v792_v29  ;;  %v761_v61 = vmul.f32 %v749_v54, %v5519_v30  ;;  %v762_v23 = vmul.f32 %v750_v5, %v5531_v47  ;;  %v642_v29 = vld [vmem:[%s5339_s28 + $0x58] sm:$0xff]  ;;  %s4513_s28 = scalar_lea.hbm %s7040_s3, %s5305_s16 }
  0xa1   : > { %v829_v43 = vmul.f32 %v817_v28, %v733_v50  ;;  %5010 = vtanh.f32 %v794_v39  ;;  %v5541_v50 = vadd.s32 56, %v5352_v13  ;;  %v419_v54 = vand.u32 65535, %v5562_v14  ;;  %s4517_s8 = sshll.u32 %s4513_s28, 4  ;;  %s4518_s8 = int_to_ptr.hbm [resolvable:$true] %s4517_s8 }
  0xa2   : > { %v827_v48 = vmul.f32 %v815_v36, %v731_v57  ;;  %v371_v57 = vshrl.u32 %v5500_v63, 16  ;;  %v5556_v63 = vsel %vm5533_vm1, 1.0, %v5261_v41  ;;  %v773_v9 = vmul.f32 %v761_v61, %v5519_v30 }
  0xa3   : > { %v841_v51 = vmul.f32 %v5457_v16, %v829_v43  ;;  %v390_v1 = vand.u32 65535, %v5541_v50  ;;  %v391_v38 = vshrl.u32 %v5541_v50, 16  ;;  %v774_v43 = vmul.f32 %v762_v23, %v5531_v47 }
  0xa4   : > { %v839_v53 = vmul.f32 %v5462_v20, %v827_v48  ;;  %v381_v22 = vadd.s32 %v380_v4, %v371_v57  ;;  %v785_v25 = vadd.f32 %v773_v9, %v5519_v30  ;;  %v420_v57 = vshrl.u32 %v5562_v14, 16 }
  0xa5   : > { %867 = vrot.lane.b32.xlu1 %v841_v51, %s5262_s6  ;;  %v393_v10 = vmul.u32 43691, %v390_v1  ;;  %v394_v11 = vmul.u32 43690, %v390_v1  ;;  %v395_v18 = vmul.u32 43691, %v391_v38  ;;  %v396_v26 = vmul.u32 43690, %v391_v38 }
  0xa6   : > { %863 = vrot.lane.b32.xlu2 %v839_v53, %s5262_s6  ;;  %v5009_v8 = vpop.eup %5008  ;;  %v382_v33 = vshrl.u32 %v381_v22, 4  ;;  %v797_v34 = vmul.f32 0.7978846, %v785_v25  ;;  %v786_v52 = vadd.f32 %v774_v43, %v5531_v47  ;;  %v424_v4 = vmul.u32 43691, %v420_v57 }
  0xa7   : > { %v5011_v19 = vpop.eup %5010  ;;  %v816_v21 = vadd.f32 1.0, %v5009_v8  ;;  %v397_v27 = vshll.u32 %v394_v11, 16  ;;  %v399_v28 = vshll.u32 %v395_v18, 16  ;;  %v398_v35 = vshrl.u32 %v394_v11, 16 }
  0xa8   : > { %v818_v32 = vadd.f32 1.0, %v5011_v19  ;;  %v383_v39 = vmul.u32 24, %v382_v33  ;;  %5012 = vtanh.f32 %v797_v34  ;;  %v400_v44 = vshrl.u32 %v395_v18, 16 }
  0xa9   : > { %v828_v45 = vmul.f32 %v816_v21, %v732_v58  ;;  %vm401_vm2 = vc.u32 %v393_v10, %v397_v27  ;;  %v403_v36 = vadd.s32 %v397_v27, %v393_v10  ;;  %v798_v1 = vmul.f32 0.7978846, %v786_v52 }
  0xaa   : > { %v402_v40 = vsel %vm401_vm2, 1, %v5260_v0  ;;  %v384_v49 = vsub.s32 %v5454_v15, %v383_v39  ;;  %v830_v53 = vmul.f32 %v818_v32, %v734_v60  ;;  %v423_v15 = vmul.u32 43690, %v419_v54 }
  0xab   : > { %v840_v37 = vmul.f32 %v5490_v46, %v828_v45  ;;  %v404_v48 = vadd.s32 %v402_v40, %v396_v26  ;;  %vm405_vm3 = vc.u32 %v403_v36, %v399_v28  ;;  %v710_v5 = vmul.f32 %v5376_v56, %v5433_v55 }
  0xac   : > { %v406_v51 = vsel %vm405_vm3, 1, %v5260_v0  ;;  %vm538_vm4 = vcmp.ne.s32.totalorder %v384_v49, 0  ;;  %vm550_vm5 = vcmp.lt.s32.totalorder %v384_v49, 0  ;;  %v574_v61 = vadd.s32 24, %v384_v49 }
  0xad   : > { %871 = vrot.lane.b32.xlu1 %v843_v2, %s5262_s6  ;;  %865 = vrot.lane.b32.xlu0 %v840_v37, %s5262_s6  ;;  %v408_v58 = vadd.s32 %v406_v51, %v404_v48  ;;  %vm562_vm6 = vmand %vm550_vm5, %vm538_vm4  ;;  %v422_v2 = vmul.u32 43691, %v419_v54  ;;  %v737_v60 = vmul.f32 0.5, %v5519_v30  ;;  %v775_v9 = vmul.f32 %v763_v59, %v5504_v3 }
  0xae   : > { %701 = vperm.xlu2 %4990, %v642_v29   ;;  %v586_v8 = vsel %vm562_vm6, %v574_v61, %v384_v49  ;;  %v5013_v10 = vpop.eup %5012  ;;  %5014 = vtanh.f32 %v798_v1  ;;  %v425_v18 = vmul.u32 43690, %v420_v57  ;;  %v426_v19 = vshll.u32 %v423_v15, 16 }
  0xaf   : > { %v409_v38 = vadd.s32 %v408_v58, %v398_v35  ;;  %v842_v21 = vmul.f32 %v5556_v63, %v830_v53  ;;  %vm5583_vm7 = vcmp.lt.s32.totalorder %v586_v8, 16  ;;  %v821_v23 = vadd.f32 1.0, %v5013_v10 }
  0xb0   : > { %v428_v25 = vshll.u32 %v424_v4, 16  ;;  %vm430_vm8 = vc.u32 %v422_v2, %v426_v19  ;;  %v432_v55 = vadd.s32 %v426_v19, %v422_v2  ;;  %v787_v27 = vadd.f32 %v775_v9, %v5504_v3 }
  0xb1   : > { %v410_v11 = vadd.s32 %v409_v38, %v400_v44  ;;  %v833_v31 = vmul.f32 %v821_v23, %v737_v60  ;;  %v427_v45 = vshrl.u32 %v423_v15, 16  ;;  %v431_v32 = vsel %vm430_vm8, 1, %v5260_v0 }
  0xb2   : > { %v5591_v33 = vadd.s32 40, %v5352_v13  ;;  %v433_v29 = vadd.s32 %v431_v32, %v425_v18  ;;  %vm434_vm9 = vc.u32 %v432_v55, %v428_v25  ;;  %v799_v34 = vmul.f32 0.7978846, %v787_v27 }
  0xb3   : > { %v411_v26 = vshrl.u32 %v410_v11, 4  ;;  %v5596_v35 = vsel %vm5583_vm7, 1.0, %v5261_v41  ;;  %v435_v36 = vsel %vm434_vm9, 1, %v5260_v0  ;;  %v5602_v43 = vadd.f32 %v5394_v17, %v710_v5 }
  0xb4   : > { %v332_v37 = vand.u32 65535, %v5591_v33  ;;  %v333_v39 = vshrl.u32 %v5591_v33, 16  ;;  %v5015_v40 = vpop.eup %5014  ;;  %v429_v48 = vshrl.u32 %v424_v4, 16  ;;  %v437_v49 = vadd.s32 %v435_v36, %v433_v29 }
  0xb5   : > { %869 = vrot.lane.b32.xlu0 %v842_v21, %s5262_s6  ;;  %v412_v28 = vmul.u32 24, %v411_v26  ;;  %5016 = vtanh.f32 %v799_v34  ;;  %v845_v53 = vmul.f32 %v5596_v35, %v833_v31  ;;  %v822_v57 = vadd.f32 1.0, %v5015_v40 }
  0xb6   : > { %v335_v51 = vmul.u32 43691, %v332_v37  ;;  %v336_v52 = vmul.u32 43690, %v332_v37  ;;  %v337_v54 = vmul.u32 43691, %v333_v39  ;;  %v438_v59 = vadd.s32 %v437_v49, %v427_v45 }
  0xb7   : > { %v413_v44 = vsub.s32 %v5541_v50, %v412_v28  ;;  %v338_v61 = vmul.u32 43690, %v333_v39  ;;  %v738_v2 = vmul.f32 0.5, %v5531_v47  ;;  %v748_v15 = vmul.f32 0.044715, %v5602_v43 }
  0xb8   : > { %v339_v1 = vshll.u32 %v336_v52, 16  ;;  %v341_v50 = vshll.u32 %v337_v54, 16  ;;  %v439_v4 = vadd.s32 %v438_v59, %v429_v48  ;;  %v340_v21 = vshrl.u32 %v336_v52, 16 }
  0xb9   : > { %vm539_vm10 = vcmp.ne.s32.totalorder %v413_v44, 0  ;;  %vm551_vm11 = vcmp.lt.s32.totalorder %v413_v44, 0  ;;  %v575_v58 = vadd.s32 24, %v413_v44  ;;  %v760_v60 = vmul.f32 %v748_v15, %v5602_v43 }
  0xba   : > { %vm563_vm13 = vmand %vm551_vm11, %vm539_vm10  ;;  %vm343_vm15 = vc.u32 %v335_v51, %v339_v1  ;;  %v345_v5 = vadd.s32 %v339_v1, %v335_v51  ;;  %v834_v10 = vmul.f32 %v822_v57, %v738_v2  ;;  %v440_v11 = vshrl.u32 %v439_v4, 4 }
  0xbb   : > { %v587_v38 = vsel %vm563_vm13, %v575_v58, %v413_v44  ;;  %v344_v8 = vsel %vm343_vm15, 1, %v5260_v0  ;;  %v5017_v9 = vpop.eup %5016  ;;  %v772_v22 = vmul.f32 %v760_v60, %v5602_v43  ;;  %v739_v25 = vmul.f32 0.5, %v5504_v3 }
  0xbc   : > { %vm599_vm14 = vcmp.lt.s32.totalorder %v587_v38, 16  ;;  %v346_v18 = vadd.s32 %v344_v8, %v338_v61  ;;  %vm347_vm0 = vc.u32 %v345_v5, %v341_v50  ;;  %v441_v23 = vmul.u32 24, %v440_v11  ;;  %v692_v11 = vpop.permute.xlu0 %691 }
  0xbd   : > { %875 = vrot.lane.b32.xlu0 %v845_v53, %s5262_s6  ;;  %v5612_v19 = vsel %vm599_vm14, 1.0, %v5261_v41  ;;  %v348_v26 = vsel %vm347_vm0, 1, %v5260_v0  ;;  %v823_v55 = vadd.f32 1.0, %v5017_v9  ;;  %v342_v27 = vshrl.u32 %v337_v54, 16 }
  0xbe   : > { %v350_v31 = vadd.s32 %v348_v26, %v346_v18  ;;  %v784_v45 = vadd.f32 %v772_v22, %v5602_v43  ;;  %v846_v32 = vmul.f32 %v5612_v19, %v834_v10  ;;  %v442_v28 = vsub.s32 %v5562_v14, %v441_v23 }
  0xbf   : > { %v835_v37 = vmul.f32 %v823_v55, %v739_v25  ;;  %v736_v51 = vmul.f32 0.5, %v5602_v43  ;;  %v5634_v38 = vadd.s32 72, %v5352_v13  ;;  %v5639_v15 = vadd.s32 80, %v5352_v13 }
  0xc0   : > { %v351_v29 = vadd.s32 %v350_v31, %v340_v21  ;;  %v796_v34 = vmul.f32 0.7978846, %v784_v45  ;;  %vm540_vm1 = vcmp.ne.s32.totalorder %v442_v28, 0  ;;  %vm552_vm2 = vcmp.lt.s32.totalorder %v442_v28, 0 }
  0xc1   : > { %v576_v36 = vadd.s32 24, %v442_v28  ;;  %vm564_vm3 = vmand %vm552_vm2, %vm540_vm1  ;;  %v449_v2 = vshrl.u32 %v5634_v38, 16  ;;  %v477_v60 = vand.u32 65535, %v5639_v15  ;;  %vm899_vm10 = vcmask 523520  }
  0xc2   : > { %v352_v39 = vadd.s32 %v351_v29, %v342_v27  ;;  %5018 = vtanh.f32 %v796_v34  ;;  %v478_v21 = vshrl.u32 %v5639_v15, 16  ;;  %v714_v26 = vmul.f32 %v5376_v56, %v692_v11 }
  0xc3   : > { %v588_v40 = vsel %vm564_vm3, %v576_v36, %v442_v28  ;;  %v453_v5 = vmul.u32 43691, %v449_v2  ;;  %v454_v18 = vmul.u32 43690, %v449_v2  ;;  %v481_v22 = vmul.u32 43690, %v477_v60 }
  0xc4   : > { %vm600_vm4 = vcmp.lt.s32.totalorder %v588_v40, 16  ;;  %v353_v44 = vshrl.u32 %v352_v39, 4  ;;  %v480_v27 = vmul.u32 43691, %v477_v60  ;;  %v482_v31 = vmul.u32 43691, %v478_v21  ;;  %v697_v39 = vpop.permute.xlu1 %696 }
  0xc5   : > { %877 = vrot.lane.b32.xlu0 %v846_v32, %s5262_s6  ;;  %v5622_v48 = vsel %vm600_vm4, 1.0, %v5261_v41  ;;  %v457_v9 = vshll.u32 %v453_v5, 16  ;;  %v484_v45 = vshll.u32 %v481_v22, 16  ;;  %v5648_v28 = vadd.f32 %v5394_v17, %v714_v26 }
  0xc6   : > { %v847_v49 = vmul.f32 %v5622_v48, %v835_v37  ;;  %v354_v14 = vmul.u32 24, %v353_v44  ;;  %v486_v36 = vshll.u32 %v482_v31, 16  ;;  %v5660_v2 = vadd.s32 88, %v5352_v13 }
  0xc7   : > { %vm488_vm13 = vc.u32 %v480_v27, %v484_v45  ;;  %v490_v37 = vadd.s32 %v484_v45, %v480_v27  ;;  %v752_v44 = vmul.f32 0.044715, %v5648_v28 }
  0xc8   : > { %v5019_v52 = vpop.eup %5018  ;;  %v355_v54 = vsub.s32 %v5591_v33, %v354_v14  ;;  %v448_v33 = vand.u32 65535, %v5634_v38  ;;  %v489_v14 = vsel %vm488_vm13, 1, %v5260_v0  ;;  %v506_v60 = vand.u32 65535, %v5660_v2 }
  0xc9   : > { %v820_v53 = vadd.f32 1.0, %v5019_v52  ;;  %v458_v52 = vshrl.u32 %v453_v5, 16  ;;  %vm492_vm14 = vc.u32 %v490_v37, %v486_v36  ;;  %v507_v11 = vshrl.u32 %v5660_v2, 16 }
  0xca   : > { %vm537_vm5 = vcmp.ne.s32.totalorder %v355_v54, 0  ;;  %vm549_vm6 = vcmp.lt.s32.totalorder %v355_v54, 0  ;;  %v573_v58 = vadd.s32 24, %v355_v54  ;;  %v452_v50 = vmul.u32 43690, %v448_v33 }
  0xcb   : > { %vm561_vm7 = vmand %vm549_vm6, %vm537_vm5  ;;  %v832_v57 = vmul.f32 %v820_v53, %v736_v51  ;;  %v451_v4 = vmul.u32 43691, %v448_v33  ;;  %v715_v51 = vmul.f32 %v5376_v56, %v697_v39  ;;  %v764_v53 = vmul.f32 %v752_v44, %v5648_v28 }
  0xcc   : > { %v585_v59 = vsel %vm561_vm7, %v573_v58, %v355_v54  ;;  %v455_v8 = vshll.u32 %v452_v50, 16  ;;  %v456_v29 = vshrl.u32 %v452_v50, 16  ;;  %v509_v26 = vmul.u32 43691, %v506_v60 }
  0xcd   : > { %879 = vrot.lane.b32.xlu0 %v847_v49, %s5262_s6  ;;  %vm597_vm8 = vcmp.lt.s32.totalorder %v585_v59, 16  ;;  %v483_v49 = vmul.u32 43690, %v478_v21  ;;  %v5657_v59 = vadd.f32 %v5394_v17, %v715_v51  ;;  %v776_v50 = vmul.f32 %v764_v53, %v5648_v28 }
  0xce   : > { %v5629_v61 = vsel %vm597_vm8, 1.0, %v5261_v41  ;;  %vm459_vm9 = vc.u32 %v451_v4, %v455_v8  ;;  %v461_v10 = vadd.s32 %v455_v8, %v451_v4  ;;  %v485_v4 = vshrl.u32 %v481_v22, 16 }
  0xcf   : > { %v844_v1 = vmul.f32 %v5629_v61, %v832_v57  ;;  %v460_v25 = vsel %vm459_vm9, 1, %v5260_v0  ;;  %v491_v58 = vadd.s32 %v489_v14, %v483_v49  ;;  %v493_v57 = vsel %vm492_vm14, 1, %v5260_v0 }
  0xd0   : > { %vm463_vm11 = vc.u32 %v461_v10, %v457_v9  ;;  %v462_v55 = vadd.s32 %v460_v25, %v454_v18  ;;  %v753_v10 = vmul.f32 0.044715, %v5657_v59  ;;  %v510_v18 = vmul.u32 43690, %v506_v60 }
  0xd1   : > { %873 = vrot.lane.b32.xlu2 %v844_v1, %s5262_s6  ;;  %v464_v32 = vsel %vm463_vm11, 1, %v5260_v0  ;;  %v495_v8 = vadd.s32 %v493_v57, %v491_v58  ;;  %v788_v21 = vadd.f32 %v776_v50, %v5648_v28  ;;  %v511_v22 = vmul.u32 43691, %v507_v11 }
  0xd2   : > { %v466_v34 = vadd.s32 %v464_v32, %v462_v55  ;;  %v513_v55 = vshll.u32 %v510_v18, 16  ;;  %v765_v45 = vmul.f32 %v753_v10, %v5657_v59  ;;  %v512_v32 = vmul.u32 43690, %v507_v11 }
  0xd3   : > { %v496_v25 = vadd.s32 %v495_v8, %v485_v4  ;;  %v800_v37 = vmul.f32 0.7978846, %v788_v21  ;;  %v514_v14 = vshrl.u32 %v510_v18, 16 }
  0xd4   : > { %v467_v54 = vadd.s32 %v466_v34, %v456_v29  ;;  %v515_v29 = vshll.u32 %v511_v22, 16  ;;  %vm517_vm15 = vc.u32 %v509_v26, %v513_v55  ;;  %v519_v34 = vadd.s32 %v513_v55, %v509_v26 }
  0xd5   : > { %5020 = vtanh.f32 %v800_v37 }
  0xd6   : > { %v468_v33 = vadd.s32 %v467_v54, %v458_v52  ;;  %vm521_vm0 = vc.u32 %v519_v34, %v515_v29  ;;  %v516_v54 = vshrl.u32 %v511_v22, 16 }
  0xd7   : > { %v522_v44 = vsel %vm521_vm0, 1, %v5260_v0  ;;  %vm1045_vm0 = vcmask 785920  }
  0xd8   : > { %v469_v9 = vshrl.u32 %v468_v33, 4 }
  0xdb   : > { %v5021_v60 = vpop.eup %5020 }
  0xdc   : > { %v824_v21 = vadd.f32 1.0, %v5021_v60 }
 0x100   : > { %v864_v23 = vpop.permute.xlu2 %863 }
 0x101   : > { %900 = vst.msk [vmem:[#allocation2 + $0x8] sm:$0xff] %vm899_vm10, %v864_v23  ;;  %v487_v23 = vshrl.u32 %v482_v31, 16  ;;  %v518_v31 = vsel %vm517_vm15, 1, %v5260_v0  ;;  %vm984_vm15 = vcmask 261120  }
 0x102   : > { %v520_v39 = vadd.s32 %v518_v31, %v512_v32 }
 0x103   : > { %v497_v36 = vadd.s32 %v496_v25, %v487_v23 }
 0x104   : > { %v524_v51 = vadd.s32 %v522_v44, %v520_v39 }
 0x105   : > { %v498_v52 = vshrl.u32 %v497_v36, 4 }
 0x106   : > { %v525_v53 = vadd.s32 %v524_v51, %v514_v14 }
 0x107   : > { %v499_v0 = vmul.u32 24, %v498_v52 }
 0x108   : > { %v912_v40 = vld [vmem:[#allocation2 + $0x7] sm:$0xff]  ;;  %v702_v1 = vpop.permute.xlu2 %701  ;;  %v526_v50 = vadd.s32 %v525_v53, %v516_v54 }
 0x109   : > { %948 = vrot.lane.b32.xlu1 %v912_v40, %s5263_s7  ;;  %v716_v5 = vmul.f32 %v5376_v56, %v702_v1  ;;  %v470_v56 = vmul.u32 24, %v469_v9  ;;  %v777_v40 = vmul.f32 %v765_v45, %v5657_v59  ;;  %v500_v10 = vsub.s32 %v5639_v15, %v499_v0 }
 0x10a   : > { %v527_v9 = vshrl.u32 %v526_v50, 4  ;;  %v740_v15 = vmul.f32 0.5, %v5648_v28 }
 0x10b   : > { %v5669_v13 = vadd.f32 %v5394_v17, %v716_v5  ;;  %v471_v49 = vsub.s32 %v5634_v38, %v470_v56  ;;  %v789_v1 = vadd.f32 %v777_v40, %v5657_v59  ;;  %vm542_vm5 = vcmp.ne.s32.totalorder %v500_v10, 0 }
 0x10c   : > { %v528_v55 = vmul.u32 24, %v527_v9  ;;  %vm554_vm6 = vcmp.lt.s32.totalorder %v500_v10, 0  ;;  %v836_v56 = vmul.f32 %v824_v21, %v740_v15  ;;  %v578_v45 = vadd.s32 24, %v500_v10  ;;  %v4873_v15 = vld [vmem:[%s7038_s1 + $0x10] sm:$0xff] }
 0x10d   : > { %v754_v17 = vmul.f32 0.044715, %v5669_v13  ;;  %vm541_vm1 = vcmp.ne.s32.totalorder %v471_v49, 0  ;;  %vm553_vm2 = vcmp.lt.s32.totalorder %v471_v49, 0  ;;  %v577_v38 = vadd.s32 24, %v471_v49  ;;  %vm5699_vm7 = vmand %vm554_vm6, %vm542_vm5 }
 0x10e   : > { %vm5683_vm3 = vmand %vm553_vm2, %vm541_vm1  ;;  %v801_v5 = vmul.f32 0.7978846, %v789_v1  ;;  %v529_v34 = vsub.s32 %v5660_v2, %v528_v55  ;;  %v590_v37 = vsel %vm5699_vm7, %v578_v45, %v500_v10  ;;  %v741_v2 = vmul.f32 0.5, %v5657_v59  ;;  %v4874_v55 = vld [vmem:[%s7038_s1 + $0x18] sm:$0xff]  ;;  %v4871_v45 = vld [vmem:[%s7038_s1] sm:$0xff] }
 0x10f   : > { %v766_v58 = vmul.f32 %v754_v17, %v5669_v13  ;;  %v589_v11 = vsel %vm5683_vm3, %v577_v38, %v471_v49  ;;  %vm602_vm11 = vcmp.lt.s32.totalorder %v590_v37, 16  ;;  %v742_v0 = vmul.f32 0.5, %v5669_v13 }
 0x110   : > { %5022 = vtanh.f32 %v801_v5  ;;  %vm601_vm4 = vcmp.lt.s32.totalorder %v589_v11, 16  ;;  %vm543_vm8 = vcmp.ne.s32.totalorder %v529_v34, 0  ;;  %vm555_vm9 = vcmp.lt.s32.totalorder %v529_v34, 0 }
 0x111   : > { %v778_v4 = vmul.f32 %v766_v58, %v5669_v13  ;;  %v5697_v32 = vsel %vm601_vm4, 1.0, %v5261_v41  ;;  %v579_v14 = vadd.s32 24, %v529_v34  ;;  %vm567_vm13 = vmand %vm555_vm9, %vm543_vm8  ;;  %v5714_v54 = vsel %vm602_vm11, 1.0, %v5261_v41 }
 0x112   : > { %v848_v31 = vmul.f32 %v5697_v32, %v836_v56  ;;  %v4872_v56 = vld [vmem:[%s7038_s1 + $0x8] sm:$0xff]  ;;  %vm4486_vm2 = vcmask 523264  }
 0x113   : > { %v790_v18 = vadd.f32 %v778_v4, %v5669_v13  ;;  %v591_v53 = vsel %vm567_vm13, %v579_v14, %v529_v34 }
 0x114   : > { %vm603_vm14 = vcmp.lt.s32.totalorder %v591_v53, 16 }
 0x115   : > { %v5723_v4 = vsel %vm603_vm14, 1.0, %v5261_v41 }
 0x116   : > { %v5023_v36 = vpop.eup %5022 }
 0x117   : > { %v868_v27 = vpop.permute.xlu1 %867  ;;  %v825_v40 = vadd.f32 1.0, %v5023_v36 }
 0x118   : > { %902 = vst.msk [vmem:[#allocation2 + $0x18] sm:$0xff] %vm899_vm10, %v868_v27  ;;  %v802_v27 = vmul.f32 0.7978846, %v790_v18 }
 0x119   : > { %v837_v52 = vmul.f32 %v825_v40, %v741_v2 }
 0x11a   : > { %5024 = vtanh.f32 %v802_v27 }
 0x11b   : > { %v849_v50 = vmul.f32 %v5714_v54, %v837_v52 }
 0x11f   : > { %v872_v57 = vpop.permute.xlu1 %871  ;;  %v866_v33 = vpop.permute.xlu0 %865 }
 0x120   : > { %904 = vst.msk [vmem:[#allocation2 + $0x28] sm:$0xff] %vm899_vm10, %v872_v57  ;;  %v5025_v51 = vpop.eup %5024 }
 0x121   : > { %901 = vst.msk [vmem:[#allocation2 + $0x10] sm:$0xff] %vm899_vm10, %v866_v33  ;;  %v826_v58 = vadd.f32 1.0, %v5025_v51 }
 0x123   : > { %v838_v38 = vmul.f32 %v826_v58, %v742_v0 }
 0x125   : > { %v850_v8 = vmul.f32 %v5723_v4, %v838_v38 }
 0x127   : > { %v870_v22 = vpop.permute.xlu0 %869 }
 0x128   : > { %v913_v23 = vld [vmem:[#allocation2 + $0xf] sm:$0xff]  ;;  %v914_v25 = vld [vmem:[#allocation2 + $0x17] sm:$0xff]  ;;  %903 = vst.msk [vmem:[#allocation2 + $0x20] sm:$0xff] %vm899_vm10, %v870_v22  ;;  %v4875_v22 = vld [vmem:[%s7038_s1 + $0x20] sm:$0xff] }
 0x129   : > { %v924_v26 = vld [vmem:[#allocation2 + $0x9] sm:$0xff]  ;;  %952 = vrot.lane.b32.xlu0 %v914_v25, %s5263_s7  ;;  %950 = vrot.lane.b32.xlu2 %v913_v23, %s5263_s7  ;;  %v925_v44 = vld [vmem:[#allocation2 + $0x11] sm:$0xff] }
 0x12a   : > { %1009 = vrot.lane.b32.xlu1 %v924_v26, %s5262_s6  ;;  %v4876_v26 = vld [vmem:[%s7038_s1 + $0x28] sm:$0xff] }
 0x12b   : > { %v874_v39 = vpop.permute.xlu2 %873  ;;  %1146 = vmatpush.bf16.msra.mxu0 %v4876_v26  ;;  %4927 = vmatpush.bf16.msra.mxu1 %v4876_v26 }
 0x12c   : > { %905 = vst.msk [vmem:[#allocation2 + $0x30] sm:$0xff] %vm899_vm10, %v874_v39  ;;  %4928 = vmatpush.bf16.msra.mxu3 %v4876_v26 }
 0x12f   : > { %v876_v17 = vpop.permute.xlu0 %875  ;;  %v927_v49 = vld [vmem:[#allocation2 + $0x21] sm:$0xff]  ;;  %v926_v60 = vld [vmem:[#allocation2 + $0x19] sm:$0xff]  ;;  %1147 = vmatpush.bf16.msra.mxu0 %v4875_v22  ;;  %4929 = vmatpush.bf16.msra.mxu1 %v4875_v22 }
 0x130   : > { %906 = vst.msk [vmem:[#allocation2 + $0x38] sm:$0xff] %vm899_vm10, %v876_v17  ;;  %v915_v57 = vld [vmem:[#allocation2 + $0x1f] sm:$0xff]  ;;  %v916_v18 = vld [vmem:[#allocation2 + $0x27] sm:$0xff]  ;;  %4930 = vmatpush.bf16.msra.mxu3 %v4875_v22 }
 0x131   : > { %1011 = vrot.lane.b32.xlu2 %v925_v44, %s5262_s6  ;;  %1015 = vrot.lane.b32.xlu0 %v927_v49, %s5262_s6 }
 0x132   : > { %881 = vrot.lane.b32.xlu1 %v848_v31, %s5262_s6 }
 0x133   : > { %v917_v1 = vld [vmem:[#allocation2 + $0x2f] sm:$0xff]  ;;  %1148 = vmatpush.bf16.msra.mxu0 %v4874_v55  ;;  %4931 = vmatpush.bf16.msra.mxu1 %v4874_v55 }
 0x134   : > { %v928_v10 = vld [vmem:[#allocation2 + $0x29] sm:$0xff]  ;;  %4932 = vmatpush.bf16.msra.mxu3 %v4874_v55 }
 0x137   : > { %v878_v33 = vpop.permute.xlu0 %877  ;;  %v918_v9 = vld [vmem:[#allocation2 + $0x37] sm:$0xff]  ;;  %1149 = vmatpush.bf16.msra.mxu0 %v4873_v15  ;;  %4933 = vmatpush.bf16.msra.mxu1 %v4873_v15 }
 0x138   : > { %907 = vst.msk [vmem:[#allocation2 + $0x40] sm:$0xff] %vm899_vm10, %v878_v33  ;;  %v929_v21 = vld [vmem:[#allocation2 + $0x31] sm:$0xff]  ;;  %4934 = vmatpush.bf16.msra.mxu3 %v4873_v15 }
 0x139   : > { %883 = vrot.lane.b32.xlu2 %v849_v50, %s5262_s6  ;;  %958 = vrot.lane.b32.xlu0 %v917_v1, %s5263_s7 }
 0x13a   : > { %954 = vrot.lane.b32.xlu1 %v915_v57, %s5263_s7 }
 0x13b   : > { %1150 = vmatpush.bf16.msra.mxu0 %v4872_v56  ;;  %4935 = vmatpush.bf16.msra.mxu1 %v4872_v56 }
 0x13c   : > { %4936 = vmatpush.bf16.msra.mxu3 %v4872_v56 }
 0x13f   : > { %v880_v5 = vpop.permute.xlu0 %879  ;;  %v919_v41 = vld [vmem:[#allocation2 + $0x3f] sm:$0xff]  ;;  %1151 = vmatpush.bf16.msra.mxu0 %v4871_v45  ;;  %4937 = vmatpush.bf16.msra.mxu1 %v4871_v45 }
 0x140   : > { %908 = vst.msk [vmem:[#allocation2 + $0x48] sm:$0xff] %vm899_vm10, %v880_v5  ;;  %v930_v25 = vld [vmem:[#allocation2 + $0x39] sm:$0xff]  ;;  %4938 = vmatpush.bf16.msra.mxu3 %v4871_v45 }
 0x141   : > { %1013 = vrot.lane.b32.xlu2 %v926_v60, %s5262_s6  ;;  %960 = vrot.lane.b32.xlu0 %v918_v9, %s5263_s7 }
 0x142   : > { %885 = vrot.lane.b32.xlu1 %v850_v8, %s5262_s6 }
 0x147   : > { %v931_v11 = vld [vmem:[#allocation2 + $0x41] sm:$0xff] }
 0x148   : > { %v920_v23 = vld [vmem:[#allocation2 + $0x47] sm:$0xff] }
 0x149   : > { %956 = vrot.lane.b32.xlu2 %v916_v18, %s5263_s7  ;;  %1023 = vrot.lane.b32.xlu0 %v931_v11, %s5262_s6 }
 0x14a   : > { %1017 = vrot.lane.b32.xlu1 %v928_v10, %s5262_s6 }
 0x151   : > { %1019 = vrot.lane.b32.xlu2 %v929_v21, %s5262_s6 }
 0x152   : > { %962 = vrot.lane.b32.xlu1 %v919_v41, %s5263_s7 }
 0x159   : > { %1021 = vrot.lane.b32.xlu2 %v930_v25, %s5262_s6 }
 0x15a   : > { %964 = vrot.lane.b32.xlu1 %v920_v23, %s5263_s7 }
 0x17b   : > { %v949_v27 = vpop.permute.xlu1 %948 }
 0x17c   : > { %985 = vst.msk [vmem:[#allocation2 + $0x8] sm:$0xff] %vm984_vm15, %v949_v27 }
 0x183   : > { %v951_v29 = vpop.permute.xlu2 %950 }
 0x184   : > { %986 = vst.msk [vmem:[#allocation2 + $0x10] sm:$0xff] %vm984_vm15, %v951_v29 }
 0x18b   : > { %v1012_v34 = vpop.permute.xlu2 %1011 }
 0x18c   : > { %1047 = vst.msk [vmem:[#allocation2 + $0x10] sm:$0xff] %vm1045_vm0, %v1012_v34 }
 0x193   : > { %v884_v36 = vpop.permute.xlu2 %883  ;;  %v1059_v44 = vld [vmem:[#allocation2 + $0x10] sm:$0xff] }
 0x194   : > { %910 = vst.msk [vmem:[#allocation2 + $0x58] sm:$0xff] %vm899_vm10, %v884_v36  ;;  %v5793_v36 = vld [vmem:[%s7039_s2 + $0x2] ss:$0 sm:$0xff] }
 0x19b   : > { %v953_v37 = vpop.permute.xlu0 %952  ;;  %v1014_v39 = vpop.permute.xlu2 %1013 }
 0x19c   : > { %v1010_v31 = vpop.permute.xlu1 %1009  ;;  %987 = vst.msk [vmem:[#allocation2 + $0x18] sm:$0xff] %vm984_vm15, %v953_v37 }
 0x19d   : > { %1046 = vst.msk [vmem:[#allocation2 + $0x8] sm:$0xff] %vm1045_vm0, %v1010_v31 }
 0x19e   : > { %1048 = vst.msk [vmem:[#allocation2 + $0x18] sm:$0xff] %vm1045_vm0, %v1014_v39 }
 0x1a3   : > { %v957_v49 = vpop.permute.xlu2 %956  ;;  %v1016_v2 = vpop.permute.xlu0 %1015 }
 0x1a4   : > { %v882_v17 = vpop.permute.xlu1 %881  ;;  %v1058_v40 = vld [vmem:[#allocation2 + $0x8] sm:$0xff]  ;;  %989 = vst.msk [vmem:[#allocation2 + $0x28] sm:$0xff] %vm984_vm15, %v957_v49 }
 0x1a5   : > { %909 = vst.msk [vmem:[#allocation2 + $0x50] sm:$0xff] %vm899_vm10, %v882_v17  ;;  %v1070_v14 = vpack.c.bf16 %v1059_v44, %v1058_v40  ;;  %v1060_v8 = vld [vmem:[#allocation2 + $0x18] sm:$0xff] }
 0x1a7   : > { %4613 = vmatmul.msk.bf16.vlgmr.msra.gmra.mxu0 %vm628_vm12, %v1070_v14 }
 0x1ab   : > { %v1020_v57 = vpop.permute.xlu2 %1019  ;;  %v959_v1 = vpop.permute.xlu0 %958 }
 0x1ac   : > { %v921_v51 = vld [vmem:[#allocation2 + $0x4f] sm:$0xff]  ;;  %v955_v53 = vpop.permute.xlu1 %954  ;;  %990 = vst.msk [vmem:[#allocation2 + $0x30] sm:$0xff] %vm984_vm15, %v959_v1  ;;  %v922_v33 = vld [vmem:[#allocation2 + $0x57] sm:$0xff] }
 0x1ad   : > { %v932_v52 = vld [vmem:[#allocation2 + $0x49] sm:$0xff]  ;;  %v933_v58 = vld [vmem:[#allocation2 + $0x51] sm:$0xff]  ;;  %988 = vst.msk [vmem:[#allocation2 + $0x20] sm:$0xff] %vm984_vm15, %v955_v53  ;;  %966 = vrot.lane.b32.xlu2 %v921_v51, %s5263_s7 }
 0x1ae   : > { %1025 = vrot.lane.b32.xlu0 %v932_v52, %s5262_s6  ;;  %1049 = vst.msk [vmem:[#allocation2 + $0x20] sm:$0xff] %vm1045_vm0, %v1016_v2  ;;  %1027 = vrot.lane.b32.xlu1 %v933_v58, %s5262_s6 }
 0x1af   : > { %1051 = vst.msk [vmem:[#allocation2 + $0x30] sm:$0xff] %vm1045_vm0, %v1020_v57 }
 0x1b3   : > { %v1022_v0 = vpop.permute.xlu2 %1021  ;;  %v961_v38 = vpop.permute.xlu0 %960 }
 0x1b4   : > { %v886_v50 = vpop.permute.xlu1 %885  ;;  %991 = vst.msk [vmem:[#allocation2 + $0x38] sm:$0xff] %vm984_vm15, %v961_v38 }
 0x1b5   : > { %911 = vst.msk [vmem:[#allocation2 + $0x60] sm:$0xff] %vm899_vm10, %v886_v50  ;;  %968 = vrot.lane.b32.xlu2 %v922_v33, %s5263_s7  ;;  %v1061_v5 = vld [vmem:[#allocation2 + $0x20] sm:$0xff] }
 0x1b6   : > { %v1071_v60 = vpack.c.bf16 %v1061_v5, %v1060_v8  ;;  %1052 = vst.msk [vmem:[#allocation2 + $0x38] sm:$0xff] %vm1045_vm0, %v1022_v0  ;;  %v1063_v23 = vld [vmem:[#allocation2 + $0x30] sm:$0xff] }
 0x1b8   : > { %4614 = vmatmul.msk.bf16.gmra.mxu0 %vm628_vm12, %v1071_v60 }
 0x1bb   : > { %v1024_v25 = vpop.permute.xlu0 %1023 }
 0x1bc   : > { %v923_v9 = vld [vmem:[#allocation2 + $0x5f] sm:$0xff]  ;;  %v1018_v18 = vpop.permute.xlu1 %1017 }
 0x1bd   : > { %v934_v10 = vld [vmem:[#allocation2 + $0x59] sm:$0xff]  ;;  %v935_v11 = vld [vmem:[#allocation2 + $0x61] sm:$0xff]  ;;  %1050 = vst.msk [vmem:[#allocation2 + $0x28] sm:$0xff] %vm1045_vm0, %v1018_v18  ;;  %970 = vrot.lane.b32.xlu0 %v923_v9, %s5263_s7 }
 0x1be   : > { %1031 = vrot.lane.b32.xlu2 %v935_v11, %s5262_s6  ;;  %1029 = vrot.lane.b32.xlu1 %v934_v10, %s5262_s6  ;;  %v1064_v15 = vld [vmem:[#allocation2 + $0x38] sm:$0xff] }
 0x1c4   : > { %v963_v41 = vpop.permute.xlu1 %962  ;;  %v1062_v21 = vld [vmem:[#allocation2 + $0x28] sm:$0xff] }
 0x1c5   : > { %992 = vst.msk [vmem:[#allocation2 + $0x40] sm:$0xff] %vm984_vm15, %v963_v41  ;;  %v1072_v26 = vpack.c.bf16 %v1063_v23, %v1062_v21 }
 0x1c6   : > { %1053 = vst.msk [vmem:[#allocation2 + $0x40] sm:$0xff] %vm1045_vm0, %v1024_v25 }
 0x1c7   : > { %4615 = vmatmul.msk.bf16.vlgmr.msra.gmra.mxu1 %vm628_vm12, %v1072_v26 }
 0x1cc   : > { %v965_v22 = vpop.permute.xlu1 %964 }
 0x1cd   : > { %993 = vst.msk [vmem:[#allocation2 + $0x48] sm:$0xff] %vm984_vm15, %v965_v22  ;;  %v1065_v55 = vld [vmem:[#allocation2 + $0x40] sm:$0xff] }
 0x1ce   : > { %v1073_v27 = vpack.c.bf16 %v1065_v55, %v1064_v15 }
 0x1d7   : > { %4616 = vmatmul.msk.bf16.gmra.mxu1 %vm628_vm12, %v1073_v27 }
 0x207   : > { %v967_v56 = vpop.permute.xlu2 %966 }
 0x208   : > { %994 = vst.msk [vmem:[#allocation2 + $0x50] sm:$0xff] %vm984_vm15, %v967_v56 }
 0x20f   : > { %v969_v45 = vpop.permute.xlu2 %968 }
 0x210   : > { %995 = vst.msk [vmem:[#allocation2 + $0x58] sm:$0xff] %vm984_vm15, %v969_v45 }
 0x218   : > { %v1032_v33 = vpop.permute.xlu2 %1031 }
 0x220   : > { %v1026_v29 = vpop.permute.xlu0 %1025  ;;  %v1028_v34 = vpop.permute.xlu1 %1027 }
 0x221   : > { %1054 = vst.msk [vmem:[#allocation2 + $0x48] sm:$0xff] %vm1045_vm0, %v1026_v29 }
 0x222   : > { %1055 = vst.msk [vmem:[#allocation2 + $0x50] sm:$0xff] %vm1045_vm0, %v1028_v34 }
 0x224   : > { %v1153_v31 = vpop.f32.mrf.mxu0 }
 0x225   : > { %v1154_v37 = vadd.f32 %v5793_v36, %v1153_v31 }
 0x227   : > { %v1195_v39 = vmul.f32 0.044715, %v1154_v37  ;;  %v1183_v18 = vmul.f32 0.5, %v1154_v37 }
 0x228   : > { %v1066_v17 = vld [vmem:[#allocation2 + $0x48] sm:$0xff] }
 0x229   : > { %v1067_v40 = vld [vmem:[#allocation2 + $0x50] sm:$0xff]  ;;  %v1207_v44 = vmul.f32 %v1195_v39, %v1154_v37 }
 0x22a   : > { %v1074_v49 = vpack.c.bf16 %v1067_v40, %v1066_v17 }
 0x22b   : > { %v1219_v2 = vmul.f32 %v1207_v44, %v1154_v37 }
 0x22c   : > { %4617 = vmatmul.msk.bf16.vlgmr.msra.gmra.mxu3 %vm628_vm12, %v1074_v49  ;;  %v1155_v14 = vpop.f32.mrf.mxu0 }
 0x22d   : > { %v1156_v51 = vadd.f32 %v5793_v36, %v1155_v14  ;;  %v1231_v52 = vadd.f32 %v1219_v2, %v1154_v37 }
 0x22f   : > { %v1196_v53 = vmul.f32 0.044715, %v1156_v51  ;;  %v971_v58 = vpop.permute.xlu0 %970  ;;  %v1243_v57 = vmul.f32 0.7978846, %v1231_v52  ;;  %v1184_v34 = vmul.f32 0.5, %v1156_v51 }
 0x230   : > { %v1030_v1 = vpop.permute.xlu1 %1029  ;;  %996 = vst.msk [vmem:[#allocation2 + $0x60] sm:$0xff] %vm984_vm15, %v971_v58 }
 0x231   : > { %v1208_v50 = vmul.f32 %v1196_v53, %v1156_v51  ;;  %1056 = vst.msk [vmem:[#allocation2 + $0x58] sm:$0xff] %vm1045_vm0, %v1030_v1  ;;  %5026 = vtanh.f32 %v1243_v57 }
 0x232   : > { %1057 = vst.msk [vmem:[#allocation2 + $0x60] sm:$0xff] %vm1045_vm0, %v1032_v33 }
 0x233   : > { %v1220_v0 = vmul.f32 %v1208_v50, %v1156_v51 }
 0x235   : > { %v1158_v38 = vpop.f32.mrf.mxu0  ;;  %v1232_v8 = vadd.f32 %v1220_v0, %v1156_v51 }
 0x236   : > { %v1159_v5 = vadd.f32 %v5793_v36, %v1158_v38 }
 0x237   : > { %v5027_v60 = vpop.eup %5026  ;;  %v1244_v9 = vmul.f32 0.7978846, %v1232_v8 }
 0x238   : > { %v1197_v10 = vmul.f32 0.044715, %v1159_v5  ;;  %v1068_v11 = vld [vmem:[#allocation2 + $0x58] sm:$0xff]  ;;  %v1267_v41 = vadd.f32 1.0, %v5027_v60  ;;  %v1185_v1 = vmul.f32 0.5, %v1159_v5 }
 0x239   : > { %v1069_v21 = vld [vmem:[#allocation2 + $0x60] sm:$0xff]  ;;  %5028 = vtanh.f32 %v1244_v9 }
 0x23a   : > { %v1209_v23 = vmul.f32 %v1197_v10, %v1159_v5  ;;  %v1075_v25 = vpack.c.bf16 %v1069_v21, %v1068_v11  ;;  %v1279_v26 = vmul.f32 %v1267_v41, %v1183_v18 }
 0x23c   : > { %4618 = vmatmul.msk.bf16.gmra.mxu3 %vm628_vm12, %v1075_v25  ;;  %v1291_v22 = vmul.f32 %v5462_v20, %v1279_v26  ;;  %v1221_v55 = vmul.f32 %v1209_v23, %v1159_v5 }
 0x23d   : > { %v1160_v15 = vpop.f32.mrf.mxu0 }
 0x23e   : > { %v1161_v27 = vadd.f32 %v5793_v36, %v1160_v15  ;;  %1315 = vrot.lane.b32.xlu0 %v1291_v22, %s5262_s6  ;;  %v1233_v56 = vadd.f32 %v1221_v55, %v1159_v5 }
 0x23f   : > { %v5029_v45 = vpop.eup %5028 }
 0x240   : > { %v1198_v29 = vmul.f32 0.044715, %v1161_v27  ;;  %v1268_v31 = vadd.f32 1.0, %v5029_v45  ;;  %v1245_v37 = vmul.f32 0.7978846, %v1233_v56  ;;  %v1186_v41 = vmul.f32 0.5, %v1161_v27 }
 0x242   : > { %v1210_v39 = vmul.f32 %v1198_v29, %v1161_v27  ;;  %v1280_v17 = vmul.f32 %v1268_v31, %v1184_v34  ;;  %5030 = vtanh.f32 %v1245_v37 }
 0x244   : > { %v1163_v40 = vpop.f32.mrf.mxu1  ;;  %v1292_v44 = vmul.f32 %v5490_v46, %v1280_v17  ;;  %v1222_v49 = vmul.f32 %v1210_v39, %v1161_v27 }
 0x245   : > { %v1164_v2 = vadd.f32 %v5793_v36, %v1163_v40 }
 0x246   : > { %1317 = vrot.lane.b32.xlu1 %v1292_v44, %s5262_s6  ;;  %v1234_v14 = vadd.f32 %v1222_v49, %v1161_v27 }
 0x247   : > { %v1199_v52 = vmul.f32 0.044715, %v1164_v2  ;;  %v1187_v29 = vmul.f32 0.5, %v1164_v2 }
 0x248   : > { %v5031_v53 = vpop.eup %5030  ;;  %v1246_v58 = vmul.f32 0.7978846, %v1234_v14 }
 0x249   : > { %v1211_v57 = vmul.f32 %v1199_v52, %v1164_v2  ;;  %v1269_v51 = vadd.f32 1.0, %v5031_v53 }
 0x24a   : > { %5032 = vtanh.f32 %v1246_v58 }
 0x24b   : > { %v1281_v33 = vmul.f32 %v1269_v51, %v1185_v1  ;;  %v1223_v50 = vmul.f32 %v1211_v57, %v1164_v2 }
 0x24c   : > { %v1165_v0 = vpop.f32.mrf.mxu1 }
 0x24d   : > { %v1166_v38 = vadd.f32 %v5793_v36, %v1165_v0  ;;  %v1293_v8 = vmul.f32 %v5457_v16, %v1281_v33  ;;  %v1235_v60 = vadd.f32 %v1223_v50, %v1164_v2 }
 0x24f   : > { %v1200_v9 = vmul.f32 0.044715, %v1166_v38  ;;  %1319 = vrot.lane.b32.xlu2 %v1293_v8, %s5262_s6  ;;  %v1247_v10 = vmul.f32 0.7978846, %v1235_v60  ;;  %v1188_v53 = vmul.f32 0.5, %v1166_v38 }
 0x250   : > { %v5033_v11 = vpop.eup %5032 }
 0x251   : > { %v1212_v18 = vmul.f32 %v1200_v9, %v1166_v38  ;;  %v1270_v21 = vadd.f32 1.0, %v5033_v11  ;;  %5034 = vtanh.f32 %v1247_v10 }
 0x253   : > { %v1282_v5 = vmul.f32 %v1270_v21, %v1186_v41  ;;  %v1224_v23 = vmul.f32 %v1212_v18, %v1166_v38 }
 0x254   : > { %v1168_v25 = vpop.f32.mrf.mxu1 }
 0x255   : > { %v1169_v26 = vadd.f32 %v5793_v36, %v1168_v25  ;;  %v1294_v22 = vmul.f32 %v5556_v63, %v1282_v5  ;;  %v1236_v55 = vadd.f32 %v1224_v23, %v1166_v38 }
 0x257   : > { %v5035_v15 = vpop.eup %5034  ;;  %v1201_v56 = vmul.f32 0.044715, %v1169_v26  ;;  %1321 = vrot.lane.b32.xlu0 %v1294_v22, %s5262_s6  ;;  %v1248_v45 = vmul.f32 0.7978846, %v1236_v55  ;;  %v1189_v8 = vmul.f32 0.5, %v1169_v26 }
 0x258   : > { %v1271_v34 = vadd.f32 1.0, %v5035_v15 }
 0x259   : > { %v1213_v31 = vmul.f32 %v1201_v56, %v1169_v26  ;;  %5036 = vtanh.f32 %v1248_v45 }
 0x25a   : > { %v1283_v27 = vmul.f32 %v1271_v34, %v1187_v29 }
 0x25b   : > { %v1225_v37 = vmul.f32 %v1213_v31, %v1169_v26 }
 0x25c   : > { %v1170_v39 = vpop.f32.mrf.mxu1  ;;  %v1295_v17 = vmul.f32 %v5511_v12, %v1283_v27 }
 0x25d   : > { %v1171_v40 = vadd.f32 %v5793_v36, %v1170_v39  ;;  %v1237_v44 = vadd.f32 %v1225_v37, %v1169_v26 }
 0x25e   : > { %1323 = vrot.lane.b32.xlu1 %v1295_v17, %s5262_s6 }
 0x25f   : > { %v5037_v49 = vpop.eup %5036  ;;  %v1202_v14 = vmul.f32 0.044715, %v1171_v40  ;;  %v1249_v52 = vmul.f32 0.7978846, %v1237_v44  ;;  %v1190_v11 = vmul.f32 0.5, %v1171_v40 }
 0x260   : > { %v1272_v58 = vadd.f32 1.0, %v5037_v49 }
 0x261   : > { %v1214_v57 = vmul.f32 %v1202_v14, %v1171_v40  ;;  %5038 = vtanh.f32 %v1249_v52 }
 0x262   : > { %v1284_v2 = vmul.f32 %v1272_v58, %v1188_v53 }
 0x263   : > { %v1226_v1 = vmul.f32 %v1214_v57, %v1171_v40 }
 0x264   : > { %v1296_v51 = vmul.f32 %v5629_v61, %v1284_v2 }
 0x265   : > { %v1238_v33 = vadd.f32 %v1226_v1, %v1171_v40 }
 0x266   : > { %1325 = vrot.lane.b32.xlu2 %v1296_v51, %s5262_s6 }
 0x267   : > { %v5039_v50 = vpop.eup %5038  ;;  %v1250_v0 = vmul.f32 0.7978846, %v1238_v33 }
 0x268   : > { %v1273_v60 = vadd.f32 1.0, %v5039_v50 }
 0x269   : > { %5040 = vtanh.f32 %v1250_v0 }
 0x26a   : > { %v1285_v9 = vmul.f32 %v1273_v60, %v1189_v8 }
 0x26c   : > { %v1297_v10 = vmul.f32 %v5596_v35, %v1285_v9 }
 0x26e   : > { %1327 = vrot.lane.b32.xlu0 %v1297_v10, %s5262_s6 }
 0x26f   : > { %v5041_v38 = vpop.eup %5040 }
 0x270   : > { %v1274_v18 = vadd.f32 1.0, %v5041_v38 }
 0x272   : > { %v1286_v41 = vmul.f32 %v1274_v18, %v1190_v11 }
 0x274   : > { %v1298_v21 = vmul.f32 %v5612_v19, %v1286_v41 }
 0x276   : > { %1329 = vrot.lane.b32.xlu0 %v1298_v21, %s5262_s6 }
 0x2a9   : > { %v1320_v5 = vpop.permute.xlu2 %1319 }
 0x2aa   : > { %1353 = vst.msk [vmem:[#allocation2 + $0x18] sm:$0xff] %vm899_vm10, %v1320_v5 }
 0x2af   : > { %v1173_v23 = vpop.f32.mrf.mxu3 }
 0x2b0   : > { %v1174_v25 = vadd.f32 %v5793_v36, %v1173_v23  ;;  %v1316_v26 = vpop.permute.xlu0 %1315 }
 0x2b1   : > { %1351 = vst.msk [vmem:[#allocation2 + $0x8] sm:$0xff] %vm899_vm10, %v1316_v26 }
 0x2b2   : > { %v1203_v22 = vmul.f32 0.044715, %v1174_v25  ;;  %v1191_v1 = vmul.f32 0.5, %v1174_v25 }
 0x2b4   : > { %v1215_v55 = vmul.f32 %v1203_v22, %v1174_v25 }
 0x2b6   : > { %v1227_v15 = vmul.f32 %v1215_v55, %v1174_v25 }
 0x2b7   : > { %v1175_v56 = vpop.f32.mrf.mxu3 }
 0x2b8   : > { %v1176_v45 = vadd.f32 %v5793_v36, %v1175_v56  ;;  %v1239_v29 = vadd.f32 %v1227_v15, %v1174_v25  ;;  %v1363_v34 = vld [vmem:[#allocation2 + $0x7] sm:$0xff]  ;;  %v1318_v31 = vpop.permute.xlu1 %1317 }
 0x2b9   : > { %1352 = vst.msk [vmem:[#allocation2 + $0x10] sm:$0xff] %vm899_vm10, %v1318_v31  ;;  %1399 = vrot.lane.b32.xlu1 %v1363_v34, %s5263_s7 }
 0x2ba   : > { %v1204_v27 = vmul.f32 0.044715, %v1176_v45  ;;  %v1251_v37 = vmul.f32 0.7978846, %v1239_v29  ;;  %v1192_v21 = vmul.f32 0.5, %v1176_v45 }
 0x2bc   : > { %v1216_v39 = vmul.f32 %v1204_v27, %v1176_v45  ;;  %5042 = vtanh.f32 %v1251_v37 }
 0x2be   : > { %v1228_v17 = vmul.f32 %v1216_v39, %v1176_v45 }
 0x2bf   : > { %v1178_v40 = vpop.f32.mrf.mxu3 }
 0x2c0   : > { %v1240_v44 = vadd.f32 %v1228_v17, %v1176_v45  ;;  %v1364_v49 = vld [vmem:[#allocation2 + $0xf] sm:$0xff]  ;;  %v1179_v52 = vadd.f32 %v5793_v36, %v1178_v40  ;;  %v1326_v53 = vpop.permute.xlu2 %1325  ;;  %v1365_v9 = vld [vmem:[#allocation2 + $0x17] sm:$0xff] }
 0x2c1   : > { %v1375_v14 = vld [vmem:[#allocation2 + $0x9] sm:$0xff]  ;;  %1356 = vst.msk [vmem:[#allocation2 + $0x30] sm:$0xff] %vm899_vm10, %v1326_v53  ;;  %1401 = vrot.lane.b32.xlu2 %v1364_v49, %s5263_s7  ;;  %v1376_v10 = vld [vmem:[#allocation2 + $0x11] sm:$0xff] }
 0x2c2   : > { %v5043_v58 = vpop.eup %5042  ;;  %1459 = vrot.lane.b32.xlu1 %v1375_v14, %s5262_s6  ;;  %v1252_v57 = vmul.f32 0.7978846, %v1240_v44  ;;  %v1205_v2 = vmul.f32 0.044715, %v1179_v52  ;;  %v1193_v27 = vmul.f32 0.5, %v1179_v52 }
 0x2c3   : > { %v1275_v51 = vadd.f32 1.0, %v5043_v58 }
 0x2c4   : > { %5044 = vtanh.f32 %v1252_v57  ;;  %v1217_v33 = vmul.f32 %v1205_v2, %v1179_v52 }
 0x2c5   : > { %v1287_v50 = vmul.f32 %v1275_v51, %v1191_v1 }
 0x2c6   : > { %v1229_v8 = vmul.f32 %v1217_v33, %v1179_v52 }
 0x2c7   : > { %v1299_v0 = vmul.f32 %v5622_v48, %v1287_v50  ;;  %v1180_v60 = vpop.f32.mrf.mxu3 }
 0x2c8   : > { %v1181_v38 = vadd.f32 %v5793_v36, %v1180_v60  ;;  %v1241_v11 = vadd.f32 %v1229_v8, %v1179_v52  ;;  %v4882_v60 = vld [vmem:[%s7038_s1 + $0x58] sm:$0xff] }
 0x2c9   : > { %1331 = vrot.lane.b32.xlu0 %v1299_v0, %s5262_s6  ;;  %1461 = vrot.lane.b32.xlu2 %v1376_v10, %s5262_s6  ;;  %v1322_v41 = vpop.permute.xlu0 %1321  ;;  %v4880_v10 = vld [vmem:[%s7038_s1 + $0x48] sm:$0xff] }
 0x2ca   : > { %v5045_v18 = vpop.eup %5044  ;;  %1403 = vrot.lane.b32.xlu1 %v1365_v9, %s5263_s7  ;;  %v1206_v5 = vmul.f32 0.044715, %v1181_v38  ;;  %1354 = vst.msk [vmem:[#allocation2 + $0x20] sm:$0xff] %vm899_vm10, %v1322_v41  ;;  %v1253_v25 = vmul.f32 0.7978846, %v1241_v11  ;;  %v1194_v14 = vmul.f32 0.5, %v1181_v38  ;;  %1595 = vmatpush.bf16.msrb.mxu1 %v4882_v60 }
 0x2cb   : > { %v1276_v23 = vadd.f32 1.0, %v5045_v18  ;;  %v4881_v9 = vld [vmem:[%s7038_s1 + $0x50] sm:$0xff]  ;;  %v4878_v11 = vld [vmem:[%s7038_s1 + $0x38] sm:$0xff] }
 0x2cc   : > { %v1218_v26 = vmul.f32 %v1206_v5, %v1181_v38  ;;  %5046 = vtanh.f32 %v1253_v25  ;;  %v4877_v41 = vld [vmem:[%s7038_s1 + $0x30] sm:$0xff] }
 0x2cd   : > { %v1288_v22 = vmul.f32 %v1276_v23, %v1192_v21 }
 0x2ce   : > { %v1230_v55 = vmul.f32 %v1218_v26, %v1181_v38  ;;  %1596 = vmatpush.bf16.msrb.mxu1 %v4881_v9 }
 0x2cf   : > { %v1300_v36 = vmul.f32 %v5697_v32, %v1288_v22 }
 0x2d0   : > { %v1324_v15 = vpop.permute.xlu1 %1323  ;;  %v1242_v56 = vadd.f32 %v1230_v55, %v1181_v38  ;;  %v4879_v38 = vld [vmem:[%s7038_s1 + $0x40] sm:$0xff] }
 0x2d1   : > { %1333 = vrot.lane.b32.xlu0 %v1300_v36, %s5262_s6  ;;  %v1366_v29 = vld [vmem:[#allocation2 + $0x1f] sm:$0xff]  ;;  %1355 = vst.msk [vmem:[#allocation2 + $0x28] sm:$0xff] %vm899_vm10, %v1324_v15 }
 0x2d2   : > { %v1377_v34 = vld [vmem:[#allocation2 + $0x19] sm:$0xff]  ;;  %v5047_v45 = vpop.eup %5046  ;;  %1405 = vrot.lane.b32.xlu2 %v1366_v29, %s5263_s7  ;;  %v1254_v31 = vmul.f32 0.7978846, %v1242_v56  ;;  %1597 = vmatpush.bf16.msrb.mxu1 %v4880_v10 }
 0x2d3   : > { %1463 = vrot.lane.b32.xlu1 %v1377_v34, %s5262_s6  ;;  %v1277_v37 = vadd.f32 1.0, %v5047_v45 }
 0x2d4   : > { %5048 = vtanh.f32 %v1254_v31 }
 0x2d5   : > { %v1289_v39 = vmul.f32 %v1277_v37, %v1193_v27 }
 0x2d6   : > { %1598 = vmatpush.bf16.msrb.mxu1 %v4879_v38 }
 0x2d7   : > { %v1301_v17 = vmul.f32 %v5714_v54, %v1289_v39 }
 0x2d8   : > { %v1367_v40 = vld [vmem:[#allocation2 + $0x27] sm:$0xff]  ;;  %v1368_v2 = vld [vmem:[#allocation2 + $0x2f] sm:$0xff] }
 0x2d9   : > { %v1378_v44 = vld [vmem:[#allocation2 + $0x21] sm:$0xff]  ;;  %1335 = vrot.lane.b32.xlu0 %v1301_v17, %s5262_s6  ;;  %v1379_v1 = vld [vmem:[#allocation2 + $0x29] sm:$0xff] }
 0x2da   : > { %v5049_v49 = vpop.eup %5048  ;;  %1465 = vrot.lane.b32.xlu2 %v1378_v44, %s5262_s6  ;;  %1599 = vmatpush.bf16.msrb.mxu1 %v4878_v11 }
 0x2db   : > { %1407 = vrot.lane.b32.xlu1 %v1367_v40, %s5263_s7  ;;  %v1278_v53 = vadd.f32 1.0, %v5049_v49 }
 0x2dd   : > { %v1290_v58 = vmul.f32 %v1278_v53, %v1194_v14 }
 0x2de   : > { %1600 = vmatpush.bf16.msrb.mxu1 %v4877_v41 }
 0x2df   : > { %v1302_v57 = vmul.f32 %v5723_v4, %v1290_v58 }
 0x2e0   : > { %v1328_v52 = vpop.permute.xlu0 %1327 }
 0x2e1   : > { %1337 = vrot.lane.b32.xlu0 %v1302_v57, %s5262_s6  ;;  %1357 = vst.msk [vmem:[#allocation2 + $0x38] sm:$0xff] %vm899_vm10, %v1328_v52 }
 0x2e2   : > { %1409 = vrot.lane.b32.xlu2 %v1368_v2, %s5263_s7 }
 0x2e3   : > { %1467 = vrot.lane.b32.xlu1 %v1379_v1, %s5262_s6 }
 0x2e8   : > { %v1369_v51 = vld [vmem:[#allocation2 + $0x37] sm:$0xff]  ;;  %v1330_v50 = vpop.permute.xlu0 %1329 }
 0x2e9   : > { %v1380_v33 = vld [vmem:[#allocation2 + $0x31] sm:$0xff]  ;;  %1358 = vst.msk [vmem:[#allocation2 + $0x40] sm:$0xff] %vm899_vm10, %v1330_v50  ;;  %1411 = vrot.lane.b32.xlu0 %v1369_v51, %s5263_s7 }
 0x2ea   : > { %1469 = vrot.lane.b32.xlu2 %v1380_v33, %s5262_s6 }
 0x2f0   : > { %v1370_v0 = vld [vmem:[#allocation2 + $0x3f] sm:$0xff] }
 0x2f1   : > { %v1381_v8 = vld [vmem:[#allocation2 + $0x39] sm:$0xff]  ;;  %1413 = vrot.lane.b32.xlu1 %v1370_v0, %s5263_s7 }
 0x2f2   : > { %1471 = vrot.lane.b32.xlu2 %v1381_v8, %s5262_s6 }
 0x31b   : > { %v1402_v18 = vpop.permute.xlu2 %1401 }
 0x31c   : > { %1436 = vst.msk [vmem:[#allocation2 + $0x10] sm:$0xff] %vm984_vm15, %v1402_v18 }
 0x323   : > { %v1462_v21 = vpop.permute.xlu2 %1461 }
 0x324   : > { %1496 = vst.msk [vmem:[#allocation2 + $0x10] sm:$0xff] %vm1045_vm0, %v1462_v21  ;;  %v5915_v21 = vld [vmem:[%s7039_s2 + $0x3] ss:$0 sm:$0xff] }
 0x32b   : > { %v1400_v5 = vpop.permute.xlu1 %1399  ;;  %v1508_v15 = vld [vmem:[#allocation2 + $0x10] sm:$0xff] }
 0x32c   : > { %1435 = vst.msk [vmem:[#allocation2 + $0x8] sm:$0xff] %vm984_vm15, %v1400_v5  ;;  %v1406_v23 = vpop.permute.xlu2 %1405 }
 0x32d   : > { %1438 = vst.msk [vmem:[#allocation2 + $0x20] sm:$0xff] %vm984_vm15, %v1406_v23 }
 0x334   : > { %v1460_v25 = vpop.permute.xlu1 %1459  ;;  %v1466_v26 = vpop.permute.xlu2 %1465 }
 0x335   : > { %1495 = vst.msk [vmem:[#allocation2 + $0x8] sm:$0xff] %vm1045_vm0, %v1460_v25 }
 0x336   : > { %1498 = vst.msk [vmem:[#allocation2 + $0x20] sm:$0xff] %vm1045_vm0, %v1466_v26 }
 0x33b   : > { %v1332_v22 = vpop.permute.xlu0 %1331 }
 0x33c   : > { %1359 = vst.msk [vmem:[#allocation2 + $0x48] sm:$0xff] %vm899_vm10, %v1332_v22  ;;  %v1404_v36 = vpop.permute.xlu1 %1403  ;;  %v1507_v55 = vld [vmem:[#allocation2 + $0x8] sm:$0xff]  ;;  %v1410_v56 = vpop.permute.xlu2 %1409 }
 0x33d   : > { %1437 = vst.msk [vmem:[#allocation2 + $0x18] sm:$0xff] %vm984_vm15, %v1404_v36  ;;  %v1519_v29 = vpack.c.bf16 %v1508_v15, %v1507_v55  ;;  %v1510_v14 = vld [vmem:[#allocation2 + $0x20] sm:$0xff] }
 0x33e   : > { %1440 = vst.msk [vmem:[#allocation2 + $0x30] sm:$0xff] %vm984_vm15, %v1410_v56 }
 0x33f   : > { %4643 = vmatmul.msk.bf16.vlgmr.msrb.gmra.mxu1 %vm628_vm12, %v1519_v29 }
 0x343   : > { %v1371_v34 = vld [vmem:[#allocation2 + $0x47] sm:$0xff]  ;;  %v1334_v31 = vpop.permute.xlu0 %1333 }
 0x344   : > { %v1382_v45 = vld [vmem:[#allocation2 + $0x41] sm:$0xff]  ;;  %1360 = vst.msk [vmem:[#allocation2 + $0x50] sm:$0xff] %vm899_vm10, %v1334_v31  ;;  %1415 = vrot.lane.b32.xlu1 %v1371_v34, %s5263_s7  ;;  %v1470_v37 = vpop.permute.xlu2 %1469 }
 0x345   : > { %1473 = vrot.lane.b32.xlu0 %v1382_v45, %s5262_s6  ;;  %v1464_v27 = vpop.permute.xlu1 %1463  ;;  %1500 = vst.msk [vmem:[#allocation2 + $0x30] sm:$0xff] %vm1045_vm0, %v1470_v37 }
 0x346   : > { %1497 = vst.msk [vmem:[#allocation2 + $0x18] sm:$0xff] %vm1045_vm0, %v1464_v27 }
 0x34b   : > { %v1372_v39 = vld [vmem:[#allocation2 + $0x4f] sm:$0xff]  ;;  %v1336_v40 = vpop.permute.xlu0 %1335 }
 0x34c   : > { %v1383_v17 = vld [vmem:[#allocation2 + $0x49] sm:$0xff]  ;;  %1417 = vrot.lane.b32.xlu2 %v1372_v39, %s5263_s7  ;;  %1361 = vst.msk [vmem:[#allocation2 + $0x58] sm:$0xff] %vm899_vm10, %v1336_v40  ;;  %v1472_v0 = vpop.permute.xlu2 %1471 }
 0x34d   : > { %1475 = vrot.lane.b32.xlu0 %v1383_v17, %s5262_s6  ;;  %v1408_v44 = vpop.permute.xlu1 %1407  ;;  %v1509_v49 = vld [vmem:[#allocation2 + $0x18] sm:$0xff]  ;;  %v1512_v60 = vld [vmem:[#allocation2 + $0x30] sm:$0xff] }
 0x34e   : > { %1439 = vst.msk [vmem:[#allocation2 + $0x28] sm:$0xff] %vm984_vm15, %v1408_v44  ;;  %v1520_v53 = vpack.c.bf16 %v1510_v14, %v1509_v49 }
 0x350   : > { %4644 = vmatmul.msk.bf16.gmra.mxu1 %vm628_vm12, %v1520_v53 }
 0x353   : > { %v1373_v58 = vld [vmem:[#allocation2 + $0x57] sm:$0xff]  ;;  %v1338_v52 = vpop.permute.xlu0 %1337 }
 0x354   : > { %v1384_v57 = vld [vmem:[#allocation2 + $0x51] sm:$0xff]  ;;  %1362 = vst.msk [vmem:[#allocation2 + $0x60] sm:$0xff] %vm899_vm10, %v1338_v52  ;;  %1419 = vrot.lane.b32.xlu2 %v1373_v58, %s5263_s7 }
 0x355   : > { %1477 = vrot.lane.b32.xlu1 %v1384_v57, %s5262_s6  ;;  %v1468_v2 = vpop.permute.xlu1 %1467 }
 0x356   : > { %1499 = vst.msk [vmem:[#allocation2 + $0x28] sm:$0xff] %vm1045_vm0, %v1468_v2 }
 0x35b   : > { %v1374_v1 = vld [vmem:[#allocation2 + $0x5f] sm:$0xff]  ;;  %v1412_v50 = vpop.permute.xlu0 %1411 }
 0x35c   : > { %v1385_v51 = vld [vmem:[#allocation2 + $0x59] sm:$0xff]  ;;  %v1386_v33 = vld [vmem:[#allocation2 + $0x61] sm:$0xff]  ;;  %1441 = vst.msk [vmem:[#allocation2 + $0x38] sm:$0xff] %vm984_vm15, %v1412_v50  ;;  %1421 = vrot.lane.b32.xlu0 %v1374_v1, %s5263_s7 }
 0x35d   : > { %1481 = vrot.lane.b32.xlu2 %v1386_v33, %s5262_s6  ;;  %1479 = vrot.lane.b32.xlu1 %v1385_v51, %s5262_s6  ;;  %v1511_v8 = vld [vmem:[#allocation2 + $0x28] sm:$0xff]  ;;  %1501 = vst.msk [vmem:[#allocation2 + $0x38] sm:$0xff] %vm1045_vm0, %v1472_v0 }
 0x35e   : > { %v1521_v9 = vpack.c.bf16 %v1512_v60, %v1511_v8 }
 0x360   : > { %4645 = vmatmul.msk.bf16.gmra.mxu1 %vm628_vm12, %v1521_v9 }
 0x363   : > { %v1414_v10 = vpop.permute.xlu1 %1413 }
 0x364   : > { %1442 = vst.msk [vmem:[#allocation2 + $0x40] sm:$0xff] %vm984_vm15, %v1414_v10  ;;  %v1513_v22 = vld [vmem:[#allocation2 + $0x38] sm:$0xff] }
 0x3a6   : > { %v1418_v38 = vpop.permute.xlu2 %1417 }
 0x3a7   : > { %1444 = vst.msk [vmem:[#allocation2 + $0x50] sm:$0xff] %vm984_vm15, %v1418_v38 }
 0x3ae   : > { %v1420_v11 = vpop.permute.xlu2 %1419 }
 0x3af   : > { %1445 = vst.msk [vmem:[#allocation2 + $0x58] sm:$0xff] %vm984_vm15, %v1420_v11 }
 0x3b6   : > { %v1416_v18 = vpop.permute.xlu1 %1415 }
 0x3b7   : > { %v1474_v41 = vpop.permute.xlu0 %1473  ;;  %1443 = vst.msk [vmem:[#allocation2 + $0x48] sm:$0xff] %vm984_vm15, %v1416_v18  ;;  %v1482_v51 = vpop.permute.xlu2 %1481 }
 0x3b8   : > { %1502 = vst.msk [vmem:[#allocation2 + $0x40] sm:$0xff] %vm1045_vm0, %v1474_v41 }
 0x3bc   : > { %v1602_v5 = vpop.f32.mrf.mxu1 }
 0x3bd   : > { %v1603_v23 = vadd.f32 %v5915_v21, %v1602_v5 }
 0x3bf   : > { %v1476_v25 = vpop.permute.xlu0 %1475  ;;  %v5919_v26 = vadd.f32 %v1603_v23, %v5448_v7  ;;  %v1514_v36 = vld [vmem:[#allocation2 + $0x40] sm:$0xff] }
 0x3c0   : > { %1503 = vst.msk [vmem:[#allocation2 + $0x48] sm:$0xff] %vm1045_vm0, %v1476_v25  ;;  %v1522_v55 = vpack.c.bf16 %v1514_v36, %v1513_v22 }
 0x3c1   : > { %v1656_v15 = vmul.f32 0.044715, %v5919_v26  ;;  %v1644_v50 = vmul.f32 0.5, %v5919_v26 }
 0x3c2   : > { %4646 = vmatmul.msk.bf16.gmra.mxu1 %vm628_vm12, %v1522_v55 }
 0x3c3   : > { %v1668_v56 = vmul.f32 %v1656_v15, %v5919_v26 }
 0x3c4   : > { %v1604_v29 = vpop.f32.mrf.mxu1 }
 0x3c5   : > { %v1605_v34 = vadd.f32 %v5915_v21, %v1604_v29  ;;  %v1680_v45 = vmul.f32 %v1668_v56, %v5919_v26 }
 0x3c7   : > { %v5928_v31 = vadd.f32 %v1605_v34, %v5483_v42  ;;  %v1478_v7 = vpop.permute.xlu1 %1477  ;;  %v1692_v27 = vadd.f32 %v1680_v45, %v5919_v26  ;;  %v1515_v53 = vld [vmem:[#allocation2 + $0x48] sm:$0xff] }
 0x3c8   : > { %1504 = vst.msk [vmem:[#allocation2 + $0x50] sm:$0xff] %vm1045_vm0, %v1478_v7 }
 0x3c9   : > { %v1704_v37 = vmul.f32 0.7978846, %v1692_v27  ;;  %v1657_v39 = vmul.f32 0.044715, %v5928_v31  ;;  %v1645_v23 = vmul.f32 0.5, %v5928_v31 }
 0x3cb   : > { %5050 = vtanh.f32 %v1704_v37  ;;  %v1669_v17 = vmul.f32 %v1657_v39, %v5928_v31 }
 0x3cd   : > { %v1607_v40 = vpop.f32.mrf.mxu1  ;;  %v1681_v44 = vmul.f32 %v1669_v17, %v5928_v31 }
 0x3ce   : > { %v1608_v49 = vadd.f32 %v5915_v21, %v1607_v40  ;;  %v1422_v52 = vpop.permute.xlu0 %1421 }
 0x3cf   : > { %v1480_v14 = vpop.permute.xlu1 %1479  ;;  %v1516_v42 = vld [vmem:[#allocation2 + $0x50] sm:$0xff]  ;;  %v1693_v58 = vadd.f32 %v1681_v44, %v5928_v31  ;;  %1446 = vst.msk [vmem:[#allocation2 + $0x60] sm:$0xff] %vm984_vm15, %v1422_v52 }
 0x3d0   : > { %v5938_v57 = vadd.f32 %v1608_v49, %v5445_v6  ;;  %1505 = vst.msk [vmem:[#allocation2 + $0x58] sm:$0xff] %vm1045_vm0, %v1480_v14  ;;  %v1523_v2 = vpack.c.bf16 %v1516_v42, %v1515_v53 }
 0x3d1   : > { %v5051_v1 = vpop.eup %5050  ;;  %v1705_v33 = vmul.f32 0.7978846, %v1693_v58  ;;  %1506 = vst.msk [vmem:[#allocation2 + $0x60] sm:$0xff] %vm1045_vm0, %v1482_v51 }
 0x3d2   : > { %4647 = vmatmul.msk.bf16.gmra.mxu1 %vm628_vm12, %v1523_v2  ;;  %v1728_v0 = vadd.f32 1.0, %v5051_v1  ;;  %v1658_v8 = vmul.f32 0.044715, %v5938_v57  ;;  %v1646_v44 = vmul.f32 0.5, %v5938_v57 }
 0x3d3   : > { %5052 = vtanh.f32 %v1705_v33 }
 0x3d4   : > { %v1740_v6 = vmul.f32 %v1728_v0, %v1644_v50  ;;  %v1670_v60 = vmul.f32 %v1658_v8, %v5938_v57 }
 0x3d5   : > { %v1609_v9 = vpop.f32.mrf.mxu1 }
 0x3d6   : > { %v1610_v10 = vadd.f32 %v5915_v21, %v1609_v9  ;;  %v1752_v38 = vmul.f32 %v5462_v20, %v1740_v6  ;;  %v1682_v11 = vmul.f32 %v1670_v60, %v5938_v57 }
 0x3d7   : > { %v1517_v56 = vld [vmem:[#allocation2 + $0x58] sm:$0xff] }
 0x3d8   : > { %v5951_v18 = vadd.f32 %v1610_v10, %v5480_v62  ;;  %1776 = vrot.lane.b32.xlu0 %v1752_v38, %s5262_s6  ;;  %v1694_v41 = vadd.f32 %v1682_v11, %v5938_v57  ;;  %v1518_v29 = vld [vmem:[#allocation2 + $0x60] sm:$0xff] }
 0x3d9   : > { %v5053_v5 = vpop.eup %5052  ;;  %v1524_v37 = vpack.c.bf16 %v1518_v29, %v1517_v56 }
 0x3da   : > { %v1729_v25 = vadd.f32 1.0, %v5053_v5  ;;  %v1706_v22 = vmul.f32 0.7978846, %v1694_v41  ;;  %v1659_v36 = vmul.f32 0.044715, %v5951_v18  ;;  %v1647_v8 = vmul.f32 0.5, %v5951_v18 }
 0x3dc   : > { %v1741_v55 = vmul.f32 %v1729_v25, %v1645_v23  ;;  %5054 = vtanh.f32 %v1706_v22  ;;  %v1671_v34 = vmul.f32 %v1659_v36, %v5951_v18 }
 0x3dd   : > { %v1612_v15 = vpop.f32.mrf.mxu1 }
 0x3de   : > { %v1613_v62 = vadd.f32 %v5915_v21, %v1612_v15  ;;  %v1753_v45 = vmul.f32 %v5490_v46, %v1741_v55  ;;  %v1683_v7 = vmul.f32 %v1671_v34, %v5951_v18 }
 0x3e0   : > { %v5962_v27 = vadd.f32 %v1613_v62, %v5398_v24  ;;  %1778 = vrot.lane.b32.xlu1 %v1753_v45, %s5262_s6  ;;  %v1695_v39 = vadd.f32 %v1683_v7, %v5951_v18 }
 0x3e2   : > { %v5055_v17 = vpop.eup %5054  ;;  %4648 = vmatmul.msk.bf16.gmra.mxu1 %vm628_vm12, %v1524_v37  ;;  %v1660_v40 = vmul.f32 0.044715, %v5962_v27  ;;  %v1707_v14 = vmul.f32 0.7978846, %v1695_v39  ;;  %v1648_v5 = vmul.f32 0.5, %v5962_v27 }
 0x3e3   : > { %v1730_v49 = vadd.f32 1.0, %v5055_v17 }
 0x3e4   : > { %v1672_v53 = vmul.f32 %v1660_v40, %v5962_v27  ;;  %5056 = vtanh.f32 %v1707_v14 }
 0x3e5   : > { %v1614_v42 = vpop.f32.mrf.mxu1  ;;  %v1742_v58 = vmul.f32 %v1730_v49, %v1646_v44 }
 0x3e6   : > { %v1615_v24 = vadd.f32 %v5915_v21, %v1614_v42  ;;  %v1684_v52 = vmul.f32 %v1672_v53, %v5962_v27 }
 0x3e7   : > { %v1754_v2 = vmul.f32 %v5457_v16, %v1742_v58 }
 0x3e8   : > { %v5974_v1 = vadd.f32 %v1615_v24, %v5602_v43  ;;  %v1696_v51 = vadd.f32 %v1684_v52, %v5962_v27 }
 0x3e9   : > { %1780 = vrot.lane.b32.xlu2 %v1754_v2, %s5262_s6 }
 0x3ea   : > { %v1708_v33 = vmul.f32 0.7978846, %v1696_v51  ;;  %v1661_v50 = vmul.f32 0.044715, %v5974_v1  ;;  %v5057_v0 = vpop.eup %5056  ;;  %v1649_v55 = vmul.f32 0.5, %v5974_v1 }
 0x3eb   : > { %v1731_v6 = vadd.f32 1.0, %v5057_v0 }
 0x3ec   : > { %5058 = vtanh.f32 %v1708_v33  ;;  %v1673_v60 = vmul.f32 %v1661_v50, %v5974_v1 }
 0x3ed   : > { %v1743_v9 = vmul.f32 %v1731_v6, %v1647_v8 }
 0x3ee   : > { %v1685_v10 = vmul.f32 %v1673_v60, %v5974_v1 }
 0x3ef   : > { %v1755_v43 = vmul.f32 %v5556_v63, %v1743_v9 }
 0x3f0   : > { %v1697_v38 = vadd.f32 %v1685_v10, %v5974_v1 }
 0x3f1   : > { %1782 = vrot.lane.b32.xlu0 %v1755_v43, %s5262_s6 }
 0x3f2   : > { %v5059_v11 = vpop.eup %5058  ;;  %v1709_v41 = vmul.f32 0.7978846, %v1697_v38 }
 0x3f3   : > { %v1732_v23 = vadd.f32 1.0, %v5059_v11 }
 0x3f4   : > { %5060 = vtanh.f32 %v1709_v41 }
 0x3f5   : > { %v1744_v25 = vmul.f32 %v1732_v23, %v1648_v5 }
 0x3f7   : > { %v1756_v22 = vmul.f32 %v5511_v12, %v1744_v25 }
 0x3f9   : > { %1784 = vrot.lane.b32.xlu1 %v1756_v22, %s5262_s6 }
 0x3fa   : > { %v5061_v36 = vpop.eup %5060 }
 0x3fb   : > { %v1733_v15 = vadd.f32 1.0, %v5061_v36 }
 0x3fd   : > { %v1745_v56 = vmul.f32 %v1733_v15, %v1649_v55 }
 0x3ff   : > { %v1757_v29 = vmul.f32 %v5629_v61, %v1745_v56 }
 0x401   : > { %1786 = vrot.lane.b32.xlu2 %v1757_v29, %s5262_s6 }
 0x43f   : > { %v1617_v34 = vpop.f32.mrf.mxu1 }
 0x440   : > { %v1618_v62 = vadd.f32 %v5915_v21, %v1617_v34 }
 0x442   : > { %v5993_v45 = vadd.f32 %v1618_v62, %v5519_v30 }
 0x443   : > { %v1781_v7 = vpop.permute.xlu2 %1780 }
 0x444   : > { %1814 = vst.msk [vmem:[#allocation2 + $0x18] sm:$0xff] %vm899_vm10, %v1781_v7  ;;  %v1662_v37 = vmul.f32 0.044715, %v5993_v45  ;;  %v1650_v60 = vmul.f32 0.5, %v5993_v45 }
 0x446   : > { %v1674_v39 = vmul.f32 %v1662_v37, %v5993_v45 }
 0x447   : > { %v1619_v17 = vpop.f32.mrf.mxu1 }
 0x448   : > { %v1620_v40 = vadd.f32 %v5915_v21, %v1619_v17  ;;  %v1686_v44 = vmul.f32 %v1674_v39, %v5993_v45 }
 0x44a   : > { %v6001_v49 = vadd.f32 %v1620_v40, %v5531_v47  ;;  %v1777_v14 = vpop.permute.xlu0 %1776  ;;  %v1698_v53 = vadd.f32 %v1686_v44, %v5993_v45 }
 0x44b   : > { %1812 = vst.msk [vmem:[#allocation2 + $0x8] sm:$0xff] %vm899_vm10, %v1777_v14 }
 0x44c   : > { %v1710_v30 = vmul.f32 0.7978846, %v1698_v53  ;;  %v1663_v42 = vmul.f32 0.044715, %v6001_v49  ;;  %v1651_v29 = vmul.f32 0.5, %v6001_v49 }
 0x44e   : > { %5062 = vtanh.f32 %v1710_v30  ;;  %v1675_v58 = vmul.f32 %v1663_v42, %v6001_v49 }
 0x44f   : > { %v1622_v24 = vpop.f32.mrf.mxu1 }
 0x450   : > { %v1623_v52 = vadd.f32 %v5915_v21, %v1622_v24  ;;  %v1687_v2 = vmul.f32 %v1675_v58, %v6001_v49 }
 0x452   : > { %v1824_v51 = vld [vmem:[#allocation2 + $0x6] sm:$0xff]  ;;  %v6010_v47 = vadd.f32 %v1623_v52, %v5504_v3  ;;  %v1779_v33 = vpop.permute.xlu1 %1778  ;;  %v1699_v50 = vadd.f32 %v1687_v2, %v6001_v49 }
 0x453   : > { %1813 = vst.msk [vmem:[#allocation2 + $0x10] sm:$0xff] %vm899_vm10, %v1779_v33  ;;  %1860 = vrot.lane.b32.xlu1 %v1824_v51, %s5263_s7 }
 0x454   : > { %v5063_v0 = vpop.eup %5062  ;;  %v1711_v8 = vmul.f32 0.7978846, %v1699_v50  ;;  %v1664_v6 = vmul.f32 0.044715, %v6010_v47  ;;  %v1652_v52 = vmul.f32 0.5, %v6010_v47 }
 0x455   : > { %v1734_v9 = vadd.f32 1.0, %v5063_v0 }
 0x456   : > { %5064 = vtanh.f32 %v1711_v8  ;;  %v1676_v10 = vmul.f32 %v1664_v6, %v6010_v47 }
 0x457   : > { %v1624_v43 = vpop.f32.mrf.mxu1  ;;  %v1746_v3 = vmul.f32 %v1734_v9, %v1650_v60 }
 0x458   : > { %v1625_v38 = vadd.f32 %v5915_v21, %v1624_v43  ;;  %v1688_v11 = vmul.f32 %v1676_v10, %v6010_v47 }
 0x459   : > { %v1758_v41 = vmul.f32 %v5596_v35, %v1746_v3 }
 0x45a   : > { %v1825_v5 = vld [vmem:[#allocation2 + $0xe] sm:$0xff]  ;;  %v6022_v25 = vadd.f32 %v1625_v38, %v5648_v28  ;;  %v1700_v22 = vadd.f32 %v1688_v11, %v6010_v47  ;;  %v1826_v53 = vld [vmem:[#allocation2 + $0x16] sm:$0xff] }
 0x45b   : > { %v1836_v23 = vld [vmem:[#allocation2 + $0xa] sm:$0xff]  ;;  %1788 = vrot.lane.b32.xlu0 %v1758_v41, %s5262_s6  ;;  %v1787_v36 = vpop.permute.xlu2 %1786  ;;  %1862 = vrot.lane.b32.xlu2 %v1825_v5, %s5263_s7  ;;  %v1837_v40 = vld [vmem:[#allocation2 + $0x12] sm:$0xff] }
 0x45c   : > { %v5065_v55 = vpop.eup %5064  ;;  %1817 = vst.msk [vmem:[#allocation2 + $0x30] sm:$0xff] %vm899_vm10, %v1787_v36  ;;  %1920 = vrot.lane.b32.xlu1 %v1836_v23, %s5262_s6  ;;  %v1712_v15 = vmul.f32 0.7978846, %v1700_v22  ;;  %v1665_v56 = vmul.f32 0.044715, %v6022_v25 }
 0x45d   : > { %v1735_v34 = vadd.f32 1.0, %v5065_v55 }
 0x45e   : > { %5066 = vtanh.f32 %v1712_v15  ;;  %v1677_v28 = vmul.f32 %v1665_v56, %v6022_v25 }
 0x45f   : > { %v1627_v62 = vpop.f32.mrf.mxu1  ;;  %v1747_v7 = vmul.f32 %v1735_v34, %v1651_v29 }
 0x460   : > { %v1628_v37 = vadd.f32 %v5915_v21, %v1627_v62  ;;  %v1689_v39 = vmul.f32 %v1677_v28, %v6022_v25 }
 0x461   : > { %v1759_v17 = vmul.f32 %v5612_v19, %v1747_v7 }
 0x462   : > { %v6036_v44 = vadd.f32 %v1628_v37, %v5657_v59  ;;  %v1701_v14 = vadd.f32 %v1689_v39, %v6022_v25 }
 0x463   : > { %1790 = vrot.lane.b32.xlu0 %v1759_v17, %s5262_s6  ;;  %1922 = vrot.lane.b32.xlu2 %v1837_v40, %s5262_s6  ;;  %v1783_v42 = vpop.permute.xlu0 %1782 }
 0x464   : > { %v5067_v30 = vpop.eup %5066  ;;  %1864 = vrot.lane.b32.xlu1 %v1826_v53, %s5263_s7  ;;  %v1713_v58 = vmul.f32 0.7978846, %v1701_v14  ;;  %v1666_v24 = vmul.f32 0.044715, %v6036_v44  ;;  %1815 = vst.msk [vmem:[#allocation2 + $0x20] sm:$0xff] %vm899_vm10, %v1783_v42  ;;  %v1654_v29 = vmul.f32 0.5, %v6036_v44 }
 0x465   : > { %v1736_v59 = vadd.f32 1.0, %v5067_v30  ;;  %v4888_v42 = vld [vmem:[%s7038_s1 + $0x88] sm:$0xff] }
 0x466   : > { %5068 = vtanh.f32 %v1713_v58  ;;  %v1678_v2 = vmul.f32 %v1666_v24, %v6036_v44  ;;  %2056 = vmatpush.bf16.msra.mxu2 %v4888_v42  ;;  %v4887_v58 = vld [vmem:[%s7038_s1 + $0x80] sm:$0xff]  ;;  %v4886_v24 = vld [vmem:[%s7038_s1 + $0x78] sm:$0xff] }
 0x467   : > { %v1629_v51 = vpop.f32.mrf.mxu1  ;;  %v1748_v33 = vmul.f32 %v1736_v59, %v1652_v52  ;;  %v4885_v59 = vld [vmem:[%s7038_s1 + $0x70] sm:$0xff] }
 0x468   : > { %v1630_v50 = vadd.f32 %v5915_v21, %v1629_v51  ;;  %v1690_v0 = vmul.f32 %v1678_v2, %v6036_v44  ;;  %v1653_v21 = vmul.f32 0.5, %v6022_v25  ;;  %v4884_v2 = vld [vmem:[%s7038_s1 + $0x68] sm:$0xff] }
 0x469   : > { %v1760_v8 = vmul.f32 %v5622_v48, %v1748_v33  ;;  %v4883_v33 = vld [vmem:[%s7038_s1 + $0x60] sm:$0xff] }
 0x46a   : > { %v6050_v6 = vadd.f32 %v1630_v50, %v5669_v13  ;;  %v1702_v60 = vadd.f32 %v1690_v0, %v6036_v44  ;;  %2057 = vmatpush.bf16.msra.mxu2 %v4887_v58 }
 0x46b   : > { %1792 = vrot.lane.b32.xlu0 %v1760_v8, %s5262_s6  ;;  %v1785_v9 = vpop.permute.xlu1 %1784  ;;  %v1827_v43 = vld [vmem:[#allocation2 + $0x1e] sm:$0xff] }
 0x46c   : > { %v5069_v10 = vpop.eup %5068  ;;  %v1838_v3 = vld [vmem:[#allocation2 + $0x1a] sm:$0xff]  ;;  %1816 = vst.msk [vmem:[#allocation2 + $0x28] sm:$0xff] %vm899_vm10, %v1785_v9  ;;  %v1714_v38 = vmul.f32 0.7978846, %v1702_v60  ;;  %1866 = vrot.lane.b32.xlu2 %v1827_v43, %s5263_s7  ;;  %v1667_v13 = vmul.f32 0.044715, %v6050_v6 }
 0x46d   : > { %1924 = vrot.lane.b32.xlu1 %v1838_v3, %s5262_s6  ;;  %v1737_v11 = vadd.f32 1.0, %v5069_v10  ;;  %v1655_v40 = vmul.f32 0.5, %v6050_v6 }
 0x46e   : > { %5070 = vtanh.f32 %v1714_v38  ;;  %v1679_v5 = vmul.f32 %v1667_v13, %v6050_v6  ;;  %2058 = vmatpush.bf16.msra.mxu2 %v4886_v24 }
 0x46f   : > { %v1749_v41 = vmul.f32 %v1737_v11, %v1653_v21 }
 0x470   : > { %v1691_v22 = vmul.f32 %v1679_v5, %v6050_v6 }
 0x471   : > { %v1761_v23 = vmul.f32 %v5697_v32, %v1749_v41 }
 0x472   : > { %v1703_v15 = vadd.f32 %v1691_v22, %v6050_v6  ;;  %2059 = vmatpush.bf16.msra.mxu2 %v4885_v59 }
 0x473   : > { %v1828_v36 = vld [vmem:[#allocation2 + $0x26] sm:$0xff]  ;;  %1794 = vrot.lane.b32.xlu0 %v1761_v23, %s5262_s6  ;;  %v1829_v37 = vld [vmem:[#allocation2 + $0x2e] sm:$0xff] }
 0x474   : > { %v1839_v55 = vld [vmem:[#allocation2 + $0x22] sm:$0xff]  ;;  %v5071_v56 = vpop.eup %5070  ;;  %v1715_v28 = vmul.f32 0.7978846, %v1703_v15  ;;  %v1840_v39 = vld [vmem:[#allocation2 + $0x2a] sm:$0xff] }
 0x475   : > { %1868 = vrot.lane.b32.xlu1 %v1828_v36, %s5263_s7  ;;  %1926 = vrot.lane.b32.xlu2 %v1839_v55, %s5262_s6  ;;  %v1738_v34 = vadd.f32 1.0, %v5071_v56 }
 0x476   : > { %5072 = vtanh.f32 %v1715_v28  ;;  %2060 = vmatpush.bf16.msra.mxu2 %v4884_v2 }
 0x477   : > { %v1750_v62 = vmul.f32 %v1738_v34, %v1654_v29 }
 0x479   : > { %v1762_v7 = vmul.f32 %v5714_v54, %v1750_v62 }
 0x47a   : > { %2061 = vmatpush.bf16.msra.mxu2 %v4883_v33 }
 0x47b   : > { %1796 = vrot.lane.b32.xlu0 %v1762_v7, %s5262_s6 }
 0x47c   : > { %v5073_v17 = vpop.eup %5072 }
 0x47d   : > { %1928 = vrot.lane.b32.xlu1 %v1840_v39, %s5262_s6  ;;  %1870 = vrot.lane.b32.xlu2 %v1829_v37, %s5263_s7  ;;  %v1739_v14 = vadd.f32 1.0, %v5073_v17 }
 0x47f   : > { %v1751_v53 = vmul.f32 %v1739_v14, %v1655_v40 }
 0x481   : > { %v1763_v30 = vmul.f32 %v5723_v4, %v1751_v53 }
 0x483   : > { %1798 = vrot.lane.b32.xlu0 %v1763_v30, %s5262_s6 }
 0x4b5   : > { %v1863_v52 = vpop.permute.xlu2 %1862 }
 0x4b6   : > { %1897 = vst.msk [vmem:[#allocation2 + $0x10] sm:$0xff] %vm984_vm15, %v1863_v52 }
 0x4bd   : > { %v1923_v51 = vpop.permute.xlu2 %1922 }
 0x4be   : > { %1957 = vst.msk [vmem:[#allocation2 + $0x10] sm:$0xff] %vm1045_vm0, %v1923_v51 }
 0x4c5   : > { %v1861_v50 = vpop.permute.xlu1 %1860  ;;  %v1969_v11 = vld [vmem:[#allocation2 + $0x10] sm:$0xff] }
 0x4c6   : > { %1896 = vst.msk [vmem:[#allocation2 + $0x8] sm:$0xff] %vm984_vm15, %v1861_v50  ;;  %v1867_v0 = vpop.permute.xlu2 %1866 }
 0x4c7   : > { %1899 = vst.msk [vmem:[#allocation2 + $0x20] sm:$0xff] %vm984_vm15, %v1867_v0 }
 0x4cd   : > { %v1789_v8 = vpop.permute.xlu0 %1788 }
 0x4ce   : > { %1818 = vst.msk [vmem:[#allocation2 + $0x38] sm:$0xff] %vm899_vm10, %v1789_v8  ;;  %v1921_v60 = vpop.permute.xlu1 %1920 }
 0x4cf   : > { %1956 = vst.msk [vmem:[#allocation2 + $0x8] sm:$0xff] %vm1045_vm0, %v1921_v60  ;;  %v1927_v9 = vpop.permute.xlu2 %1926 }
 0x4d0   : > { %1959 = vst.msk [vmem:[#allocation2 + $0x20] sm:$0xff] %vm1045_vm0, %v1927_v9 }
 0x4d5   : > { %v1830_v10 = vld [vmem:[#allocation2 + $0x36] sm:$0xff]  ;;  %v1791_v3 = vpop.permute.xlu0 %1790 }
 0x4d6   : > { %v1841_v43 = vld [vmem:[#allocation2 + $0x32] sm:$0xff]  ;;  %1819 = vst.msk [vmem:[#allocation2 + $0x40] sm:$0xff] %vm899_vm10, %v1791_v3  ;;  %1872 = vrot.lane.b32.xlu0 %v1830_v10, %s5263_s7  ;;  %v1865_v38 = vpop.permute.xlu1 %1864  ;;  %v1968_v21 = vld [vmem:[#allocation2 + $0x8] sm:$0xff]  ;;  %v6135_v10 = vld [vmem:[%s7039_s2 + $0x4] ss:$0 sm:$0xff] }
 0x4d7   : > { %1930 = vrot.lane.b32.xlu2 %v1841_v43, %s5262_s6  ;;  %1898 = vst.msk [vmem:[#allocation2 + $0x18] sm:$0xff] %vm984_vm15, %v1865_v38  ;;  %v1871_v13 = vpop.permute.xlu2 %1870  ;;  %v1980_v41 = vpack.c.bf16 %v1969_v11, %v1968_v21  ;;  %v1971_v28 = vld [vmem:[#allocation2 + $0x20] sm:$0xff] }
 0x4d8   : > { %1901 = vst.msk [vmem:[#allocation2 + $0x30] sm:$0xff] %vm984_vm15, %v1871_v13 }
 0x4d9   : > { %4673 = vmatmul.msk.bf16.vlgmr.msra.gmra.mxu2 %vm628_vm12, %v1980_v41 }
 0x4dd   : > { %v1831_v5 = vld [vmem:[#allocation2 + $0x3e] sm:$0xff]  ;;  %v1793_v22 = vpop.permute.xlu0 %1792 }
 0x4de   : > { %v1842_v23 = vld [vmem:[#allocation2 + $0x3a] sm:$0xff]  ;;  %1874 = vrot.lane.b32.xlu1 %v1831_v5, %s5263_s7  ;;  %1820 = vst.msk [vmem:[#allocation2 + $0x48] sm:$0xff] %vm899_vm10, %v1793_v22 }
 0x4df   : > { %1932 = vrot.lane.b32.xlu2 %v1842_v23, %s5262_s6  ;;  %v1925_v36 = vpop.permute.xlu1 %1924 }
 0x4e0   : > { %1958 = vst.msk [vmem:[#allocation2 + $0x18] sm:$0xff] %vm1045_vm0, %v1925_v36 }
 0x4e5   : > { %v1832_v55 = vld [vmem:[#allocation2 + $0x46] sm:$0xff]  ;;  %v1795_v56 = vpop.permute.xlu0 %1794 }
 0x4e6   : > { %v1843_v15 = vld [vmem:[#allocation2 + $0x42] sm:$0xff]  ;;  %1821 = vst.msk [vmem:[#allocation2 + $0x50] sm:$0xff] %vm899_vm10, %v1795_v56  ;;  %1876 = vrot.lane.b32.xlu1 %v1832_v55, %s5263_s7 }
 0x4e7   : > { %1934 = vrot.lane.b32.xlu0 %v1843_v15, %s5262_s6  ;;  %v1869_v29 = vpop.permute.xlu1 %1868  ;;  %v1970_v34 = vld [vmem:[#allocation2 + $0x18] sm:$0xff] }
 0x4e8   : > { %1900 = vst.msk [vmem:[#allocation2 + $0x28] sm:$0xff] %vm984_vm15, %v1869_v29  ;;  %v1981_v62 = vpack.c.bf16 %v1971_v28, %v1970_v34 }
 0x4ea   : > { %4674 = vmatmul.msk.bf16.gmra.mxu2 %vm628_vm12, %v1981_v62 }
 0x4ed   : > { %v1833_v7 = vld [vmem:[#allocation2 + $0x4e] sm:$0xff]  ;;  %v1797_v39 = vpop.permute.xlu0 %1796 }
 0x4ee   : > { %v1844_v37 = vld [vmem:[#allocation2 + $0x4a] sm:$0xff]  ;;  %1822 = vst.msk [vmem:[#allocation2 + $0x58] sm:$0xff] %vm899_vm10, %v1797_v39  ;;  %1878 = vrot.lane.b32.xlu2 %v1833_v7, %s5263_s7 }
 0x4ef   : > { %1936 = vrot.lane.b32.xlu0 %v1844_v37, %s5262_s6  ;;  %v1929_v17 = vpop.permute.xlu1 %1928 }
 0x4f0   : > { %1960 = vst.msk [vmem:[#allocation2 + $0x28] sm:$0xff] %vm1045_vm0, %v1929_v17 }
 0x4f5   : > { %v1834_v40 = vld [vmem:[#allocation2 + $0x56] sm:$0xff]  ;;  %v1799_v53 = vpop.permute.xlu0 %1798 }
 0x4f6   : > { %v1845_v14 = vld [vmem:[#allocation2 + $0x52] sm:$0xff]  ;;  %1880 = vrot.lane.b32.xlu2 %v1834_v40, %s5263_s7  ;;  %1823 = vst.msk [vmem:[#allocation2 + $0x60] sm:$0xff] %vm899_vm10, %v1799_v53 }
 0x4f7   : > { %1938 = vrot.lane.b32.xlu1 %v1845_v14, %s5262_s6  ;;  %v1972_v52 = vld [vmem:[#allocation2 + $0x28] sm:$0xff] }
 0x4fd   : > { %v1835_v30 = vld [vmem:[#allocation2 + $0x5e] sm:$0xff] }
 0x4fe   : > { %v1846_v42 = vld [vmem:[#allocation2 + $0x5a] sm:$0xff]  ;;  %v1847_v58 = vld [vmem:[#allocation2 + $0x62] sm:$0xff]  ;;  %1882 = vrot.lane.b32.xlu0 %v1835_v30, %s5263_s7 }
 0x4ff   : > { %1942 = vrot.lane.b32.xlu2 %v1847_v58, %s5262_s6  ;;  %1940 = vrot.lane.b32.xlu1 %v1846_v42, %s5262_s6 }
 0x531   : > { %v1931_v24 = vpop.permute.xlu2 %1930 }
 0x532   : > { %1961 = vst.msk [vmem:[#allocation2 + $0x30] sm:$0xff] %vm1045_vm0, %v1931_v24 }
 0x539   : > { %v1973_v59 = vld [vmem:[#allocation2 + $0x30] sm:$0xff]  ;;  %v1933_v51 = vpop.permute.xlu2 %1932 }
 0x53a   : > { %v1982_v2 = vpack.c.bf16 %v1973_v59, %v1972_v52 }
 0x53c   : > { %4675 = vmatmul.msk.bf16.gmra.mxu2 %vm628_vm12, %v1982_v2 }
 0x548   : > { %v1873_v33 = vpop.permute.xlu0 %1872  ;;  %v1879_v50 = vpop.permute.xlu2 %1878 }
 0x549   : > { %1902 = vst.msk [vmem:[#allocation2 + $0x38] sm:$0xff] %vm984_vm15, %v1873_v33 }
 0x54a   : > { %1962 = vst.msk [vmem:[#allocation2 + $0x38] sm:$0xff] %vm1045_vm0, %v1933_v51 }
 0x54b   : > { %1905 = vst.msk [vmem:[#allocation2 + $0x50] sm:$0xff] %vm984_vm15, %v1879_v50 }
 0x550   : > { %v1875_v0 = vpop.permute.xlu1 %1874  ;;  %v1881_v8 = vpop.permute.xlu2 %1880 }
 0x551   : > { %1903 = vst.msk [vmem:[#allocation2 + $0x40] sm:$0xff] %vm984_vm15, %v1875_v0  ;;  %v1974_v13 = vld [vmem:[#allocation2 + $0x38] sm:$0xff] }
 0x552   : > { %1906 = vst.msk [vmem:[#allocation2 + $0x58] sm:$0xff] %vm984_vm15, %v1881_v8 }
 0x558   : > { %v1877_v60 = vpop.permute.xlu1 %1876 }
 0x559   : > { %v1935_v9 = vpop.permute.xlu0 %1934  ;;  %1904 = vst.msk [vmem:[#allocation2 + $0x48] sm:$0xff] %vm984_vm15, %v1877_v60  ;;  %v1943_v51 = vpop.permute.xlu2 %1942 }
 0x55a   : > { %1963 = vst.msk [vmem:[#allocation2 + $0x40] sm:$0xff] %vm1045_vm0, %v1935_v9 }
 0x55c   : > { %v2063_v43 = vpop.f32.mrf.mxu2 }
 0x55d   : > { %v2064_v3 = vadd.f32 %v6135_v10, %v2063_v43 }
 0x55f   : > { %v2105_v38 = vmul.f32 0.044715, %v2064_v3  ;;  %v2093_v30 = vmul.f32 0.5, %v2064_v3 }
 0x561   : > { %v1937_v21 = vpop.permute.xlu0 %1936  ;;  %v2117_v11 = vmul.f32 %v2105_v38, %v2064_v3  ;;  %v1975_v41 = vld [vmem:[#allocation2 + $0x40] sm:$0xff] }
 0x562   : > { %1964 = vst.msk [vmem:[#allocation2 + $0x48] sm:$0xff] %vm1045_vm0, %v1937_v21  ;;  %v1983_v5 = vpack.c.bf16 %v1975_v41, %v1974_v13 }
 0x563   : > { %v2129_v23 = vmul.f32 %v2117_v11, %v2064_v3 }
 0x564   : > { %4676 = vmatmul.msk.bf16.gmra.mxu2 %vm628_vm12, %v1983_v5  ;;  %v2065_v22 = vpop.f32.mrf.mxu2 }
 0x565   : > { %v2066_v36 = vadd.f32 %v6135_v10, %v2065_v22  ;;  %v2141_v55 = vadd.f32 %v2129_v23, %v2064_v3 }
 0x567   : > { %v2106_v15 = vmul.f32 0.044715, %v2066_v36  ;;  %v2153_v56 = vmul.f32 0.7978846, %v2141_v55  ;;  %v2094_v3 = vmul.f32 0.5, %v2066_v36 }
 0x569   : > { %v1939_v29 = vpop.permute.xlu1 %1938  ;;  %v2118_v34 = vmul.f32 %v2106_v15, %v2066_v36  ;;  %5074 = vtanh.f32 %v2153_v56  ;;  %v1976_v14 = vld [vmem:[#allocation2 + $0x48] sm:$0xff] }
 0x56a   : > { %1965 = vst.msk [vmem:[#allocation2 + $0x50] sm:$0xff] %vm1045_vm0, %v1939_v29 }
 0x56b   : > { %v2130_v28 = vmul.f32 %v2118_v34, %v2066_v36 }
 0x56d   : > { %v2068_v62 = vpop.f32.mrf.mxu2  ;;  %v2142_v7 = vadd.f32 %v2130_v28, %v2066_v36 }
 0x56e   : > { %v2069_v37 = vadd.f32 %v6135_v10, %v2068_v62 }
 0x56f   : > { %v5075_v39 = vpop.eup %5074  ;;  %v2154_v17 = vmul.f32 0.7978846, %v2142_v7 }
 0x570   : > { %v2107_v40 = vmul.f32 0.044715, %v2069_v37  ;;  %v2177_v42 = vadd.f32 1.0, %v5075_v39  ;;  %v1883_v59 = vpop.permute.xlu0 %1882  ;;  %v2095_v29 = vmul.f32 0.5, %v2069_v37 }
 0x571   : > { %v1977_v53 = vld [vmem:[#allocation2 + $0x50] sm:$0xff]  ;;  %v1941_v58 = vpop.permute.xlu1 %1940  ;;  %5076 = vtanh.f32 %v2154_v17  ;;  %1907 = vst.msk [vmem:[#allocation2 + $0x60] sm:$0xff] %vm984_vm15, %v1883_v59 }
 0x572   : > { %v1984_v24 = vpack.c.bf16 %v1977_v53, %v1976_v14  ;;  %v2119_v52 = vmul.f32 %v2107_v40, %v2069_v37  ;;  %1966 = vst.msk [vmem:[#allocation2 + $0x58] sm:$0xff] %vm1045_vm0, %v1941_v58  ;;  %v2189_v2 = vmul.f32 %v2177_v42, %v2093_v30 }
 0x573   : > { %1967 = vst.msk [vmem:[#allocation2 + $0x60] sm:$0xff] %vm1045_vm0, %v1943_v51 }
 0x574   : > { %4677 = vmatmul.msk.bf16.gmra.mxu2 %vm628_vm12, %v1984_v24  ;;  %v2201_v33 = vmul.f32 %v5462_v20, %v2189_v2  ;;  %v2131_v50 = vmul.f32 %v2119_v52, %v2069_v37 }
 0x575   : > { %v2070_v0 = vpop.f32.mrf.mxu2 }
 0x576   : > { %v2071_v8 = vadd.f32 %v6135_v10, %v2070_v0  ;;  %2225 = vrot.lane.b32.xlu0 %v2201_v33, %s5262_s6  ;;  %v2143_v60 = vadd.f32 %v2131_v50, %v2069_v37 }
 0x577   : > { %v5077_v9 = vpop.eup %5076 }
 0x578   : > { %v2108_v43 = vmul.f32 0.044715, %v2071_v8  ;;  %v2178_v38 = vadd.f32 1.0, %v5077_v9  ;;  %v2155_v21 = vmul.f32 0.7978846, %v2143_v60  ;;  %v2096_v39 = vmul.f32 0.5, %v2071_v8 }
 0x579   : > { %v1978_v22 = vld [vmem:[#allocation2 + $0x58] sm:$0xff] }
 0x57a   : > { %v2120_v11 = vmul.f32 %v2108_v43, %v2071_v8  ;;  %v2190_v13 = vmul.f32 %v2178_v38, %v2094_v3  ;;  %5078 = vtanh.f32 %v2155_v21  ;;  %v1979_v55 = vld [vmem:[#allocation2 + $0x60] sm:$0xff] }
 0x57b   : > { %v1985_v28 = vpack.c.bf16 %v1979_v55, %v1978_v22 }
 0x57c   : > { %v2202_v41 = vmul.f32 %v5490_v46, %v2190_v13  ;;  %v2132_v5 = vmul.f32 %v2120_v11, %v2071_v8 }
 0x57e   : > { %2227 = vrot.lane.b32.xlu1 %v2202_v41, %s5262_s6  ;;  %v2144_v23 = vadd.f32 %v2132_v5, %v2071_v8 }
 0x580   : > { %v5079_v15 = vpop.eup %5078  ;;  %v2156_v56 = vmul.f32 0.7978846, %v2144_v23 }
 0x581   : > { %v2179_v34 = vadd.f32 1.0, %v5079_v15 }
 0x582   : > { %5080 = vtanh.f32 %v2156_v56 }
 0x583   : > { %v2191_v36 = vmul.f32 %v2179_v34, %v2095_v29 }
 0x584   : > { %4678 = vmatmul.msk.bf16.gmra.mxu2 %vm628_vm12, %v1985_v28 }
 0x585   : > { %v2203_v62 = vmul.f32 %v5457_v16, %v2191_v36 }
 0x587   : > { %2229 = vrot.lane.b32.xlu2 %v2203_v62, %s5262_s6 }
 0x588   : > { %v5081_v7 = vpop.eup %5080 }
 0x589   : > { %v2180_v17 = vadd.f32 1.0, %v5081_v7 }
 0x58b   : > { %v2192_v40 = vmul.f32 %v2180_v17, %v2096_v39 }
 0x58d   : > { %v2204_v14 = vmul.f32 %v5556_v63, %v2192_v40 }
 0x58f   : > { %2231 = vrot.lane.b32.xlu0 %v2204_v14, %s5262_s6 }
 0x5bf   : > { %v2073_v53 = vpop.f32.mrf.mxu2 }
 0x5c0   : > { %v2074_v37 = vadd.f32 %v6135_v10, %v2073_v53 }
 0x5c2   : > { %v2109_v30 = vmul.f32 0.044715, %v2074_v37  ;;  %v2097_v9 = vmul.f32 0.5, %v2074_v37 }
 0x5c4   : > { %v2121_v42 = vmul.f32 %v2109_v30, %v2074_v37 }
 0x5c6   : > { %v2133_v58 = vmul.f32 %v2121_v42, %v2074_v37 }
 0x5c7   : > { %v2075_v24 = vpop.f32.mrf.mxu2 }
 0x5c8   : > { %v2076_v52 = vadd.f32 %v6135_v10, %v2075_v24  ;;  %v2145_v59 = vadd.f32 %v2133_v58, %v2074_v37 }
 0x5ca   : > { %v2110_v2 = vmul.f32 0.044715, %v2076_v52  ;;  %v2157_v51 = vmul.f32 0.7978846, %v2145_v59  ;;  %v2098_v11 = vmul.f32 0.5, %v2076_v52 }
 0x5cc   : > { %v2122_v33 = vmul.f32 %v2110_v2, %v2076_v52  ;;  %5082 = vtanh.f32 %v2157_v51 }
 0x5ce   : > { %v2134_v50 = vmul.f32 %v2122_v33, %v2076_v52 }
 0x5d0   : > { %v2146_v0 = vadd.f32 %v2134_v50, %v2076_v52 }
 0x5d2   : > { %v5083_v8 = vpop.eup %5082  ;;  %v2158_v60 = vmul.f32 0.7978846, %v2146_v0 }
 0x5d3   : > { %v2181_v43 = vadd.f32 1.0, %v5083_v8 }
 0x5d4   : > { %5084 = vtanh.f32 %v2158_v60 }
 0x5d5   : > { %v2193_v3 = vmul.f32 %v2181_v43, %v2097_v9 }
 0x5d7   : > { %v2205_v38 = vmul.f32 %v5511_v12, %v2193_v3 }
 0x5d9   : > { %2233 = vrot.lane.b32.xlu1 %v2205_v38, %s5262_s6 }
 0x5da   : > { %v5085_v21 = vpop.eup %5084 }
 0x5db   : > { %v2182_v13 = vadd.f32 1.0, %v5085_v21 }
 0x5dd   : > { %v2194_v41 = vmul.f32 %v2182_v13, %v2098_v11 }
 0x5df   : > { %v2206_v5 = vmul.f32 %v5629_v61, %v2194_v41 }
 0x5e1   : > { %2235 = vrot.lane.b32.xlu2 %v2206_v5, %s5262_s6  ;;  %v2230_v23 = vpop.permute.xlu2 %2229 }
 0x5e2   : > { %2263 = vst.msk [vmem:[#allocation2 + $0x18] sm:$0xff] %vm899_vm10, %v2230_v23 }
 0x5e7   : > { %v2078_v22 = vpop.f32.mrf.mxu2 }
 0x5e8   : > { %v2079_v55 = vadd.f32 %v6135_v10, %v2078_v22  ;;  %v2226_v15 = vpop.permute.xlu0 %2225 }
 0x5e9   : > { %2261 = vst.msk [vmem:[#allocation2 + $0x8] sm:$0xff] %vm899_vm10, %v2226_v15 }
 0x5ea   : > { %v2111_v56 = vmul.f32 0.044715, %v2079_v55  ;;  %v2099_v51 = vmul.f32 0.5, %v2079_v55 }
 0x5ec   : > { %v2123_v29 = vmul.f32 %v2111_v56, %v2079_v55 }
 0x5ee   : > { %v2135_v34 = vmul.f32 %v2123_v29, %v2079_v55 }
 0x5ef   : > { %v2080_v28 = vpop.f32.mrf.mxu2 }
 0x5f0   : > { %v2081_v36 = vadd.f32 %v6135_v10, %v2080_v28  ;;  %v2228_v62 = vpop.permute.xlu1 %2227  ;;  %v2273_v7 = vld [vmem:[#allocation2 + $0x6] sm:$0xff]  ;;  %v2147_v39 = vadd.f32 %v2135_v34, %v2079_v55 }
 0x5f1   : > { %2262 = vst.msk [vmem:[#allocation2 + $0x10] sm:$0xff] %vm899_vm10, %v2228_v62  ;;  %2309 = vrot.lane.b32.xlu1 %v2273_v7, %s5263_s7 }
 0x5f2   : > { %v2112_v17 = vmul.f32 0.044715, %v2081_v36  ;;  %v2159_v40 = vmul.f32 0.7978846, %v2147_v39  ;;  %v2100_v23 = vmul.f32 0.5, %v2081_v36 }
 0x5f4   : > { %v2124_v14 = vmul.f32 %v2112_v17, %v2081_v36  ;;  %5086 = vtanh.f32 %v2159_v40 }
 0x5f6   : > { %v2136_v53 = vmul.f32 %v2124_v14, %v2081_v36 }
 0x5f7   : > { %v2083_v37 = vpop.f32.mrf.mxu2 }
 0x5f8   : > { %v2274_v30 = vld [vmem:[#allocation2 + $0xe] sm:$0xff]  ;;  %v2084_v58 = vadd.f32 %v6135_v10, %v2083_v37  ;;  %v2148_v24 = vadd.f32 %v2136_v53, %v2081_v36  ;;  %v2275_v21 = vld [vmem:[#allocation2 + $0x16] sm:$0xff] }
 0x5f9   : > { %v2285_v42 = vld [vmem:[#allocation2 + $0xa] sm:$0xff]  ;;  %2311 = vrot.lane.b32.xlu2 %v2274_v30, %s5263_s7  ;;  %v2286_v43 = vld [vmem:[#allocation2 + $0x12] sm:$0xff] }
 0x5fa   : > { %2369 = vrot.lane.b32.xlu1 %v2285_v42, %s5262_s6  ;;  %v5087_v52 = vpop.eup %5086  ;;  %v2113_v59 = vmul.f32 0.044715, %v2084_v58  ;;  %v2160_v2 = vmul.f32 0.7978846, %v2148_v24  ;;  %v2101_v14 = vmul.f32 0.5, %v2084_v58 }
 0x5fb   : > { %v2183_v33 = vadd.f32 1.0, %v5087_v52 }
 0x5fc   : > { %v2125_v50 = vmul.f32 %v2113_v59, %v2084_v58  ;;  %5088 = vtanh.f32 %v2160_v2 }
 0x5fd   : > { %v2195_v0 = vmul.f32 %v2183_v33, %v2099_v51 }
 0x5fe   : > { %v2137_v8 = vmul.f32 %v2125_v50, %v2084_v58 }
 0x5ff   : > { %v2085_v60 = vpop.f32.mrf.mxu2  ;;  %v2207_v9 = vmul.f32 %v5596_v35, %v2195_v0 }
 0x600   : > { %v2086_v3 = vadd.f32 %v6135_v10, %v2085_v60  ;;  %v2149_v38 = vadd.f32 %v2137_v8, %v2084_v58 }
 0x601   : > { %2237 = vrot.lane.b32.xlu0 %v2207_v9, %s5262_s6  ;;  %2371 = vrot.lane.b32.xlu2 %v2286_v43, %s5262_s6  ;;  %v2232_v11 = vpop.permute.xlu0 %2231 }
 0x602   : > { %v5089_v13 = vpop.eup %5088  ;;  %v2114_v41 = vmul.f32 0.044715, %v2086_v3  ;;  %2313 = vrot.lane.b32.xlu1 %v2275_v21, %s5263_s7  ;;  %2264 = vst.msk [vmem:[#allocation2 + $0x20] sm:$0xff] %vm899_vm10, %v2232_v11  ;;  %v2161_v5 = vmul.f32 0.7978846, %v2149_v38  ;;  %v2102_v0 = vmul.f32 0.5, %v2086_v3 }
 0x603   : > { %v2184_v22 = vadd.f32 1.0, %v5089_v13 }
 0x604   : > { %v2126_v55 = vmul.f32 %v2114_v41, %v2086_v3  ;;  %5090 = vtanh.f32 %v2161_v5 }
 0x605   : > { %v2196_v15 = vmul.f32 %v2184_v22, %v2100_v23 }
 0x606   : > { %v2138_v56 = vmul.f32 %v2126_v55, %v2086_v3 }
 0x607   : > { %v2088_v29 = vpop.f32.mrf.mxu2  ;;  %v2208_v34 = vmul.f32 %v5612_v19, %v2196_v15 }
 0x608   : > { %v2089_v28 = vadd.f32 %v6135_v10, %v2088_v29  ;;  %v2150_v62 = vadd.f32 %v2138_v56, %v2086_v3  ;;  %v4894_v29 = vld [vmem:[%s7038_s1 + $0xb8] sm:$0xff] }
 0x609   : > { %v2276_v7 = vld [vmem:[#allocation2 + $0x1e] sm:$0xff]  ;;  %2239 = vrot.lane.b32.xlu0 %v2208_v34, %s5262_s6  ;;  %2505 = vmatpush.bf16.msrb.mxu3 %v4894_v29  ;;  %v4893_v34 = vld [vmem:[%s7038_s1 + $0xb0] sm:$0xff] }
 0x60a   : > { %v2287_v39 = vld [vmem:[#allocation2 + $0x1a] sm:$0xff]  ;;  %v5091_v17 = vpop.eup %5090  ;;  %v2115_v40 = vmul.f32 0.044715, %v2089_v28  ;;  %2315 = vrot.lane.b32.xlu2 %v2276_v7, %s5263_s7  ;;  %v2162_v36 = vmul.f32 0.7978846, %v2150_v62 }
 0x60b   : > { %2373 = vrot.lane.b32.xlu1 %v2287_v39, %s5262_s6  ;;  %v2185_v53 = vadd.f32 1.0, %v5091_v17  ;;  %v4891_v62 = vld [vmem:[%s7038_s1 + $0xa0] sm:$0xff]  ;;  %v4890_v39 = vld [vmem:[%s7038_s1 + $0x98] sm:$0xff] }
 0x60c   : > { %v2127_v37 = vmul.f32 %v2115_v40, %v2089_v28  ;;  %5092 = vtanh.f32 %v2162_v36 }
 0x60d   : > { %v2197_v30 = vmul.f32 %v2185_v53, %v2101_v14  ;;  %2506 = vmatpush.bf16.msrb.mxu3 %v4893_v34 }
 0x60e   : > { %v2139_v42 = vmul.f32 %v2127_v37, %v2089_v28 }
 0x60f   : > { %v2090_v24 = vpop.f32.mrf.mxu2  ;;  %v2209_v52 = vmul.f32 %v5622_v48, %v2197_v30  ;;  %v4889_v30 = vld [vmem:[%s7038_s1 + $0x90] sm:$0xff] }
 0x610   : > { %v2091_v59 = vadd.f32 %v6135_v10, %v2090_v24  ;;  %v2151_v2 = vadd.f32 %v2139_v42, %v2089_v28  ;;  %v2103_v10 = vmul.f32 0.5, %v2089_v28  ;;  %v4892_v28 = vld [vmem:[%s7038_s1 + $0xa8] sm:$0xff] }
 0x611   : > { %2241 = vrot.lane.b32.xlu0 %v2209_v52, %s5262_s6  ;;  %2507 = vmatpush.bf16.msrb.mxu3 %v4892_v28 }
 0x612   : > { %v5093_v51 = vpop.eup %5092  ;;  %v2116_v33 = vmul.f32 0.044715, %v2091_v59  ;;  %v2163_v50 = vmul.f32 0.7978846, %v2151_v2  ;;  %v2104_v23 = vmul.f32 0.5, %v2091_v59 }
 0x613   : > { %v2186_v8 = vadd.f32 1.0, %v5093_v51 }
 0x614   : > { %v2128_v60 = vmul.f32 %v2116_v33, %v2091_v59  ;;  %5094 = vtanh.f32 %v2163_v50 }
 0x615   : > { %v2198_v58 = vmul.f32 %v2186_v8, %v2102_v0  ;;  %2508 = vmatpush.bf16.msrb.mxu3 %v4891_v62 }
 0x616   : > { %v2140_v9 = vmul.f32 %v2128_v60, %v2091_v59 }
 0x617   : > { %v2210_v43 = vmul.f32 %v5697_v32, %v2198_v58 }
 0x618   : > { %v2152_v38 = vadd.f32 %v2140_v9, %v2091_v59 }
 0x619   : > { %2243 = vrot.lane.b32.xlu0 %v2210_v43, %s5262_s6  ;;  %2509 = vmatpush.bf16.msrb.mxu3 %v4890_v39 }
 0x61a   : > { %v5095_v21 = vpop.eup %5094  ;;  %v2164_v11 = vmul.f32 0.7978846, %v2152_v38 }
 0x61b   : > { %v2187_v13 = vadd.f32 1.0, %v5095_v21 }
 0x61c   : > { %5096 = vtanh.f32 %v2164_v11 }
 0x61d   : > { %v2199_v41 = vmul.f32 %v2187_v13, %v2103_v10  ;;  %2510 = vmatpush.bf16.msrb.mxu3 %v4889_v30 }
 0x61f   : > { %v2211_v5 = vmul.f32 %v5714_v54, %v2199_v41 }
 0x621   : > { %2245 = vrot.lane.b32.xlu0 %v2211_v5, %s5262_s6 }
 0x622   : > { %v5097_v3 = vpop.eup %5096 }
 0x623   : > { %v2188_v22 = vadd.f32 1.0, %v5097_v3 }
 0x625   : > { %v2200_v55 = vmul.f32 %v2188_v22, %v2104_v23 }
 0x627   : > { %v2212_v15 = vmul.f32 %v5723_v4, %v2200_v55 }
 0x629   : > { %2247 = vrot.lane.b32.xlu0 %v2212_v15, %s5262_s6 }
 0x63b   : > { %v2236_v56 = vpop.permute.xlu2 %2235 }
 0x63c   : > { %2266 = vst.msk [vmem:[#allocation2 + $0x30] sm:$0xff] %vm899_vm10, %v2236_v56 }
 0x64b   : > { %v2234_v7 = vpop.permute.xlu1 %2233 }
 0x64c   : > { %2265 = vst.msk [vmem:[#allocation2 + $0x28] sm:$0xff] %vm899_vm10, %v2234_v7 }
 0x653   : > { %v2277_v17 = vld [vmem:[#allocation2 + $0x26] sm:$0xff]  ;;  %v2312_v36 = vpop.permute.xlu2 %2311  ;;  %v2278_v14 = vld [vmem:[#allocation2 + $0x2e] sm:$0xff] }
 0x654   : > { %v2288_v40 = vld [vmem:[#allocation2 + $0x22] sm:$0xff]  ;;  %2317 = vrot.lane.b32.xlu1 %v2277_v17, %s5263_s7  ;;  %2346 = vst.msk [vmem:[#allocation2 + $0x10] sm:$0xff] %vm984_vm15, %v2312_v36  ;;  %v2289_v53 = vld [vmem:[#allocation2 + $0x2a] sm:$0xff] }
 0x655   : > { %2375 = vrot.lane.b32.xlu2 %v2288_v40, %s5262_s6 }
 0x65b   : > { %v2372_v37 = vpop.permute.xlu2 %2371 }
 0x65c   : > { %2377 = vrot.lane.b32.xlu1 %v2289_v53, %s5262_s6  ;;  %2406 = vst.msk [vmem:[#allocation2 + $0x10] sm:$0xff] %vm1045_vm0, %v2372_v37 }
 0x65d   : > { %2319 = vrot.lane.b32.xlu2 %v2278_v14, %s5263_s7 }
 0x663   : > { %v2310_v42 = vpop.permute.xlu1 %2309  ;;  %v2418_v51 = vld [vmem:[#allocation2 + $0x10] sm:$0xff] }
 0x664   : > { %2345 = vst.msk [vmem:[#allocation2 + $0x8] sm:$0xff] %vm984_vm15, %v2310_v42  ;;  %v2316_v24 = vpop.permute.xlu2 %2315 }
 0x665   : > { %2348 = vst.msk [vmem:[#allocation2 + $0x20] sm:$0xff] %vm984_vm15, %v2316_v24 }
 0x66c   : > { %v2370_v52 = vpop.permute.xlu1 %2369 }
 0x66d   : > { %2405 = vst.msk [vmem:[#allocation2 + $0x8] sm:$0xff] %vm1045_vm0, %v2370_v52 }
 0x673   : > { %v2238_v59 = vpop.permute.xlu0 %2237 }
 0x674   : > { %v2417_v2 = vld [vmem:[#allocation2 + $0x8] sm:$0xff]  ;;  %2267 = vst.msk [vmem:[#allocation2 + $0x38] sm:$0xff] %vm899_vm10, %v2238_v59  ;;  %v2314_v33 = vpop.permute.xlu1 %2313  ;;  %v6257_v59 = vld [vmem:[%s7039_s2 + $0x5] ss:$0 sm:$0xff] }
 0x675   : > { %v2429_v50 = vpack.c.bf16 %v2418_v51, %v2417_v2  ;;  %2347 = vst.msk [vmem:[#allocation2 + $0x18] sm:$0xff] %vm984_vm15, %v2314_v33 }
 0x677   : > { %4703 = vmatmul.msk.bf16.vlgmr.msrb.gmra.mxu3 %vm628_vm12, %v2429_v50 }
 0x67b   : > { %v2279_v0 = vld [vmem:[#allocation2 + $0x36] sm:$0xff]  ;;  %v2240_v60 = vpop.permute.xlu0 %2239 }
 0x67c   : > { %v2290_v8 = vld [vmem:[#allocation2 + $0x32] sm:$0xff]  ;;  %2268 = vst.msk [vmem:[#allocation2 + $0x40] sm:$0xff] %vm899_vm10, %v2240_v60  ;;  %2321 = vrot.lane.b32.xlu0 %v2279_v0, %s5263_s7 }
 0x67d   : > { %2379 = vrot.lane.b32.xlu2 %v2290_v8, %s5262_s6  ;;  %v2374_v58 = vpop.permute.xlu1 %2373 }
 0x67e   : > { %2407 = vst.msk [vmem:[#allocation2 + $0x18] sm:$0xff] %vm1045_vm0, %v2374_v58 }
 0x683   : > { %v2280_v9 = vld [vmem:[#allocation2 + $0x3e] sm:$0xff]  ;;  %v2242_v38 = vpop.permute.xlu0 %2241 }
 0x684   : > { %v2291_v43 = vld [vmem:[#allocation2 + $0x3a] sm:$0xff]  ;;  %2269 = vst.msk [vmem:[#allocation2 + $0x48] sm:$0xff] %vm899_vm10, %v2242_v38  ;;  %2323 = vrot.lane.b32.xlu1 %v2280_v9, %s5263_s7 }
 0x685   : > { %2381 = vrot.lane.b32.xlu2 %v2291_v43, %s5262_s6  ;;  %v2419_v28 = vld [vmem:[#allocation2 + $0x18] sm:$0xff] }
 0x68b   : > { %v2281_v21 = vld [vmem:[#allocation2 + $0x46] sm:$0xff]  ;;  %v2244_v10 = vpop.permute.xlu0 %2243 }
 0x68c   : > { %v2292_v11 = vld [vmem:[#allocation2 + $0x42] sm:$0xff]  ;;  %2270 = vst.msk [vmem:[#allocation2 + $0x50] sm:$0xff] %vm899_vm10, %v2244_v10  ;;  %2325 = vrot.lane.b32.xlu1 %v2281_v21, %s5263_s7 }
 0x68d   : > { %2383 = vrot.lane.b32.xlu0 %v2292_v11, %s5262_s6 }
 0x693   : > { %v2282_v13 = vld [vmem:[#allocation2 + $0x4e] sm:$0xff]  ;;  %v2246_v5 = vpop.permute.xlu0 %2245 }
 0x694   : > { %v2293_v41 = vld [vmem:[#allocation2 + $0x4a] sm:$0xff]  ;;  %2271 = vst.msk [vmem:[#allocation2 + $0x58] sm:$0xff] %vm899_vm10, %v2246_v5  ;;  %2327 = vrot.lane.b32.xlu2 %v2282_v13, %s5263_s7 }
 0x695   : > { %2385 = vrot.lane.b32.xlu0 %v2293_v41, %s5262_s6 }
 0x69b   : > { %v2283_v3 = vld [vmem:[#allocation2 + $0x56] sm:$0xff]  ;;  %v2248_v22 = vpop.permute.xlu0 %2247 }
 0x69c   : > { %v2294_v23 = vld [vmem:[#allocation2 + $0x52] sm:$0xff]  ;;  %2272 = vst.msk [vmem:[#allocation2 + $0x60] sm:$0xff] %vm899_vm10, %v2248_v22  ;;  %2329 = vrot.lane.b32.xlu2 %v2283_v3, %s5263_s7 }
 0x69d   : > { %2387 = vrot.lane.b32.xlu1 %v2294_v23, %s5262_s6 }
 0x6a3   : > { %v2284_v55 = vld [vmem:[#allocation2 + $0x5e] sm:$0xff] }
 0x6a4   : > { %v2295_v15 = vld [vmem:[#allocation2 + $0x5a] sm:$0xff]  ;;  %v2296_v56 = vld [vmem:[#allocation2 + $0x62] sm:$0xff]  ;;  %2331 = vrot.lane.b32.xlu0 %v2284_v55, %s5263_s7 }
 0x6a5   : > { %2391 = vrot.lane.b32.xlu2 %v2296_v56, %s5262_s6  ;;  %2389 = vrot.lane.b32.xlu1 %v2295_v15, %s5262_s6 }
 0x6af   : > { %v2376_v29 = vpop.permute.xlu2 %2375 }
 0x6b0   : > { %2408 = vst.msk [vmem:[#allocation2 + $0x20] sm:$0xff] %vm1045_vm0, %v2376_v29 }
 0x6b7   : > { %v2320_v34 = vpop.permute.xlu2 %2319  ;;  %v2420_v62 = vld [vmem:[#allocation2 + $0x20] sm:$0xff] }
 0x6b8   : > { %2350 = vst.msk [vmem:[#allocation2 + $0x30] sm:$0xff] %vm984_vm15, %v2320_v34  ;;  %v2430_v7 = vpack.c.bf16 %v2420_v62, %v2419_v28 }
 0x6ba   : > { %4704 = vmatmul.msk.bf16.gmra.mxu3 %vm628_vm12, %v2430_v7 }
 0x6c6   : > { %v2318_v39 = vpop.permute.xlu1 %2317 }
 0x6c7   : > { %2349 = vst.msk [vmem:[#allocation2 + $0x28] sm:$0xff] %vm984_vm15, %v2318_v39 }
 0x6ce   : > { %v2378_v17 = vpop.permute.xlu1 %2377 }
 0x6cf   : > { %2409 = vst.msk [vmem:[#allocation2 + $0x28] sm:$0xff] %vm1045_vm0, %v2378_v17 }
 0x6d6   : > { %v2421_v36 = vld [vmem:[#allocation2 + $0x28] sm:$0xff] }
 0x6d7   : > { %v2380_v40 = vpop.permute.xlu2 %2379 }
 0x6d8   : > { %2410 = vst.msk [vmem:[#allocation2 + $0x30] sm:$0xff] %vm1045_vm0, %v2380_v40 }
 0x6df   : > { %v2422_v14 = vld [vmem:[#allocation2 + $0x30] sm:$0xff]  ;;  %v2382_v37 = vpop.permute.xlu2 %2381 }
 0x6e0   : > { %v2431_v53 = vpack.c.bf16 %v2422_v14, %v2421_v36 }
 0x6e2   : > { %4705 = vmatmul.msk.bf16.gmra.mxu3 %vm628_vm12, %v2431_v53 }
 0x6ee   : > { %v2328_v30 = vpop.permute.xlu2 %2327  ;;  %v2322_v42 = vpop.permute.xlu0 %2321 }
 0x6ef   : > { %2354 = vst.msk [vmem:[#allocation2 + $0x50] sm:$0xff] %vm984_vm15, %v2328_v30 }
 0x6f0   : > { %2351 = vst.msk [vmem:[#allocation2 + $0x38] sm:$0xff] %vm984_vm15, %v2322_v42 }
 0x6f1   : > { %2411 = vst.msk [vmem:[#allocation2 + $0x38] sm:$0xff] %vm1045_vm0, %v2382_v37 }
 0x6f6   : > { %v2324_v24 = vpop.permute.xlu1 %2323  ;;  %v2330_v52 = vpop.permute.xlu2 %2329 }
 0x6f7   : > { %2352 = vst.msk [vmem:[#allocation2 + $0x40] sm:$0xff] %vm984_vm15, %v2324_v24 }
 0x6f8   : > { %2355 = vst.msk [vmem:[#allocation2 + $0x58] sm:$0xff] %vm984_vm15, %v2330_v52  ;;  %v2423_v13 = vld [vmem:[#allocation2 + $0x38] sm:$0xff] }
 0x6fa   : > { %v2512_v2 = vpop.f32.mrf.mxu3 }
 0x6fb   : > { %v2513_v51 = vadd.f32 %v6257_v59, %v2512_v2 }
 0x6fd   : > { %v6263_v33 = vadd.f32 %v2513_v51, %v5919_v26 }
 0x6fe   : > { %v2326_v50 = vpop.permute.xlu1 %2325 }
 0x6ff   : > { %v2566_v0 = vmul.f32 0.044715, %v6263_v33  ;;  %2353 = vst.msk [vmem:[#allocation2 + $0x48] sm:$0xff] %vm984_vm15, %v2326_v50  ;;  %v2384_v8 = vpop.permute.xlu0 %2383  ;;  %v2554_v56 = vmul.f32 0.5, %v6263_v33  ;;  %v2392_v37 = vpop.permute.xlu2 %2391 }
 0x700   : > { %2412 = vst.msk [vmem:[#allocation2 + $0x40] sm:$0xff] %vm1045_vm0, %v2384_v8 }
 0x701   : > { %v2578_v60 = vmul.f32 %v2566_v0, %v6263_v33 }
 0x702   : > { %v2514_v58 = vpop.f32.mrf.mxu3 }
 0x703   : > { %v2515_v9 = vadd.f32 %v6257_v59, %v2514_v58  ;;  %v2590_v43 = vmul.f32 %v2578_v60, %v6263_v33 }
 0x705   : > { %v6272_v38 = vadd.f32 %v2515_v9, %v5928_v31  ;;  %v2602_v26 = vadd.f32 %v2590_v43, %v6263_v33 }
 0x707   : > { %v2614_v21 = vmul.f32 0.7978846, %v2602_v26  ;;  %v2567_v11 = vmul.f32 0.044715, %v6272_v38  ;;  %v2386_v10 = vpop.permute.xlu0 %2385  ;;  %v2424_v41 = vld [vmem:[#allocation2 + $0x40] sm:$0xff]  ;;  %v2555_v14 = vmul.f32 0.5, %v6272_v38 }
 0x708   : > { %2413 = vst.msk [vmem:[#allocation2 + $0x48] sm:$0xff] %vm1045_vm0, %v2386_v10  ;;  %v2432_v5 = vpack.c.bf16 %v2424_v41, %v2423_v13 }
 0x709   : > { %5098 = vtanh.f32 %v2614_v21  ;;  %v2579_v3 = vmul.f32 %v2567_v11, %v6272_v38 }
 0x70a   : > { %4706 = vmatmul.msk.bf16.gmra.mxu3 %vm628_vm12, %v2432_v5 }
 0x70b   : > { %v2591_v23 = vmul.f32 %v2579_v3, %v6272_v38 }
 0x70d   : > { %v2603_v31 = vadd.f32 %v2591_v23, %v6272_v38 }
 0x70f   : > { %v5099_v22 = vpop.eup %5098  ;;  %v2388_v55 = vpop.permute.xlu1 %2387  ;;  %v2615_v15 = vmul.f32 0.7978846, %v2603_v31  ;;  %v2425_v39 = vld [vmem:[#allocation2 + $0x48] sm:$0xff] }
 0x710   : > { %2414 = vst.msk [vmem:[#allocation2 + $0x50] sm:$0xff] %vm1045_vm0, %v2388_v55  ;;  %v2638_v29 = vadd.f32 1.0, %v5099_v22 }
 0x711   : > { %5100 = vtanh.f32 %v2615_v15 }
 0x712   : > { %v2650_v34 = vmul.f32 %v2638_v29, %v2554_v56 }
 0x714   : > { %v2662_v28 = vmul.f32 %v5462_v20, %v2650_v34 }
 0x716   : > { %2686 = vrot.lane.b32.xlu0 %v2662_v28, %s5262_s6  ;;  %v2332_v40 = vpop.permute.xlu0 %2331 }
 0x717   : > { %v5101_v62 = vpop.eup %5100  ;;  %v2390_v7 = vpop.permute.xlu1 %2389  ;;  %v2426_v17 = vld [vmem:[#allocation2 + $0x50] sm:$0xff]  ;;  %2356 = vst.msk [vmem:[#allocation2 + $0x60] sm:$0xff] %vm984_vm15, %v2332_v40 }
 0x718   : > { %2415 = vst.msk [vmem:[#allocation2 + $0x58] sm:$0xff] %vm1045_vm0, %v2390_v7  ;;  %v2433_v36 = vpack.c.bf16 %v2426_v17, %v2425_v39  ;;  %v2639_v53 = vadd.f32 1.0, %v5101_v62 }
 0x719   : > { %2416 = vst.msk [vmem:[#allocation2 + $0x60] sm:$0xff] %vm1045_vm0, %v2392_v37 }
 0x71a   : > { %v2651_v30 = vmul.f32 %v2639_v53, %v2555_v14  ;;  %4707 = vmatmul.msk.bf16.gmra.mxu3 %vm628_vm12, %v2433_v36 }
 0x71c   : > { %v2663_v42 = vmul.f32 %v5490_v46, %v2651_v30 }
 0x71e   : > { %2688 = vrot.lane.b32.xlu1 %v2663_v42, %s5262_s6 }
 0x71f   : > { %v2427_v24 = vld [vmem:[#allocation2 + $0x58] sm:$0xff] }
 0x720   : > { %v2428_v52 = vld [vmem:[#allocation2 + $0x60] sm:$0xff] }
 0x721   : > { %v2434_v2 = vpack.c.bf16 %v2428_v52, %v2427_v24 }
 0x72a   : > { %4708 = vmatmul.msk.bf16.gmra.mxu3 %vm628_vm12, %v2434_v2 }
 0x73d   : > { %v2517_v51 = vpop.f32.mrf.mxu3 }
 0x73e   : > { %v2518_v50 = vadd.f32 %v6257_v59, %v2517_v51 }
 0x740   : > { %v6295_v0 = vadd.f32 %v2518_v50, %v5938_v57 }
 0x742   : > { %v2568_v8 = vmul.f32 0.044715, %v6295_v0  ;;  %v2556_v23 = vmul.f32 0.5, %v6295_v0 }
 0x744   : > { %v2580_v60 = vmul.f32 %v2568_v8, %v6295_v0 }
 0x745   : > { %v2519_v58 = vpop.f32.mrf.mxu3 }
 0x746   : > { %v2520_v9 = vadd.f32 %v6257_v59, %v2519_v58  ;;  %v2592_v43 = vmul.f32 %v2580_v60, %v6295_v0 }
 0x748   : > { %v6302_v26 = vadd.f32 %v2520_v9, %v5951_v18  ;;  %v2604_v21 = vadd.f32 %v2592_v43, %v6295_v0 }
 0x74a   : > { %v2616_v11 = vmul.f32 0.7978846, %v2604_v21  ;;  %v2569_v10 = vmul.f32 0.044715, %v6302_v26  ;;  %v2557_v15 = vmul.f32 0.5, %v6302_v26 }
 0x74c   : > { %5102 = vtanh.f32 %v2616_v11  ;;  %v2581_v57 = vmul.f32 %v2569_v10, %v6302_v26 }
 0x74e   : > { %v2593_v13 = vmul.f32 %v2581_v57, %v6302_v26 }
 0x750   : > { %v2605_v41 = vadd.f32 %v2593_v13, %v6302_v26 }
 0x752   : > { %v5103_v5 = vpop.eup %5102  ;;  %v2617_v3 = vmul.f32 0.7978846, %v2605_v41 }
 0x753   : > { %v2640_v31 = vadd.f32 1.0, %v5103_v5 }
 0x754   : > { %5104 = vtanh.f32 %v2617_v3 }
 0x755   : > { %v2652_v18 = vmul.f32 %v2640_v31, %v2556_v23 }
 0x757   : > { %v2664_v22 = vmul.f32 %v5457_v16, %v2652_v18 }
 0x759   : > { %2690 = vrot.lane.b32.xlu2 %v2664_v22, %s5262_s6 }
 0x75a   : > { %v5105_v55 = vpop.eup %5104 }
 0x75b   : > { %v2641_v56 = vadd.f32 1.0, %v5105_v55 }
 0x75d   : > { %v2653_v29 = vmul.f32 %v2641_v56, %v2557_v15 }
 0x75f   : > { %v2665_v34 = vmul.f32 %v5556_v63, %v2653_v29 }
 0x761   : > { %2692 = vrot.lane.b32.xlu0 %v2665_v34, %s5262_s6 }
 0x765   : > { %v2522_v28 = vpop.f32.mrf.mxu3 }
 0x766   : > { %v2523_v62 = vadd.f32 %v6257_v59, %v2522_v28 }
 0x768   : > { %v6317_v7 = vadd.f32 %v2523_v62, %v5962_v27 }
 0x76a   : > { %v2570_v39 = vmul.f32 0.044715, %v6317_v7  ;;  %v2558_v50 = vmul.f32 0.5, %v6317_v7 }
 0x76c   : > { %v2582_v17 = vmul.f32 %v2570_v39, %v6317_v7 }
 0x76d   : > { %v2524_v40 = vpop.f32.mrf.mxu3 }
 0x76e   : > { %v2525_v36 = vadd.f32 %v6257_v59, %v2524_v40  ;;  %v2594_v14 = vmul.f32 %v2582_v17, %v6317_v7 }
 0x770   : > { %v6324_v53 = vadd.f32 %v2525_v36, %v5974_v1  ;;  %v2606_v37 = vadd.f32 %v2594_v14, %v6317_v7 }
 0x772   : > { %v2618_v30 = vmul.f32 0.7978846, %v2606_v37  ;;  %v2571_v42 = vmul.f32 0.044715, %v6324_v53  ;;  %v2559_v9 = vmul.f32 0.5, %v6324_v53 }
 0x774   : > { %5106 = vtanh.f32 %v2618_v30  ;;  %v2583_v27 = vmul.f32 %v2571_v42, %v6324_v53 }
 0x776   : > { %v2595_v24 = vmul.f32 %v2583_v27, %v6324_v53 }
 0x778   : > { %v2607_v52 = vadd.f32 %v2595_v24, %v6324_v53 }
 0x77a   : > { %v5107_v2 = vpop.eup %5106  ;;  %v2619_v51 = vmul.f32 0.7978846, %v2607_v52 }
 0x77b   : > { %v2642_v8 = vadd.f32 1.0, %v5107_v2 }
 0x77c   : > { %5108 = vtanh.f32 %v2619_v51 }
 0x77d   : > { %v2654_v1 = vmul.f32 %v2642_v8, %v2558_v50 }
 0x77f   : > { %v2666_v60 = vmul.f32 %v5511_v12, %v2654_v1 }
 0x781   : > { %2694 = vrot.lane.b32.xlu1 %v2666_v60, %s5262_s6 }
 0x782   : > { %v5109_v58 = vpop.eup %5108 }
 0x783   : > { %v2643_v43 = vadd.f32 1.0, %v5109_v58 }
 0x785   : > { %v2655_v21 = vmul.f32 %v2643_v43, %v2559_v9 }
 0x787   : > { %v2667_v11 = vmul.f32 %v5629_v61, %v2655_v21 }
 0x788   : > { %v2687_v10 = vpop.permute.xlu0 %2686 }
 0x789   : > { %2696 = vrot.lane.b32.xlu2 %v2667_v11, %s5262_s6  ;;  %2722 = vst.msk [vmem:[#allocation2 + $0x8] sm:$0xff] %vm899_vm10, %v2687_v10 }
 0x78d   : > { %v2527_v57 = vpop.f32.mrf.mxu3 }
 0x78e   : > { %v2528_v13 = vadd.f32 %v6257_v59, %v2527_v57 }
 0x790   : > { %v2689_v41 = vpop.permute.xlu1 %2688  ;;  %v2734_v5 = vld [vmem:[#allocation2 + $0x4] sm:$0xff]  ;;  %v6340_v3 = vadd.f32 %v2528_v13, %v5993_v45 }
 0x791   : > { %2723 = vst.msk [vmem:[#allocation2 + $0x10] sm:$0xff] %vm899_vm10, %v2689_v41  ;;  %2759 = vrot.lane.b32.xlu1 %v2734_v5, %s5263_s7 }
 0x792   : > { %v2572_v23 = vmul.f32 0.044715, %v6340_v3  ;;  %v2560_v30 = vmul.f32 0.5, %v6340_v3 }
 0x794   : > { %v2584_v31 = vmul.f32 %v2572_v23, %v6340_v3 }
 0x795   : > { %v2529_v18 = vpop.f32.mrf.mxu3 }
 0x796   : > { %v2530_v22 = vadd.f32 %v6257_v59, %v2529_v18  ;;  %v2596_v55 = vmul.f32 %v2584_v31, %v6340_v3 }
 0x798   : > { %v2735_v15 = vld [vmem:[#allocation2 + $0xc] sm:$0xff]  ;;  %v6349_v56 = vadd.f32 %v2530_v22, %v6001_v49  ;;  %v2608_v45 = vadd.f32 %v2596_v55, %v6340_v3 }
 0x799   : > { %2761 = vrot.lane.b32.xlu2 %v2735_v15, %s5263_s7  ;;  %2808 = vrot.lane.b32.xlu1 %v2735_v15, %s5262_s6 }
 0x79a   : > { %v2620_v29 = vmul.f32 0.7978846, %v2608_v45  ;;  %v2573_v34 = vmul.f32 0.044715, %v6349_v56  ;;  %v2561_v9 = vmul.f32 0.5, %v6349_v56 }
 0x79c   : > { %5110 = vtanh.f32 %v2620_v29  ;;  %v2585_v28 = vmul.f32 %v2573_v34, %v6349_v56 }
 0x79d   : > { %v2532_v62 = vpop.f32.mrf.mxu3 }
 0x79e   : > { %v2533_v39 = vadd.f32 %v6257_v59, %v2532_v62  ;;  %v2597_v17 = vmul.f32 %v2585_v28, %v6349_v56 }
 0x7a0   : > { %v6359_v49 = vadd.f32 %v2533_v39, %v6010_v47  ;;  %v2609_v40 = vadd.f32 %v2597_v17, %v6349_v56 }
 0x7a2   : > { %v5111_v36 = vpop.eup %5110  ;;  %v2621_v14 = vmul.f32 0.7978846, %v2609_v40  ;;  %v2574_v37 = vmul.f32 0.044715, %v6359_v49  ;;  %v2562_v55 = vmul.f32 0.5, %v6359_v49 }
 0x7a3   : > { %v2644_v42 = vadd.f32 1.0, %v5111_v36 }
 0x7a4   : > { %5112 = vtanh.f32 %v2621_v14  ;;  %v2586_v27 = vmul.f32 %v2574_v37, %v6359_v49 }
 0x7a5   : > { %v2534_v24 = vpop.f32.mrf.mxu3  ;;  %v2656_v52 = vmul.f32 %v2644_v42, %v2560_v30 }
 0x7a6   : > { %v2535_v2 = vadd.f32 %v6257_v59, %v2534_v24  ;;  %v2598_v51 = vmul.f32 %v2586_v27, %v6359_v49 }
 0x7a7   : > { %v2668_v47 = vmul.f32 %v5596_v35, %v2656_v52 }
 0x7a8   : > { %v6369_v50 = vadd.f32 %v2535_v2, %v6022_v25  ;;  %v2610_v8 = vadd.f32 %v2598_v51, %v6359_v49 }
 0x7a9   : > { %2698 = vrot.lane.b32.xlu0 %v2668_v47, %s5262_s6 }
 0x7aa   : > { %v5113_v1 = vpop.eup %5112  ;;  %v2622_v60 = vmul.f32 0.7978846, %v2610_v8  ;;  %v2575_v58 = vmul.f32 0.044715, %v6369_v50  ;;  %v2563_v37 = vmul.f32 0.5, %v6369_v50 }
 0x7ab   : > { %v2645_v43 = vadd.f32 1.0, %v5113_v1 }
 0x7ac   : > { %5114 = vtanh.f32 %v2622_v60  ;;  %v2587_v21 = vmul.f32 %v2575_v58, %v6369_v50 }
 0x7ad   : > { %v2537_v11 = vpop.f32.mrf.mxu3  ;;  %v2657_v10 = vmul.f32 %v2645_v43, %v2561_v9 }
 0x7ae   : > { %v2538_v57 = vadd.f32 %v6257_v59, %v2537_v11  ;;  %v2599_v25 = vmul.f32 %v2587_v21, %v6369_v50 }
 0x7af   : > { %v2669_v13 = vmul.f32 %v5612_v19, %v2657_v10 }
 0x7b0   : > { %v6380_v41 = vadd.f32 %v2538_v57, %v6036_v44  ;;  %v2611_v5 = vadd.f32 %v2599_v25, %v6369_v50 }
 0x7b1   : > { %2700 = vrot.lane.b32.xlu0 %v2669_v13, %s5262_s6  ;;  %v4900_v13 = vld [vmem:[%s7038_s1 + $0xe8] sm:$0xff] }
 0x7b2   : > { %v5115_v31 = vpop.eup %5114  ;;  %v2623_v18 = vmul.f32 0.7978846, %v2611_v5  ;;  %v2576_v22 = vmul.f32 0.044715, %v6380_v41  ;;  %v2564_v47 = vmul.f32 0.5, %v6380_v41  ;;  %2944 = vmatpush.bf16.msrb.mxu0 %v4900_v13  ;;  %v4899_v5 = vld [vmem:[%s7038_s1 + $0xe0] sm:$0xff] }
 0x7b3   : > { %v2691_v23 = vpop.permute.xlu2 %2690  ;;  %v2646_v15 = vadd.f32 1.0, %v5115_v31  ;;  %v4897_v31 = vld [vmem:[%s7038_s1 + $0xd0] sm:$0xff] }
 0x7b4   : > { %2724 = vst.msk [vmem:[#allocation2 + $0x18] sm:$0xff] %vm899_vm10, %v2691_v23  ;;  %5116 = vtanh.f32 %v2623_v18  ;;  %v2588_v45 = vmul.f32 %v2576_v22, %v6380_v41  ;;  %v4898_v23 = vld [vmem:[%s7038_s1 + $0xd8] sm:$0xff] }
 0x7b5   : > { %v2539_v29 = vpop.f32.mrf.mxu3  ;;  %v2658_v44 = vmul.f32 %v2646_v15, %v2562_v55  ;;  %v4896_v55 = vld [vmem:[%s7038_s1 + $0xc8] sm:$0xff] }
 0x7b6   : > { %v2540_v34 = vadd.f32 %v6257_v59, %v2539_v29  ;;  %v2600_v28 = vmul.f32 %v2588_v45, %v6380_v41  ;;  %2945 = vmatpush.bf16.msrb.mxu0 %v4899_v5 }
 0x7b7   : > { %v2670_v62 = vmul.f32 %v5622_v48, %v2658_v44  ;;  %v4895_v44 = vld [vmem:[%s7038_s1 + $0xc0] sm:$0xff] }
 0x7b8   : > { %v6392_v39 = vadd.f32 %v2540_v34, %v6050_v6  ;;  %v2612_v17 = vadd.f32 %v2600_v28, %v6380_v41 }
 0x7b9   : > { %2702 = vrot.lane.b32.xlu0 %v2670_v62, %s5262_s6 }
 0x7ba   : > { %v5117_v36 = vpop.eup %5116  ;;  %v2624_v14 = vmul.f32 0.7978846, %v2612_v17  ;;  %v2577_v59 = vmul.f32 0.044715, %v6392_v39  ;;  %v2565_v9 = vmul.f32 0.5, %v6392_v39  ;;  %2946 = vmatpush.bf16.msrb.mxu0 %v4898_v23 }
 0x7bb   : > { %v2736_v40 = vld [vmem:[#allocation2 + $0x14] sm:$0xff]  ;;  %v2647_v30 = vadd.f32 1.0, %v5117_v36 }
 0x7bc   : > { %2810 = vrot.lane.b32.xlu2 %v2736_v40, %s5262_s6  ;;  %2763 = vrot.lane.b32.xlu1 %v2736_v40, %s5263_s7  ;;  %5118 = vtanh.f32 %v2624_v14  ;;  %v2589_v6 = vmul.f32 %v2577_v59, %v6392_v39 }
 0x7bd   : > { %v2659_v42 = vmul.f32 %v2647_v30, %v2563_v37 }
 0x7be   : > { %v2601_v27 = vmul.f32 %v2589_v6, %v6392_v39  ;;  %2947 = vmatpush.bf16.msrb.mxu0 %v4897_v31 }
 0x7bf   : > { %v2671_v24 = vmul.f32 %v5697_v32, %v2659_v42 }
 0x7c0   : > { %v2613_v52 = vadd.f32 %v2601_v27, %v6392_v39 }
 0x7c1   : > { %2704 = vrot.lane.b32.xlu0 %v2671_v24, %s5262_s6 }
 0x7c2   : > { %v5119_v2 = vpop.eup %5118  ;;  %v2625_v51 = vmul.f32 0.7978846, %v2613_v52  ;;  %2948 = vmatpush.bf16.msrb.mxu0 %v4896_v55  ;;  %v6478_v55 = vld [vmem:[%s7039_s2 + $0x6] ss:$0 sm:$0xff] }
 0x7c3   : > { %v2648_v8 = vadd.f32 1.0, %v5119_v2 }
 0x7c4   : > { %5120 = vtanh.f32 %v2625_v51 }
 0x7c5   : > { %v2660_v1 = vmul.f32 %v2648_v8, %v2564_v47 }
 0x7c6   : > { %2949 = vmatpush.bf16.msrb.mxu0 %v4895_v44 }
 0x7c7   : > { %v2672_v60 = vmul.f32 %v5714_v54, %v2660_v1 }
 0x7c9   : > { %2706 = vrot.lane.b32.xlu0 %v2672_v60, %s5262_s6 }
 0x7ca   : > { %v5121_v58 = vpop.eup %5120 }
 0x7cb   : > { %v2649_v43 = vadd.f32 1.0, %v5121_v58 }
 0x7cd   : > { %v2661_v21 = vmul.f32 %v2649_v43, %v2565_v9 }
 0x7cf   : > { %v2673_v11 = vmul.f32 %v5723_v4, %v2661_v21 }
 0x7d1   : > { %2708 = vrot.lane.b32.xlu0 %v2673_v11, %s5262_s6 }
 0x7d3   : > { %v2693_v10 = vpop.permute.xlu0 %2692 }
 0x7d4   : > { %2725 = vst.msk [vmem:[#allocation2 + $0x20] sm:$0xff] %vm899_vm10, %v2693_v10 }
 0x7db   : > { %v2737_v57 = vld [vmem:[#allocation2 + $0x1c] sm:$0xff] }
 0x7dc   : > { %2812 = vrot.lane.b32.xlu1 %v2737_v57, %s5262_s6  ;;  %2765 = vrot.lane.b32.xlu2 %v2737_v57, %s5263_s7 }
 0x7e3   : > { %v2697_v25 = vpop.permute.xlu2 %2696 }
 0x7e4   : > { %2727 = vst.msk [vmem:[#allocation2 + $0x30] sm:$0xff] %vm899_vm10, %v2697_v25 }
 0x7f3   : > { %v2695_v18 = vpop.permute.xlu1 %2694  ;;  %v2762_v22 = vpop.permute.xlu2 %2761 }
 0x7f4   : > { %2726 = vst.msk [vmem:[#allocation2 + $0x28] sm:$0xff] %vm899_vm10, %v2695_v18 }
 0x7f5   : > { %2796 = vst.msk [vmem:[#allocation2 + $0x10] sm:$0xff] %vm984_vm15, %v2762_v22 }
 0x7fb   : > { %v2738_v15 = vld [vmem:[#allocation2 + $0x24] sm:$0xff]  ;;  %v2739_v45 = vld [vmem:[#allocation2 + $0x2c] sm:$0xff] }
 0x7fc   : > { %2767 = vrot.lane.b32.xlu1 %v2738_v15, %s5263_s7  ;;  %2814 = vrot.lane.b32.xlu2 %v2738_v15, %s5262_s6 }
 0x803   : > { %v2760_v29 = vpop.permute.xlu1 %2759 }
 0x804   : > { %2795 = vst.msk [vmem:[#allocation2 + $0x8] sm:$0xff] %vm984_vm15, %v2760_v29  ;;  %2816 = vrot.lane.b32.xlu1 %v2739_v45, %s5262_s6  ;;  %2769 = vrot.lane.b32.xlu2 %v2739_v45, %s5263_s7 }
 0x80b   : > { %v2809_v34 = vpop.permute.xlu1 %2808 }
 0x80c   : > { %2844 = vst.msk [vmem:[#allocation2 + $0x8] sm:$0xff] %vm1045_vm0, %v2809_v34 }
 0x813   : > { %v2856_v17 = vld [vmem:[#allocation2 + $0x8] sm:$0xff] }
 0x816   : > { %v2811_v28 = vpop.permute.xlu2 %2810 }
 0x817   : > { %2845 = vst.msk [vmem:[#allocation2 + $0x10] sm:$0xff] %vm1045_vm0, %v2811_v28 }
 0x81b   : > { %v2699_v62 = vpop.permute.xlu0 %2698 }
 0x81c   : > { %2728 = vst.msk [vmem:[#allocation2 + $0x38] sm:$0xff] %vm899_vm10, %v2699_v62 }
 0x81e   : > { %v2857_v40 = vld [vmem:[#allocation2 + $0x10] sm:$0xff] }
 0x81f   : > { %v2868_v36 = vpack.c.bf16 %v2857_v40, %v2856_v17 }
 0x821   : > { %4733 = vmatmul.msk.bf16.vlgmr.msrb.gmra.mxu0 %vm628_vm12, %v2868_v36 }
 0x823   : > { %v2740_v14 = vld [vmem:[#allocation2 + $0x34] sm:$0xff]  ;;  %v2701_v59 = vpop.permute.xlu0 %2700 }
 0x824   : > { %2729 = vst.msk [vmem:[#allocation2 + $0x40] sm:$0xff] %vm899_vm10, %v2701_v59  ;;  %2771 = vrot.lane.b32.xlu0 %v2740_v14, %s5263_s7  ;;  %2818 = vrot.lane.b32.xlu2 %v2740_v14, %s5262_s6 }
 0x82b   : > { %v2741_v37 = vld [vmem:[#allocation2 + $0x3c] sm:$0xff]  ;;  %v2703_v30 = vpop.permute.xlu0 %2702 }
 0x82c   : > { %2730 = vst.msk [vmem:[#allocation2 + $0x48] sm:$0xff] %vm899_vm10, %v2703_v30  ;;  %2820 = vrot.lane.b32.xlu2 %v2741_v37, %s5262_s6  ;;  %2773 = vrot.lane.b32.xlu1 %v2741_v37, %s5263_s7 }
 0x82e   : > { %v2764_v6 = vpop.permute.xlu1 %2763 }
 0x82f   : > { %2797 = vst.msk [vmem:[#allocation2 + $0x18] sm:$0xff] %vm984_vm15, %v2764_v6 }
 0x833   : > { %v2742_v42 = vld [vmem:[#allocation2 + $0x44] sm:$0xff]  ;;  %v2705_v27 = vpop.permute.xlu0 %2704 }
 0x834   : > { %2731 = vst.msk [vmem:[#allocation2 + $0x50] sm:$0xff] %vm899_vm10, %v2705_v27  ;;  %2775 = vrot.lane.b32.xlu1 %v2742_v42, %s5263_s7  ;;  %2822 = vrot.lane.b32.xlu0 %v2742_v42, %s5262_s6 }
 0x836   : > { %v2766_v24 = vpop.permute.xlu2 %2765 }
 0x837   : > { %2798 = vst.msk [vmem:[#allocation2 + $0x20] sm:$0xff] %vm984_vm15, %v2766_v24 }
 0x83b   : > { %v2743_v52 = vld [vmem:[#allocation2 + $0x4c] sm:$0xff]  ;;  %v2707_v2 = vpop.permute.xlu0 %2706 }
 0x83c   : > { %2732 = vst.msk [vmem:[#allocation2 + $0x58] sm:$0xff] %vm899_vm10, %v2707_v2  ;;  %2824 = vrot.lane.b32.xlu0 %v2743_v52, %s5262_s6  ;;  %2777 = vrot.lane.b32.xlu2 %v2743_v52, %s5263_s7 }
 0x843   : > { %v2744_v51 = vld [vmem:[#allocation2 + $0x54] sm:$0xff]  ;;  %v2709_v47 = vpop.permute.xlu0 %2708 }
 0x844   : > { %2733 = vst.msk [vmem:[#allocation2 + $0x60] sm:$0xff] %vm899_vm10, %v2709_v47  ;;  %2779 = vrot.lane.b32.xlu2 %v2744_v51, %s5263_s7  ;;  %2826 = vrot.lane.b32.xlu1 %v2744_v51, %s5262_s6 }
 0x84b   : > { %v2745_v8 = vld [vmem:[#allocation2 + $0x5c] sm:$0xff]  ;;  %v2746_v1 = vld [vmem:[#allocation2 + $0x64] sm:$0xff] }
 0x84c   : > { %2830 = vrot.lane.b32.xlu2 %v2746_v1, %s5262_s6  ;;  %2828 = vrot.lane.b32.xlu1 %v2745_v8, %s5262_s6 }
 0x84d   : > { %2781 = vrot.lane.b32.xlu0 %v2745_v8, %s5263_s7 }
 0x84e   : > { %v2813_v60 = vpop.permute.xlu1 %2812 }
 0x84f   : > { %2846 = vst.msk [vmem:[#allocation2 + $0x18] sm:$0xff] %vm1045_vm0, %v2813_v60 }
 0x856   : > { %v2815_v58 = vpop.permute.xlu2 %2814  ;;  %v2858_v43 = vld [vmem:[#allocation2 + $0x18] sm:$0xff] }
 0x857   : > { %2847 = vst.msk [vmem:[#allocation2 + $0x20] sm:$0xff] %vm1045_vm0, %v2815_v58 }
 0x85e   : > { %v2770_v9 = vpop.permute.xlu2 %2769  ;;  %v2859_v21 = vld [vmem:[#allocation2 + $0x20] sm:$0xff] }
 0x85f   : > { %2800 = vst.msk [vmem:[#allocation2 + $0x30] sm:$0xff] %vm984_vm15, %v2770_v9  ;;  %v2869_v11 = vpack.c.bf16 %v2859_v21, %v2858_v43 }
 0x861   : > { %4734 = vmatmul.msk.bf16.gmra.mxu0 %vm628_vm12, %v2869_v11 }
 0x86e   : > { %v2768_v10 = vpop.permute.xlu1 %2767 }
 0x86f   : > { %2799 = vst.msk [vmem:[#allocation2 + $0x28] sm:$0xff] %vm984_vm15, %v2768_v10 }
 0x876   : > { %v2817_v57 = vpop.permute.xlu1 %2816 }
 0x877   : > { %2848 = vst.msk [vmem:[#allocation2 + $0x28] sm:$0xff] %vm1045_vm0, %v2817_v57 }
 0x87e   : > { %v2819_v25 = vpop.permute.xlu2 %2818  ;;  %v2860_v13 = vld [vmem:[#allocation2 + $0x28] sm:$0xff] }
 0x87f   : > { %2849 = vst.msk [vmem:[#allocation2 + $0x30] sm:$0xff] %vm1045_vm0, %v2819_v25 }
 0x886   : > { %v2861_v5 = vld [vmem:[#allocation2 + $0x30] sm:$0xff]  ;;  %v2821_v31 = vpop.permute.xlu2 %2820 }
 0x887   : > { %v2870_v23 = vpack.c.bf16 %v2861_v5, %v2860_v13 }
 0x889   : > { %4735 = vmatmul.msk.bf16.gmra.mxu0 %vm628_vm12, %v2870_v23 }
 0x896   : > { %v2778_v18 = vpop.permute.xlu2 %2777  ;;  %v2772_v22 = vpop.permute.xlu0 %2771 }
 0x897   : > { %2804 = vst.msk [vmem:[#allocation2 + $0x50] sm:$0xff] %vm984_vm15, %v2778_v18 }
 0x898   : > { %2801 = vst.msk [vmem:[#allocation2 + $0x38] sm:$0xff] %vm984_vm15, %v2772_v22 }
 0x899   : > { %2850 = vst.msk [vmem:[#allocation2 + $0x38] sm:$0xff] %vm1045_vm0, %v2821_v31 }
 0x89e   : > { %v2951_v15 = vpop.f32.mrf.mxu0  ;;  %v2774_v29 = vpop.permute.xlu1 %2773 }
 0x89f   : > { %v2952_v45 = vadd.f32 %v6478_v55, %v2951_v15  ;;  %v2780_v44 = vpop.permute.xlu2 %2779  ;;  %2802 = vst.msk [vmem:[#allocation2 + $0x40] sm:$0xff] %vm984_vm15, %v2774_v29 }
 0x8a0   : > { %2805 = vst.msk [vmem:[#allocation2 + $0x58] sm:$0xff] %vm984_vm15, %v2780_v44  ;;  %v2862_v51 = vld [vmem:[#allocation2 + $0x38] sm:$0xff] }
 0x8a1   : > { %v2993_v34 = vmul.f32 0.044715, %v2952_v45  ;;  %v2981_v1 = vmul.f32 0.5, %v2952_v45 }
 0x8a3   : > { %v3005_v28 = vmul.f32 %v2993_v34, %v2952_v45 }
 0x8a5   : > { %v3017_v62 = vmul.f32 %v3005_v28, %v2952_v45 }
 0x8a6   : > { %v2953_v17 = vpop.f32.mrf.mxu0  ;;  %v2776_v14 = vpop.permute.xlu1 %2775 }
 0x8a7   : > { %v3029_v40 = vadd.f32 %v3017_v62, %v2952_v45  ;;  %v2954_v36 = vadd.f32 %v6478_v55, %v2953_v17  ;;  %2803 = vst.msk [vmem:[#allocation2 + $0x48] sm:$0xff] %vm984_vm15, %v2776_v14  ;;  %v2823_v30 = vpop.permute.xlu0 %2822  ;;  %v2831_v22 = vpop.permute.xlu2 %2830 }
 0x8a8   : > { %2851 = vst.msk [vmem:[#allocation2 + $0x40] sm:$0xff] %vm1045_vm0, %v2823_v30 }
 0x8a9   : > { %v3041_v59 = vmul.f32 0.7978846, %v3029_v40  ;;  %v2994_v37 = vmul.f32 0.044715, %v2954_v36  ;;  %v2982_v11 = vmul.f32 0.5, %v2954_v36 }
 0x8ab   : > { %v3006_v6 = vmul.f32 %v2994_v37, %v2954_v36  ;;  %5122 = vtanh.f32 %v3041_v59 }
 0x8ad   : > { %v3018_v42 = vmul.f32 %v3006_v6, %v2954_v36 }
 0x8af   : > { %v3030_v27 = vadd.f32 %v3018_v42, %v2954_v36  ;;  %v2825_v2 = vpop.permute.xlu0 %2824  ;;  %v2863_v47 = vld [vmem:[#allocation2 + $0x40] sm:$0xff] }
 0x8b0   : > { %2852 = vst.msk [vmem:[#allocation2 + $0x48] sm:$0xff] %vm1045_vm0, %v2825_v2  ;;  %v2871_v8 = vpack.c.bf16 %v2863_v47, %v2862_v51 }
 0x8b1   : > { %v5123_v24 = vpop.eup %5122  ;;  %v3042_v52 = vmul.f32 0.7978846, %v3030_v27 }
 0x8b2   : > { %v3065_v60 = vadd.f32 1.0, %v5123_v24  ;;  %4736 = vmatmul.msk.bf16.gmra.mxu0 %vm628_vm12, %v2871_v8 }
 0x8b3   : > { %5124 = vtanh.f32 %v3042_v52 }
 0x8b4   : > { %v3077_v58 = vmul.f32 %v3065_v60, %v2981_v1 }
 0x8b6   : > { %v3089_v9 = vmul.f32 %v5462_v20, %v3077_v58  ;;  %v2827_v43 = vpop.permute.xlu1 %2826 }
 0x8b7   : > { %2853 = vst.msk [vmem:[#allocation2 + $0x50] sm:$0xff] %vm1045_vm0, %v2827_v43  ;;  %v2864_v5 = vld [vmem:[#allocation2 + $0x48] sm:$0xff] }
 0x8b8   : > { %3113 = vrot.lane.b32.xlu0 %v3089_v9, %s5262_s6 }
 0x8b9   : > { %v5125_v21 = vpop.eup %5124 }
 0x8ba   : > { %v3066_v10 = vadd.f32 1.0, %v5125_v21 }
 0x8bc   : > { %v3078_v57 = vmul.f32 %v3066_v10, %v2982_v11 }
 0x8be   : > { %v3090_v25 = vmul.f32 %v5490_v46, %v3078_v57  ;;  %v2829_v13 = vpop.permute.xlu1 %2828  ;;  %v2865_v23 = vld [vmem:[#allocation2 + $0x50] sm:$0xff] }
 0x8bf   : > { %2854 = vst.msk [vmem:[#allocation2 + $0x58] sm:$0xff] %vm1045_vm0, %v2829_v13  ;;  %v2782_v31 = vpop.permute.xlu0 %2781  ;;  %v2872_v18 = vpack.c.bf16 %v2865_v23, %v2864_v5 }
 0x8c0   : > { %3115 = vrot.lane.b32.xlu1 %v3090_v25, %s5262_s6  ;;  %2806 = vst.msk [vmem:[#allocation2 + $0x60] sm:$0xff] %vm984_vm15, %v2782_v31 }
 0x8c1   : > { %2855 = vst.msk [vmem:[#allocation2 + $0x60] sm:$0xff] %vm1045_vm0, %v2831_v22 }
 0x8c2   : > { %4737 = vmatmul.msk.bf16.gmra.mxu0 %vm628_vm12, %v2872_v18 }
 0x8c6   : > { %v2866_v15 = vld [vmem:[#allocation2 + $0x58] sm:$0xff] }
 0x8c8   : > { %v2867_v45 = vld [vmem:[#allocation2 + $0x60] sm:$0xff] }
 0x8c9   : > { %v2873_v29 = vpack.c.bf16 %v2867_v45, %v2866_v15 }
 0x8d2   : > { %4738 = vmatmul.msk.bf16.gmra.mxu0 %vm628_vm12, %v2873_v29 }
 0x8de   : > { %v2956_v44 = vpop.f32.mrf.mxu0 }
 0x8df   : > { %v2957_v34 = vadd.f32 %v6478_v55, %v2956_v44 }
 0x8e1   : > { %v2995_v28 = vmul.f32 0.044715, %v2957_v34  ;;  %v2983_v52 = vmul.f32 0.5, %v2957_v34 }
 0x8e3   : > { %v3007_v62 = vmul.f32 %v2995_v28, %v2957_v34 }
 0x8e5   : > { %v3019_v17 = vmul.f32 %v3007_v62, %v2957_v34 }
 0x8e6   : > { %v2958_v40 = vpop.f32.mrf.mxu0 }
 0x8e7   : > { %v3031_v36 = vadd.f32 %v3019_v17, %v2957_v34  ;;  %v2959_v14 = vadd.f32 %v6478_v55, %v2958_v40 }
 0x8e9   : > { %v3043_v59 = vmul.f32 0.7978846, %v3031_v36  ;;  %v2996_v37 = vmul.f32 0.044715, %v2959_v14  ;;  %v2984_v1 = vmul.f32 0.5, %v2959_v14 }
 0x8eb   : > { %v3008_v30 = vmul.f32 %v2996_v37, %v2959_v14  ;;  %5126 = vtanh.f32 %v3043_v59 }
 0x8ed   : > { %v3020_v6 = vmul.f32 %v3008_v30, %v2959_v14 }
 0x8ef   : > { %v3032_v42 = vadd.f32 %v3020_v6, %v2959_v14 }
 0x8f1   : > { %v5127_v27 = vpop.eup %5126  ;;  %v3044_v24 = vmul.f32 0.7978846, %v3032_v42 }
 0x8f2   : > { %v3067_v2 = vadd.f32 1.0, %v5127_v27 }
 0x8f3   : > { %5128 = vtanh.f32 %v3044_v24 }
 0x8f4   : > { %v3079_v51 = vmul.f32 %v3067_v2, %v2983_v52 }
 0x8f6   : > { %v3091_v47 = vmul.f32 %v5457_v16, %v3079_v51 }
 0x8f8   : > { %3117 = vrot.lane.b32.xlu2 %v3091_v47, %s5262_s6 }
 0x8f9   : > { %v5129_v8 = vpop.eup %5128 }
 0x8fa   : > { %v3068_v60 = vadd.f32 1.0, %v5129_v8 }
 0x8fc   : > { %v3080_v58 = vmul.f32 %v3068_v60, %v2984_v1 }
 0x8fe   : > { %v3092_v9 = vmul.f32 %v5556_v63, %v3080_v58 }
 0x900   : > { %3119 = vrot.lane.b32.xlu0 %v3092_v9, %s5262_s6 }
 0x906   : > { %v2961_v43 = vpop.f32.mrf.mxu0 }
 0x907   : > { %v2962_v21 = vadd.f32 %v6478_v55, %v2961_v43 }
 0x909   : > { %v2997_v11 = vmul.f32 0.044715, %v2962_v21  ;;  %v2985_v44 = vmul.f32 0.5, %v2962_v21 }
 0x90b   : > { %v3009_v10 = vmul.f32 %v2997_v11, %v2962_v21 }
 0x90d   : > { %v3021_v57 = vmul.f32 %v3009_v10, %v2962_v21 }
 0x90e   : > { %v2963_v25 = vpop.f32.mrf.mxu0 }
 0x90f   : > { %v3033_v13 = vadd.f32 %v3021_v57, %v2962_v21  ;;  %v2964_v5 = vadd.f32 %v6478_v55, %v2963_v25 }
 0x911   : > { %v3045_v23 = vmul.f32 0.7978846, %v3033_v13  ;;  %v2998_v31 = vmul.f32 0.044715, %v2964_v5  ;;  %v2986_v40 = vmul.f32 0.5, %v2964_v5 }
 0x913   : > { %v3010_v18 = vmul.f32 %v2998_v31, %v2964_v5  ;;  %5130 = vtanh.f32 %v3045_v23 }
 0x915   : > { %v3022_v22 = vmul.f32 %v3010_v18, %v2964_v5 }
 0x917   : > { %v3034_v15 = vadd.f32 %v3022_v22, %v2964_v5 }
 0x919   : > { %v5131_v45 = vpop.eup %5130  ;;  %v3046_v29 = vmul.f32 0.7978846, %v3034_v15 }
 0x91a   : > { %v3069_v34 = vadd.f32 1.0, %v5131_v45 }
 0x91b   : > { %5132 = vtanh.f32 %v3046_v29 }
 0x91c   : > { %v3081_v28 = vmul.f32 %v3069_v34, %v2985_v44 }
 0x91e   : > { %v3093_v62 = vmul.f32 %v5511_v12, %v3081_v28 }
 0x920   : > { %3121 = vrot.lane.b32.xlu1 %v3093_v62, %s5262_s6 }
 0x921   : > { %v5133_v17 = vpop.eup %5132 }
 0x922   : > { %v3070_v36 = vadd.f32 1.0, %v5133_v17 }
 0x924   : > { %v3082_v14 = vmul.f32 %v3070_v36, %v2986_v40 }
 0x926   : > { %v3094_v59 = vmul.f32 %v5629_v61, %v3082_v14 }
 0x928   : > { %3123 = vrot.lane.b32.xlu2 %v3094_v59, %s5262_s6 }
 0x92a   : > { %v3114_v37 = vpop.permute.xlu0 %3113 }
 0x92b   : > { %3149 = vst.msk [vmem:[#allocation2 + $0x8] sm:$0xff] %vm899_vm10, %v3114_v37 }
 0x92f   : > { %v2966_v30 = vpop.f32.mrf.mxu0 }
 0x930   : > { %v2967_v6 = vadd.f32 %v6478_v55, %v2966_v30 }
 0x932   : > { %v3116_v42 = vpop.permute.xlu1 %3115  ;;  %v3161_v27 = vld [vmem:[#allocation2 + $0x4] sm:$0xff]  ;;  %v2999_v24 = vmul.f32 0.044715, %v2967_v6  ;;  %v2987_v5 = vmul.f32 0.5, %v2967_v6 }
 0x933   : > { %3150 = vst.msk [vmem:[#allocation2 + $0x10] sm:$0xff] %vm899_vm10, %v3116_v42  ;;  %3186 = vrot.lane.b32.xlu1 %v3161_v27, %s5263_s7 }
 0x934   : > { %v3011_v52 = vmul.f32 %v2999_v24, %v2967_v6 }
 0x936   : > { %v3023_v2 = vmul.f32 %v3011_v52, %v2967_v6 }
 0x937   : > { %v2968_v51 = vpop.f32.mrf.mxu0 }
 0x938   : > { %v3035_v47 = vadd.f32 %v3023_v2, %v2967_v6  ;;  %v2969_v8 = vadd.f32 %v6478_v55, %v2968_v51 }
 0x93a   : > { %v3162_v1 = vld [vmem:[#allocation2 + $0xc] sm:$0xff]  ;;  %v3047_v60 = vmul.f32 0.7978846, %v3035_v47  ;;  %v3000_v58 = vmul.f32 0.044715, %v2969_v8  ;;  %v2988_v17 = vmul.f32 0.5, %v2969_v8 }
 0x93b   : > { %3188 = vrot.lane.b32.xlu2 %v3162_v1, %s5263_s7  ;;  %3235 = vrot.lane.b32.xlu1 %v3162_v1, %s5262_s6 }
 0x93c   : > { %v3012_v9 = vmul.f32 %v3000_v58, %v2969_v8  ;;  %5134 = vtanh.f32 %v3047_v60 }
 0x93e   : > { %v3024_v43 = vmul.f32 %v3012_v9, %v2969_v8 }
 0x93f   : > { %v2971_v21 = vpop.f32.mrf.mxu0 }
 0x940   : > { %v3036_v11 = vadd.f32 %v3024_v43, %v2969_v8  ;;  %v2972_v10 = vadd.f32 %v6478_v55, %v2971_v21 }
 0x942   : > { %v5135_v57 = vpop.eup %5134  ;;  %v3048_v25 = vmul.f32 0.7978846, %v3036_v11  ;;  %v3001_v13 = vmul.f32 0.044715, %v2972_v10  ;;  %v2989_v51 = vmul.f32 0.5, %v2972_v10 }
 0x943   : > { %v3071_v23 = vadd.f32 1.0, %v5135_v57 }
 0x944   : > { %v3013_v31 = vmul.f32 %v3001_v13, %v2972_v10  ;;  %5136 = vtanh.f32 %v3048_v25 }
 0x945   : > { %v3083_v18 = vmul.f32 %v3071_v23, %v2987_v5 }
 0x946   : > { %v3025_v22 = vmul.f32 %v3013_v31, %v2972_v10 }
 0x947   : > { %v2973_v15 = vpop.f32.mrf.mxu0  ;;  %v3095_v45 = vmul.f32 %v5596_v35, %v3083_v18 }
 0x948   : > { %v3037_v29 = vadd.f32 %v3025_v22, %v2972_v10  ;;  %v2974_v44 = vadd.f32 %v6478_v55, %v2973_v15 }
 0x949   : > { %3125 = vrot.lane.b32.xlu0 %v3095_v45, %s5262_s6 }
 0x94a   : > { %v5137_v34 = vpop.eup %5136  ;;  %v3049_v28 = vmul.f32 0.7978846, %v3037_v29  ;;  %v3002_v62 = vmul.f32 0.044715, %v2974_v44  ;;  %v2990_v13 = vmul.f32 0.5, %v2974_v44 }
 0x94b   : > { %v3072_v40 = vadd.f32 1.0, %v5137_v34 }
 0x94c   : > { %v3014_v36 = vmul.f32 %v3002_v62, %v2974_v44  ;;  %5138 = vtanh.f32 %v3049_v28 }
 0x94d   : > { %v3084_v14 = vmul.f32 %v3072_v40, %v2988_v17 }
 0x94e   : > { %v3026_v59 = vmul.f32 %v3014_v36, %v2974_v44 }
 0x94f   : > { %v2976_v37 = vpop.f32.mrf.mxu0  ;;  %v3096_v30 = vmul.f32 %v5612_v19, %v3084_v14 }
 0x950   : > { %v3038_v6 = vadd.f32 %v3026_v59, %v2974_v44  ;;  %v2977_v42 = vadd.f32 %v6478_v55, %v2976_v37 }
 0x951   : > { %3127 = vrot.lane.b32.xlu0 %v3096_v30, %s5262_s6 }
 0x952   : > { %v3118_v27 = vpop.permute.xlu2 %3117  ;;  %v5139_v24 = vpop.eup %5138  ;;  %v3050_v52 = vmul.f32 0.7978846, %v3038_v6  ;;  %v3003_v2 = vmul.f32 0.044715, %v2977_v42  ;;  %v2991_v15 = vmul.f32 0.5, %v2977_v42  ;;  %v4906_v6 = vld [vmem:[%s7038_s1 + $0x118] sm:$0xff] }
 0x953   : > { %3151 = vst.msk [vmem:[#allocation2 + $0x18] sm:$0xff] %vm899_vm10, %v3118_v27  ;;  %v3073_v47 = vadd.f32 1.0, %v5139_v24  ;;  %3371 = vmatpush.bf16.msra.mxu1 %v4906_v6  ;;  %4939 = vmatpush.bf16.msrb.mxu2 %v4906_v6  ;;  %v4904_v27 = vld [vmem:[%s7038_s1 + $0x108] sm:$0xff] }
 0x954   : > { %v3015_v8 = vmul.f32 %v3003_v2, %v2977_v42  ;;  %5140 = vtanh.f32 %v3050_v52  ;;  %v4903_v52 = vld [vmem:[%s7038_s1 + $0x100] sm:$0xff] }
 0x955   : > { %v3085_v1 = vmul.f32 %v3073_v47, %v2989_v51  ;;  %v4902_v51 = vld [vmem:[%s7038_s1 + $0xf8] sm:$0xff] }
 0x956   : > { %v3027_v60 = vmul.f32 %v3015_v8, %v2977_v42 }
 0x957   : > { %v2978_v58 = vpop.f32.mrf.mxu0  ;;  %v3097_v9 = vmul.f32 %v5622_v48, %v3085_v1  ;;  %v4901_v1 = vld [vmem:[%s7038_s1 + $0xf0] sm:$0xff] }
 0x958   : > { %v3039_v43 = vadd.f32 %v3027_v60, %v2977_v42  ;;  %v2979_v21 = vadd.f32 %v6478_v55, %v2978_v58  ;;  %v4905_v42 = vld [vmem:[%s7038_s1 + $0x110] sm:$0xff] }
 0x959   : > { %3129 = vrot.lane.b32.xlu0 %v3097_v9, %s5262_s6  ;;  %3372 = vmatpush.bf16.msra.mxu1 %v4905_v42 }
 0x95a   : > { %v3163_v11 = vld [vmem:[#allocation2 + $0x14] sm:$0xff]  ;;  %v5141_v57 = vpop.eup %5140  ;;  %v3051_v25 = vmul.f32 0.7978846, %v3039_v43  ;;  %v3004_v10 = vmul.f32 0.044715, %v2979_v21  ;;  %v2992_v14 = vmul.f32 0.5, %v2979_v21  ;;  %4940 = vmatpush.bf16.msrb.mxu2 %v4905_v42 }
 0x95b   : > { %3237 = vrot.lane.b32.xlu2 %v3163_v11, %s5262_s6  ;;  %3190 = vrot.lane.b32.xlu1 %v3163_v11, %s5263_s7  ;;  %v3074_v5 = vadd.f32 1.0, %v5141_v57 }
 0x95c   : > { %5142 = vtanh.f32 %v3051_v25  ;;  %v3016_v31 = vmul.f32 %v3004_v10, %v2979_v21 }
 0x95d   : > { %v3086_v23 = vmul.f32 %v3074_v5, %v2990_v13  ;;  %3373 = vmatpush.bf16.msra.mxu1 %v4904_v27 }
 0x95e   : > { %v3028_v22 = vmul.f32 %v3016_v31, %v2979_v21  ;;  %4941 = vmatpush.bf16.msrb.mxu2 %v4904_v27 }
 0x95f   : > { %v3098_v18 = vmul.f32 %v5697_v32, %v3086_v23 }
 0x960   : > { %v3040_v34 = vadd.f32 %v3028_v22, %v2979_v21 }
 0x961   : > { %3131 = vrot.lane.b32.xlu0 %v3098_v18, %s5262_s6  ;;  %3374 = vmatpush.bf16.msra.mxu1 %v4903_v52 }
 0x962   : > { %v5143_v55 = vpop.eup %5142  ;;  %v3052_v62 = vmul.f32 0.7978846, %v3040_v34  ;;  %4942 = vmatpush.bf16.msrb.mxu2 %v4903_v52 }
 0x963   : > { %v3075_v45 = vadd.f32 1.0, %v5143_v55 }
 0x964   : > { %5144 = vtanh.f32 %v3052_v62 }
 0x965   : > { %v3087_v29 = vmul.f32 %v3075_v45, %v2991_v15  ;;  %3375 = vmatpush.bf16.msra.mxu1 %v4902_v51 }
 0x966   : > { %4943 = vmatpush.bf16.msrb.mxu2 %v4902_v51  ;;  %v6603_v51 = vld [vmem:[%s7039_s2 + $0x7] ss:$0 sm:$0xff] }
 0x967   : > { %v3099_v28 = vmul.f32 %v5714_v54, %v3087_v29 }
 0x969   : > { %3133 = vrot.lane.b32.xlu0 %v3099_v28, %s5262_s6  ;;  %3376 = vmatpush.bf16.msra.mxu1 %v4901_v1 }
 0x96a   : > { %v5145_v17 = vpop.eup %5144  ;;  %4944 = vmatpush.bf16.msrb.mxu2 %v4901_v1 }
 0x96b   : > { %v3076_v40 = vadd.f32 1.0, %v5145_v17 }
 0x96d   : > { %v3088_v59 = vmul.f32 %v3076_v40, %v2992_v14 }
 0x96f   : > { %v3100_v37 = vmul.f32 %v5723_v4, %v3088_v59 }
 0x972   : > { %v3120_v44 = vpop.permute.xlu0 %3119 }
 0x973   : > { %3152 = vst.msk [vmem:[#allocation2 + $0x20] sm:$0xff] %vm899_vm10, %v3120_v44 }
 0x97a   : > { %v3164_v36 = vld [vmem:[#allocation2 + $0x1c] sm:$0xff] }
 0x97b   : > { %3239 = vrot.lane.b32.xlu1 %v3164_v36, %s5262_s6  ;;  %3192 = vrot.lane.b32.xlu2 %v3164_v36, %s5263_s7 }
 0x982   : > { %v3124_v30 = vpop.permute.xlu2 %3123 }
 0x983   : > { %3135 = vrot.lane.b32.xlu1 %v3100_v37, %s5262_s6  ;;  %3154 = vst.msk [vmem:[#allocation2 + $0x30] sm:$0xff] %vm899_vm10, %v3124_v30 }
 0x992   : > { %v3122_v24 = vpop.permute.xlu1 %3121 }
 0x993   : > { %3153 = vst.msk [vmem:[#allocation2 + $0x28] sm:$0xff] %vm899_vm10, %v3122_v24 }
 0x995   : > { %v3189_v2 = vpop.permute.xlu2 %3188 }
 0x996   : > { %3223 = vst.msk [vmem:[#allocation2 + $0x10] sm:$0xff] %vm984_vm15, %v3189_v2 }
 0x99a   : > { %v3166_v47 = vld [vmem:[#allocation2 + $0x2c] sm:$0xff]  ;;  %v3165_v8 = vld [vmem:[#allocation2 + $0x24] sm:$0xff] }
 0x99b   : > { %3196 = vrot.lane.b32.xlu0 %v3166_v47, %s5263_s7  ;;  %3243 = vrot.lane.b32.xlu1 %v3166_v47, %s5262_s6 }
 0x99c   : > { %3241 = vrot.lane.b32.xlu2 %v3165_v8, %s5262_s6 }
 0x9a4   : > { %3194 = vrot.lane.b32.xlu2 %v3165_v8, %s5263_s7 }
 0x9a5   : > { %v3187_v60 = vpop.permute.xlu1 %3186 }
 0x9a6   : > { %3222 = vst.msk [vmem:[#allocation2 + $0x8] sm:$0xff] %vm984_vm15, %v3187_v60 }
 0x9ad   : > { %v3236_v58 = vpop.permute.xlu1 %3235 }
 0x9ae   : > { %3271 = vst.msk [vmem:[#allocation2 + $0x8] sm:$0xff] %vm1045_vm0, %v3236_v58 }
 0x9b5   : > { %v3238_v9 = vpop.permute.xlu2 %3237  ;;  %v3283_v21 = vld [vmem:[#allocation2 + $0x8] sm:$0xff] }
 0x9b6   : > { %3272 = vst.msk [vmem:[#allocation2 + $0x10] sm:$0xff] %vm1045_vm0, %v3238_v9 }
 0x9bb   : > { %v3126_v43 = vpop.permute.xlu0 %3125 }
 0x9bc   : > { %3155 = vst.msk [vmem:[#allocation2 + $0x38] sm:$0xff] %vm899_vm10, %v3126_v43 }
 0x9bd   : > { %v3284_v11 = vld [vmem:[#allocation2 + $0x10] sm:$0xff] }
 0x9be   : > { %v3295_v57 = vpack.c.bf16 %v3284_v11, %v3283_v21 }
 0x9c0   : > { %4763 = vmatmul.msk.bf16.vlgmr.msra.gmra.mxu1 %vm628_vm12, %v3295_v57 }
 0x9c3   : > { %v3128_v25 = vpop.permute.xlu0 %3127  ;;  %v3167_v10 = vld [vmem:[#allocation2 + $0x34] sm:$0xff] }
 0x9c4   : > { %3156 = vst.msk [vmem:[#allocation2 + $0x40] sm:$0xff] %vm899_vm10, %v3128_v25  ;;  %3198 = vrot.lane.b32.xlu0 %v3167_v10, %s5263_s7  ;;  %3245 = vrot.lane.b32.xlu2 %v3167_v10, %s5262_s6 }
 0x9cb   : > { %v3130_v13 = vpop.permute.xlu0 %3129  ;;  %v3168_v5 = vld [vmem:[#allocation2 + $0x3c] sm:$0xff] }
 0x9cc   : > { %3157 = vst.msk [vmem:[#allocation2 + $0x48] sm:$0xff] %vm899_vm10, %v3130_v13  ;;  %3247 = vrot.lane.b32.xlu2 %v3168_v5, %s5262_s6  ;;  %3200 = vrot.lane.b32.xlu1 %v3168_v5, %s5263_s7 }
 0x9cd   : > { %v3191_v23 = vpop.permute.xlu1 %3190 }
 0x9ce   : > { %3224 = vst.msk [vmem:[#allocation2 + $0x18] sm:$0xff] %vm984_vm15, %v3191_v23 }
 0x9d3   : > { %v3132_v31 = vpop.permute.xlu0 %3131  ;;  %v3169_v18 = vld [vmem:[#allocation2 + $0x44] sm:$0xff] }
 0x9d4   : > { %3158 = vst.msk [vmem:[#allocation2 + $0x50] sm:$0xff] %vm899_vm10, %v3132_v31  ;;  %3202 = vrot.lane.b32.xlu1 %v3169_v18, %s5263_s7  ;;  %3249 = vrot.lane.b32.xlu0 %v3169_v18, %s5262_s6 }
 0x9d5   : > { %v3193_v55 = vpop.permute.xlu2 %3192 }
 0x9d6   : > { %3225 = vst.msk [vmem:[#allocation2 + $0x20] sm:$0xff] %vm984_vm15, %v3193_v55 }
 0x9db   : > { %v3134_v22 = vpop.permute.xlu0 %3133  ;;  %v3170_v15 = vld [vmem:[#allocation2 + $0x4c] sm:$0xff] }
 0x9dc   : > { %3159 = vst.msk [vmem:[#allocation2 + $0x58] sm:$0xff] %vm899_vm10, %v3134_v22  ;;  %3251 = vrot.lane.b32.xlu0 %v3170_v15, %s5262_s6  ;;  %3204 = vrot.lane.b32.xlu2 %v3170_v15, %s5263_s7 }
 0x9e3   : > { %v3171_v45 = vld [vmem:[#allocation2 + $0x54] sm:$0xff] }
 0x9e4   : > { %3206 = vrot.lane.b32.xlu2 %v3171_v45, %s5263_s7  ;;  %3253 = vrot.lane.b32.xlu1 %v3171_v45, %s5262_s6 }
 0x9ed   : > { %v3240_v29 = vpop.permute.xlu1 %3239 }
 0x9ee   : > { %3273 = vst.msk [vmem:[#allocation2 + $0x18] sm:$0xff] %vm1045_vm0, %v3240_v29 }
 0x9f5   : > { %v3136_v34 = vpop.permute.xlu1 %3135  ;;  %v3285_v40 = vld [vmem:[#allocation2 + $0x18] sm:$0xff] }
 0x9f6   : > { %3160 = vst.msk [vmem:[#allocation2 + $0x60] sm:$0xff] %vm899_vm10, %v3136_v34  ;;  %v3242_v28 = vpop.permute.xlu2 %3241 }
 0x9f7   : > { %3274 = vst.msk [vmem:[#allocation2 + $0x20] sm:$0xff] %vm1045_vm0, %v3242_v28 }
 0x9fd   : > { %v3172_v62 = vld [vmem:[#allocation2 + $0x5c] sm:$0xff]  ;;  %v3173_v44 = vld [vmem:[#allocation2 + $0x64] sm:$0xff] }
 0x9fe   : > { %3208 = vrot.lane.b32.xlu0 %v3172_v62, %s5263_s7  ;;  %3257 = vrot.lane.b32.xlu2 %v3173_v44, %s5262_s6  ;;  %v3195_v17 = vpop.permute.xlu2 %3194  ;;  %v3286_v36 = vld [vmem:[#allocation2 + $0x20] sm:$0xff] }
 0x9ff   : > { %3255 = vrot.lane.b32.xlu1 %v3172_v62, %s5262_s6  ;;  %3226 = vst.msk [vmem:[#allocation2 + $0x28] sm:$0xff] %vm984_vm15, %v3195_v17  ;;  %v3296_v14 = vpack.c.bf16 %v3286_v36, %v3285_v40 }
 0xa01   : > { %4764 = vmatmul.msk.bf16.gmra.mxu1 %vm628_vm12, %v3296_v14 }
 0xa0d   : > { %v3244_v59 = vpop.permute.xlu1 %3243  ;;  %v3197_v37 = vpop.permute.xlu0 %3196 }
 0xa0e   : > { %3275 = vst.msk [vmem:[#allocation2 + $0x28] sm:$0xff] %vm1045_vm0, %v3244_v59 }
 0xa0f   : > { %3227 = vst.msk [vmem:[#allocation2 + $0x30] sm:$0xff] %vm984_vm15, %v3197_v37 }
 0xa15   : > { %v3287_v6 = vld [vmem:[#allocation2 + $0x28] sm:$0xff] }
 0xa1e   : > { %v3246_v30 = vpop.permute.xlu2 %3245 }
 0xa1f   : > { %3276 = vst.msk [vmem:[#allocation2 + $0x30] sm:$0xff] %vm1045_vm0, %v3246_v30 }
 0xa26   : > { %v3288_v42 = vld [vmem:[#allocation2 + $0x30] sm:$0xff]  ;;  %v3248_v24 = vpop.permute.xlu2 %3247 }
 0xa27   : > { %v3297_v27 = vpack.c.bf16 %v3288_v42, %v3287_v6 }
 0xa29   : > { %4765 = vmatmul.msk.bf16.gmra.mxu1 %vm628_vm12, %v3297_v27 }
 0xa36   : > { %v3205_v52 = vpop.permute.xlu2 %3204  ;;  %v3199_v2 = vpop.permute.xlu0 %3198 }
 0xa37   : > { %3231 = vst.msk [vmem:[#allocation2 + $0x50] sm:$0xff] %vm984_vm15, %v3205_v52  ;;  %v4908_v52 = vld [vmem:[%s7038_s1 + $0x188] sm:$0xff] }
 0xa38   : > { %3228 = vst.msk [vmem:[#allocation2 + $0x38] sm:$0xff] %vm984_vm15, %v3199_v2  ;;  %3468 = vmatpush.bf16.msra.mxu2 %v4908_v52  ;;  %v4907_v2 = vld [vmem:[%s7038_s1 + $0x180] sm:$0xff] }
 0xa39   : > { %3277 = vst.msk [vmem:[#allocation2 + $0x38] sm:$0xff] %vm1045_vm0, %v3248_v24 }
 0xa3c   : > { %3469 = vmatpush.bf16.msra.mxu2 %v4907_v2 }
 0xa3d   : > { %v3378_v47 = vpop.f32.mrf.mxu1 }
 0xa3e   : > { %v3379_v8 = vadd.f32 %v6603_v51, %v3378_v47  ;;  %v3201_v1 = vpop.permute.xlu1 %3200  ;;  %v3207_v60 = vpop.permute.xlu2 %3206 }
 0xa3f   : > { %3229 = vst.msk [vmem:[#allocation2 + $0x40] sm:$0xff] %vm984_vm15, %v3201_v1 }
 0xa40   : > { %v6607_v58 = vadd.f32 %v3379_v8, %v6263_v33  ;;  %3232 = vst.msk [vmem:[#allocation2 + $0x58] sm:$0xff] %vm984_vm15, %v3207_v60  ;;  %v3289_v22 = vld [vmem:[#allocation2 + $0x38] sm:$0xff] }
 0xa42   : > { %v3509_v9 = vmul.f32 0.044715, %v6607_v58  ;;  %v3497_v28 = vmul.f32 0.5, %v6607_v58 }
 0xa44   : > { %v3521_v43 = vmul.f32 %v3509_v9, %v6607_v58 }
 0xa45   : > { %v3380_v21 = vpop.f32.mrf.mxu1 }
 0xa46   : > { %v3381_v11 = vadd.f32 %v6603_v51, %v3380_v21  ;;  %v3533_v57 = vmul.f32 %v3521_v43, %v6607_v58  ;;  %v3203_v25 = vpop.permute.xlu1 %3202  ;;  %v3250_v10 = vpop.permute.xlu0 %3249 }
 0xa47   : > { %3230 = vst.msk [vmem:[#allocation2 + $0x48] sm:$0xff] %vm984_vm15, %v3203_v25 }
 0xa48   : > { %v6616_v13 = vadd.f32 %v3381_v11, %v6272_v38  ;;  %v3545_v33 = vadd.f32 %v3533_v57, %v6607_v58  ;;  %3278 = vst.msk [vmem:[#allocation2 + $0x40] sm:$0xff] %vm1045_vm0, %v3250_v10 }
 0xa4a   : > { %v3557_v5 = vmul.f32 0.7978846, %v3545_v33  ;;  %v3510_v23 = vmul.f32 0.044715, %v6616_v13  ;;  %v3420_v44 = vpack.c.bf16 %v6616_v13, %v6607_v58  ;;  %v3498_v59 = vmul.f32 0.5, %v6616_v13 }
 0xa4c   : > { %5146 = vtanh.f32 %v3557_v5  ;;  %v3522_v31 = vmul.f32 %v3510_v23, %v6616_v13 }
 0xa4e   : > { %v3534_v18 = vmul.f32 %v3522_v31, %v6616_v13  ;;  %v3252_v55 = vpop.permute.xlu0 %3251 }
 0xa4f   : > { %3279 = vst.msk [vmem:[#allocation2 + $0x48] sm:$0xff] %vm1045_vm0, %v3252_v55  ;;  %v3290_v38 = vld [vmem:[#allocation2 + $0x40] sm:$0xff] }
 0xa50   : > { %v3546_v15 = vadd.f32 %v3534_v18, %v6616_v13  ;;  %v3298_v45 = vpack.c.bf16 %v3290_v38, %v3289_v22 }
 0xa52   : > { %v5147_v29 = vpop.eup %5146  ;;  %v3558_v34 = vmul.f32 0.7978846, %v3546_v15  ;;  %4766 = vmatmul.msk.bf16.gmra.mxu1 %vm628_vm12, %v3298_v45 }
 0xa53   : > { %v3581_v62 = vadd.f32 1.0, %v5147_v29 }
 0xa54   : > { %5148 = vtanh.f32 %v3558_v34 }
 0xa55   : > { %v3593_v17 = vmul.f32 %v3581_v62, %v3497_v28 }
 0xa56   : > { %v3254_v40 = vpop.permute.xlu1 %3253  ;;  %v3291_v6 = vld [vmem:[#allocation2 + $0x48] sm:$0xff] }
 0xa57   : > { %v3605_v36 = vmul.f32 %v5462_v20, %v3593_v17  ;;  %3280 = vst.msk [vmem:[#allocation2 + $0x50] sm:$0xff] %vm1045_vm0, %v3254_v40 }
 0xa58   : > { %v3258_v1 = vpop.permute.xlu2 %3257 }
 0xa59   : > { %3629 = vrot.lane.b32.xlu0 %v3605_v36, %s5262_s6 }
 0xa5a   : > { %v5149_v14 = vpop.eup %5148 }
 0xa5b   : > { %v3582_v37 = vadd.f32 1.0, %v5149_v14 }
 0xa5d   : > { %v3594_v30 = vmul.f32 %v3582_v37, %v3498_v59 }
 0xa5e   : > { %v3292_v42 = vld [vmem:[#allocation2 + $0x50] sm:$0xff] }
 0xa5f   : > { %v3606_v27 = vmul.f32 %v5490_v46, %v3594_v30  ;;  %v3299_v24 = vpack.c.bf16 %v3292_v42, %v3291_v6 }
 0xa61   : > { %3631 = vrot.lane.b32.xlu1 %v3606_v27, %s5262_s6 }
 0xa62   : > { %4767 = vmatmul.msk.bf16.gmra.mxu1 %vm628_vm12, %v3299_v24 }
 0xa70   : > { %v3209_v47 = vpop.permute.xlu0 %3208 }
 0xa71   : > { %v3256_v8 = vpop.permute.xlu1 %3255  ;;  %3233 = vst.msk [vmem:[#allocation2 + $0x60] sm:$0xff] %vm984_vm15, %v3209_v47 }
 0xa72   : > { %3281 = vst.msk [vmem:[#allocation2 + $0x58] sm:$0xff] %vm1045_vm0, %v3256_v8 }
 0xa73   : > { %3282 = vst.msk [vmem:[#allocation2 + $0x60] sm:$0xff] %vm1045_vm0, %v3258_v1 }
 0xa79   : > { %v3293_v60 = vld [vmem:[#allocation2 + $0x58] sm:$0xff] }
 0xa7a   : > { %v3294_v58 = vld [vmem:[#allocation2 + $0x60] sm:$0xff] }
 0xa7b   : > { %v3300_v9 = vpack.c.bf16 %v3294_v58, %v3293_v60 }
 0xa7d   : > { %4768 = vmatmul.msk.bf16.vlgmr.msrb.gmra.mxu2 %vm628_vm12, %v3300_v9 }
 0xa7e   : > { %v3383_v43 = vpop.f32.mrf.mxu1 }
 0xa7f   : > { %v3384_v21 = vadd.f32 %v6603_v51, %v3383_v43 }
 0xa81   : > { %v3410_v11 = vadd.f32 %v3384_v21, %v6295_v0 }
 0xa83   : > { %v3511_v57 = vmul.f32 0.044715, %v3410_v11  ;;  %v3499_v0 = vmul.f32 0.5, %v3410_v11 }
 0xa85   : > { %v3523_v25 = vmul.f32 %v3511_v57, %v3410_v11 }
 0xa86   : > { %v3385_v10 = vpop.f32.mrf.mxu1 }
 0xa87   : > { %v3386_v13 = vadd.f32 %v6603_v51, %v3385_v10  ;;  %v3535_v33 = vmul.f32 %v3523_v25, %v3410_v11 }
 0xa89   : > { %v3411_v5 = vadd.f32 %v3386_v13, %v6302_v26  ;;  %v3547_v23 = vadd.f32 %v3535_v33, %v3410_v11 }
 0xa8b   : > { %v3559_v31 = vmul.f32 0.7978846, %v3547_v23  ;;  %v3512_v18 = vmul.f32 0.044715, %v3411_v5  ;;  %v3421_v26 = vpack.c.bf16 %v3411_v5, %v3410_v11  ;;  %v3500_v17 = vmul.f32 0.5, %v3411_v5 }
 0xa8d   : > { %4777 = vmatmul.msk.bf16.vlgmr.msra.gmra.mxu2 %vm984_vm15, %v3420_v44  ;;  %5150 = vtanh.f32 %v3559_v31  ;;  %v3524_v55 = vmul.f32 %v3512_v18, %v3411_v5  ;;  %v6667_v31 = vld [vmem:[#allocation2] sm:$0xff] }
 0xa8f   : > { %v3536_v22 = vmul.f32 %v3524_v55, %v3411_v5 }
 0xa91   : > { %v3548_v38 = vadd.f32 %v3536_v22, %v3411_v5 }
 0xa93   : > { %v5151_v15 = vpop.eup %5150  ;;  %v3560_v45 = vmul.f32 0.7978846, %v3548_v38 }
 0xa94   : > { %v3583_v29 = vadd.f32 1.0, %v5151_v15 }
 0xa95   : > { %5152 = vtanh.f32 %v3560_v45 }
 0xa96   : > { %v3595_v34 = vmul.f32 %v3583_v29, %v3499_v0 }
 0xa98   : > { %v3607_v28 = vmul.f32 %v5457_v16, %v3595_v34 }
 0xa9a   : > { %3633 = vrot.lane.b32.xlu2 %v3607_v28, %s5262_s6 }
 0xa9b   : > { %v5153_v62 = vpop.eup %5152 }
 0xa9c   : > { %v3584_v44 = vadd.f32 1.0, %v5153_v62 }
 0xa9d   : > { %4778 = vmatmul.msk.bf16.gmra.mxu2 %vm984_vm15, %v3421_v26 }
 0xa9e   : > { %v3596_v40 = vmul.f32 %v3584_v44, %v3500_v17 }
 0xaa0   : > { %v3608_v36 = vmul.f32 %v5556_v63, %v3596_v40 }
 0xaa2   : > { %3635 = vrot.lane.b32.xlu0 %v3608_v36, %s5262_s6 }
 0xaa6   : > { %v3388_v14 = vpop.f32.mrf.mxu1 }
 0xaa7   : > { %v3389_v59 = vadd.f32 %v6603_v51, %v3388_v14 }
 0xaa9   : > { %v3412_v37 = vadd.f32 %v3389_v59, %v6317_v7 }
 0xaab   : > { %v3513_v30 = vmul.f32 0.044715, %v3412_v37  ;;  %v3501_v21 = vmul.f32 0.5, %v3412_v37 }
 0xaad   : > { %v3525_v6 = vmul.f32 %v3513_v30, %v3412_v37 }
 0xaae   : > { %v3390_v42 = vpop.f32.mrf.mxu1 }
 0xaaf   : > { %v3391_v27 = vadd.f32 %v6603_v51, %v3390_v42  ;;  %v3537_v24 = vmul.f32 %v3525_v6, %v3412_v37 }
 0xab1   : > { %v3413_v52 = vadd.f32 %v3391_v27, %v6324_v53  ;;  %v3549_v2 = vadd.f32 %v3537_v24, %v3412_v37 }
 0xab3   : > { %v3422_v47 = vpack.c.bf16 %v3413_v52, %v3412_v37  ;;  %v3561_v8 = vmul.f32 0.7978846, %v3549_v2  ;;  %v3514_v1 = vmul.f32 0.044715, %v3413_v52  ;;  %v3502_v10 = vmul.f32 0.5, %v3413_v52 }
 0xab5   : > { %4779 = vmatmul.msk.bf16.gmra.mxu2 %vm984_vm15, %v3422_v47  ;;  %5154 = vtanh.f32 %v3561_v8  ;;  %v3526_v60 = vmul.f32 %v3514_v1, %v3413_v52 }
 0xab7   : > { %v3538_v58 = vmul.f32 %v3526_v60, %v3413_v52 }
 0xab9   : > { %v3550_v9 = vadd.f32 %v3538_v58, %v3413_v52 }
 0xabb   : > { %v5155_v43 = vpop.eup %5154  ;;  %v3562_v7 = vmul.f32 0.7978846, %v3550_v9 }
 0xabc   : > { %v3585_v11 = vadd.f32 1.0, %v5155_v43 }
 0xabd   : > { %5156 = vtanh.f32 %v3562_v7 }
 0xabe   : > { %v3597_v57 = vmul.f32 %v3585_v11, %v3501_v21 }
 0xac0   : > { %v3609_v25 = vmul.f32 %v5511_v12, %v3597_v57 }
 0xac2   : > { %3637 = vrot.lane.b32.xlu1 %v3609_v25, %s5262_s6 }
 0xac3   : > { %v5157_v53 = vpop.eup %5156 }
 0xac4   : > { %v3586_v13 = vadd.f32 1.0, %v5157_v53 }
 0xac6   : > { %v3598_v33 = vmul.f32 %v3586_v13, %v3502_v10 }
 0xac8   : > { %v3610_v5 = vmul.f32 %v5629_v61, %v3598_v33 }
 0xaca   : > { %3639 = vrot.lane.b32.xlu2 %v3610_v5, %s5262_s6  ;;  %3703 = vrot.lane.b32.xlu1 %v6667_v31, %s5263_s7 }
 0xacb   : > { %v3630_v23 = vpop.permute.xlu0 %3629 }
 0xacc   : > { %3665 = vst.msk [vmem:[#allocation2 + $0x8] sm:$0xff] %vm899_vm10, %v3630_v23 }
 0xacf   : > { %v3393_v18 = vpop.f32.mrf.mxu1 }
 0xad0   : > { %v3394_v55 = vadd.f32 %v6603_v51, %v3393_v18 }
 0xad2   : > { %v3414_v22 = vadd.f32 %v3394_v55, %v6340_v3 }
 0xad3   : > { %v3632_v38 = vpop.permute.xlu1 %3631  ;;  %v3678_v15 = vld [vmem:[#allocation2 + $0x8] sm:$0xff] }
 0xad4   : > { %3666 = vst.msk [vmem:[#allocation2 + $0x10] sm:$0xff] %vm899_vm10, %v3632_v38  ;;  %3705 = vrot.lane.b32.xlu2 %v3678_v15, %s5263_s7  ;;  %v3515_v45 = vmul.f32 0.044715, %v3414_v22  ;;  %v3503_v24 = vmul.f32 0.5, %v3414_v22 }
 0xad6   : > { %v3527_v0 = vmul.f32 %v3515_v45, %v3414_v22 }
 0xad7   : > { %v3395_v29 = vpop.f32.mrf.mxu1 }
 0xad8   : > { %v3396_v34 = vadd.f32 %v6603_v51, %v3395_v29  ;;  %v3539_v28 = vmul.f32 %v3527_v0, %v3414_v22 }
 0xada   : > { %v3415_v26 = vadd.f32 %v3396_v34, %v6349_v56  ;;  %v3551_v62 = vadd.f32 %v3539_v28, %v3414_v22 }
 0xadb   : > { %v3679_v33 = vld [vmem:[#allocation2 + $0x10] sm:$0xff] }
 0xadc   : > { %v3423_v17 = vpack.c.bf16 %v3415_v26, %v3414_v22  ;;  %v3563_v44 = vmul.f32 0.7978846, %v3551_v62  ;;  %v3516_v40 = vmul.f32 0.044715, %v3415_v26  ;;  %v3504_v11 = vmul.f32 0.5, %v3415_v26 }
 0xade   : > { %4780 = vmatmul.msk.bf16.gmra.mxu2 %vm984_vm15, %v3423_v17  ;;  %5158 = vtanh.f32 %v3563_v44  ;;  %v3528_v3 = vmul.f32 %v3516_v40, %v3415_v26 }
 0xadf   : > { %v3398_v36 = vpop.f32.mrf.mxu1 }
 0xae0   : > { %v3399_v14 = vadd.f32 %v6603_v51, %v3398_v36  ;;  %v3540_v59 = vmul.f32 %v3528_v3, %v3415_v26 }
 0xae2   : > { %v3416_v37 = vadd.f32 %v3399_v14, %v6359_v49  ;;  %v3552_v30 = vadd.f32 %v3540_v59, %v3415_v26 }
 0xae4   : > { %v5159_v6 = vpop.eup %5158  ;;  %v3564_v42 = vmul.f32 0.7978846, %v3552_v30  ;;  %v3517_v27 = vmul.f32 0.044715, %v3416_v37  ;;  %v3505_v55 = vmul.f32 0.5, %v3416_v37 }
 0xae5   : > { %v3587_v56 = vadd.f32 1.0, %v5159_v6 }
 0xae6   : > { %5160 = vtanh.f32 %v3564_v42  ;;  %v3529_v52 = vmul.f32 %v3517_v27, %v3416_v37 }
 0xae7   : > { %v3400_v2 = vpop.f32.mrf.mxu1  ;;  %v3599_v47 = vmul.f32 %v3587_v56, %v3503_v24 }
 0xae8   : > { %v3401_v8 = vadd.f32 %v6603_v51, %v3400_v2  ;;  %v3541_v1 = vmul.f32 %v3529_v52, %v3416_v37 }
 0xae9   : > { %v3611_v60 = vmul.f32 %v5596_v35, %v3599_v47 }
 0xaea   : > { %v3417_v58 = vadd.f32 %v3401_v8, %v6369_v50  ;;  %v3553_v9 = vadd.f32 %v3541_v1, %v3416_v37 }
 0xaeb   : > { %3641 = vrot.lane.b32.xlu0 %v3611_v60, %s5262_s6 }
 0xaec   : > { %v5161_v49 = vpop.eup %5160  ;;  %v3424_v43 = vpack.c.bf16 %v3417_v58, %v3416_v37  ;;  %v3565_v7 = vmul.f32 0.7978846, %v3553_v9  ;;  %v3518_v21 = vmul.f32 0.044715, %v3417_v58  ;;  %v3506_v29 = vmul.f32 0.5, %v3417_v58  ;;  %v4914_v9 = vld [vmem:[%s7038_s1 + $0x148] sm:$0xff] }
 0xaed   : > { %v3588_v57 = vadd.f32 1.0, %v5161_v49  ;;  %3889 = vmatpush.bf16.msra.mxu3 %v4914_v9 }
 0xaee   : > { %4781 = vmatmul.msk.bf16.gmra.mxu2 %vm984_vm15, %v3424_v43  ;;  %5162 = vtanh.f32 %v3565_v7  ;;  %v3530_v25 = vmul.f32 %v3518_v21, %v3417_v58 }
 0xaef   : > { %v3600_v53 = vmul.f32 %v3588_v57, %v3504_v11 }
 0xaf0   : > { %v3542_v10 = vmul.f32 %v3530_v25, %v3417_v58 }
 0xaf1   : > { %v3612_v13 = vmul.f32 %v5612_v19, %v3600_v53 }
 0xaf2   : > { %v3554_v5 = vadd.f32 %v3542_v10, %v3417_v58 }
 0xaf3   : > { %3753 = vrot.lane.b32.xlu0 %v3679_v33, %s5262_s6  ;;  %3643 = vrot.lane.b32.xlu2 %v3612_v13, %s5262_s6  ;;  %v4913_v13 = vld [vmem:[%s7038_s1 + $0x140] sm:$0xff] }
 0xaf4   : > { %v5163_v50 = vpop.eup %5162  ;;  %v3634_v23 = vpop.permute.xlu2 %3633  ;;  %v3566_v18 = vmul.f32 0.7978846, %v3554_v5  ;;  %3890 = vmatpush.bf16.msra.mxu3 %v4913_v13 }
 0xaf5   : > { %3667 = vst.msk [vmem:[#allocation2 + $0x18] sm:$0xff] %vm899_vm10, %v3634_v23  ;;  %v3589_v22 = vadd.f32 1.0, %v5163_v50 }
 0xaf6   : > { %5164 = vtanh.f32 %v3566_v18 }
 0xaf7   : > { %v3601_v38 = vmul.f32 %v3589_v22, %v3505_v55 }
 0xaf9   : > { %v3613_v15 = vmul.f32 %v5622_v48, %v3601_v38  ;;  %v4912_v38 = vld [vmem:[%s7038_s1 + $0x138] sm:$0xff] }
 0xafa   : > { %3891 = vmatpush.bf16.msra.mxu3 %v4912_v38 }
 0xafb   : > { %3645 = vrot.lane.b32.xlu0 %v3613_v15, %s5262_s6 }
 0xafc   : > { %v5165_v45 = vpop.eup %5164  ;;  %v3680_v0 = vld [vmem:[#allocation2 + $0x18] sm:$0xff] }
 0xafd   : > { %3755 = vrot.lane.b32.xlu1 %v3680_v0, %s5262_s6  ;;  %3709 = vrot.lane.b32.xlu2 %v3680_v0, %s5263_s7  ;;  %v3590_v34 = vadd.f32 1.0, %v5165_v45  ;;  %v4911_v45 = vld [vmem:[%s7038_s1 + $0x130] sm:$0xff]  ;;  %v4910_v0 = vld [vmem:[%s7038_s1 + $0x128] sm:$0xff] }
 0xafe   : > { %3892 = vmatpush.bf16.msra.mxu3 %v4911_v45 }
 0xaff   : > { %v3602_v26 = vmul.f32 %v3590_v34, %v3506_v29 }
 0xb00   : > { %v3403_v28 = vpop.f32.mrf.mxu2 }
 0xb01   : > { %v3404_v62 = vadd.f32 %v6603_v51, %v3403_v28  ;;  %v3614_v44 = vmul.f32 %v5697_v32, %v3602_v26  ;;  %v4909_v28 = vld [vmem:[%s7038_s1 + $0x120] sm:$0xff] }
 0xb02   : > { %3893 = vmatpush.bf16.msra.mxu3 %v4910_v0 }
 0xb03   : > { %v3418_v17 = vadd.f32 %v3404_v62, %v6380_v41 }
 0xb05   : > { %3707 = vrot.lane.b32.xlu1 %v3679_v33, %s5263_s7  ;;  %3647 = vrot.lane.b32.xlu2 %v3614_v44, %s5262_s6  ;;  %v3519_v40 = vmul.f32 0.044715, %v3418_v17 }
 0xb06   : > { %3894 = vmatpush.bf16.msra.mxu3 %v4909_v28  ;;  %v6796_v28 = vld [vmem:[%s7039_s2 + $0x8] ss:$0 sm:$0xff] }
 0xb07   : > { %v3531_v36 = vmul.f32 %v3519_v40, %v3418_v17 }
 0xb08   : > { %v3405_v3 = vpop.f32.mrf.mxu2 }
 0xb09   : > { %v3406_v14 = vadd.f32 %v6603_v51, %v3405_v3  ;;  %v3543_v59 = vmul.f32 %v3531_v36, %v3418_v17  ;;  %v3507_v51 = vmul.f32 0.5, %v3418_v17 }
 0xb0b   : > { %v3419_v37 = vadd.f32 %v3406_v14, %v6392_v39  ;;  %v3555_v30 = vadd.f32 %v3543_v59, %v3418_v17 }
 0xb0d   : > { %v3425_v6 = vpack.c.bf16 %v3419_v37, %v3418_v17  ;;  %v3567_v42 = vmul.f32 0.7978846, %v3555_v30  ;;  %v3520_v39 = vmul.f32 0.044715, %v3419_v37  ;;  %v3508_v50 = vmul.f32 0.5, %v3419_v37 }
 0xb0f   : > { %4782 = vmatmul.msk.bf16.gmra.mxu2 %vm984_vm15, %v3425_v6  ;;  %5166 = vtanh.f32 %v3567_v42  ;;  %v3532_v1 = vmul.f32 %v3520_v39, %v3419_v37 }
 0xb10   : > { %v6701_v41 = vpop.f32.mrf.mxu2 }
 0xb11   : > { %v3544_v49 = vmul.f32 %v3532_v1, %v3419_v37  ;;  %v6770_v1 = vld [vmem:[#allocation2 + $0x68] sm:$0xff] }
 0xb13   : > { %v3556_v43 = vadd.f32 %v3544_v49, %v3419_v37 }
 0xb14   : > { %v3636_v27 = vpop.permute.xlu0 %3635 }
 0xb15   : > { %3668 = vst.msk [vmem:[#allocation2 + $0x20] sm:$0xff] %vm899_vm10, %v3636_v27  ;;  %v5167_v56 = vpop.eup %5166  ;;  %v3568_v11 = vmul.f32 0.7978846, %v3556_v43 }
 0xb16   : > { %v3591_v52 = vadd.f32 1.0, %v5167_v56 }
 0xb17   : > { %5168 = vtanh.f32 %v3568_v11 }
 0xb18   : > { %v6704_v24 = vpop.f32.mrf.mxu2  ;;  %v3603_v8 = vmul.f32 %v3591_v52, %v3507_v51 }
 0xb1a   : > { %v3615_v60 = vmul.f32 %v5714_v54, %v3603_v8 }
 0xb1c   : > { %v3681_v2 = vld [vmem:[#allocation2 + $0x20] sm:$0xff] }
 0xb1d   : > { %3757 = vrot.lane.b32.xlu0 %v3681_v2, %s5262_s6  ;;  %v5169_v53 = vpop.eup %5168 }
 0xb1e   : > { %v3592_v33 = vadd.f32 1.0, %v5169_v53 }
 0xb20   : > { %v3476_v47 = vpop.f32.mrf.mxu2  ;;  %v3604_v23 = vmul.f32 %v3592_v33, %v3508_v50 }
 0xb22   : > { %v3616_v22 = vmul.f32 %v5723_v4, %v3604_v23 }
 0xb24   : > { %v3640_v58 = vpop.permute.xlu2 %3639 }
 0xb25   : > { %3670 = vst.msk [vmem:[#allocation2 + $0x30] sm:$0xff] %vm899_vm10, %v3640_v58  ;;  %3649 = vrot.lane.b32.xlu0 %v3615_v60, %s5262_s6 }
 0xb28   : > { %v6715_v57 = vpop.f32.mrf.mxu2 }
 0xb2c   : > { %v3683_v7 = vld [vmem:[#allocation2 + $0x30] sm:$0xff] }
 0xb2d   : > { %3761 = vrot.lane.b32.xlu0 %v3683_v7, %s5262_s6 }
 0xb2e   : > { %v3706_v21 = vpop.permute.xlu2 %3705 }
 0xb2f   : > { %3740 = vst.msk [vmem:[#allocation2 + $0x10] sm:$0xff] %vm984_vm15, %v3706_v21 }
 0xb34   : > { %v3638_v25 = vpop.permute.xlu1 %3637 }
 0xb35   : > { %3669 = vst.msk [vmem:[#allocation2 + $0x28] sm:$0xff] %vm899_vm10, %v3638_v25  ;;  %3715 = vrot.lane.b32.xlu0 %v3683_v7, %s5263_s7 }
 0xb38   : > { %v6719_v10 = vpop.f32.mrf.mxu2 }
 0xb3c   : > { %v3682_v5 = vld [vmem:[#allocation2 + $0x28] sm:$0xff]  ;;  %v3704_v55 = vpop.permute.xlu1 %3703 }
 0xb3d   : > { %3759 = vrot.lane.b32.xlu1 %v3682_v5, %s5262_s6  ;;  %3713 = vrot.lane.b32.xlu2 %v3682_v5, %s5263_s7  ;;  %3739 = vst.msk [vmem:[#allocation2 + $0x8] sm:$0xff] %vm984_vm15, %v3704_v55 }
 0xb40   : > { %v3482_v18 = vpop.f32.mrf.mxu2 }
 0xb45   : > { %3651 = vrot.lane.b32.xlu2 %v3616_v22, %s5262_s6  ;;  %3711 = vrot.lane.b32.xlu1 %v3681_v2, %s5263_s7 }
 0xb4d   : > { %v3644_v15 = vpop.permute.xlu2 %3643 }
 0xb4e   : > { %3672 = vst.msk [vmem:[#allocation2 + $0x40] sm:$0xff] %vm899_vm10, %v3644_v15 }
 0xb55   : > { %v3685_v29 = vld [vmem:[#allocation2 + $0x40] sm:$0xff] }
 0xb56   : > { %3765 = vrot.lane.b32.xlu2 %v3685_v29, %s5262_s6 }
 0xb57   : > { %v3710_v34 = vpop.permute.xlu2 %3709 }
 0xb58   : > { %3742 = vst.msk [vmem:[#allocation2 + $0x20] sm:$0xff] %vm984_vm15, %v3710_v34 }
 0xb5d   : > { %v3642_v26 = vpop.permute.xlu0 %3641 }
 0xb5e   : > { %3671 = vst.msk [vmem:[#allocation2 + $0x38] sm:$0xff] %vm899_vm10, %v3642_v26 }
 0xb5f   : > { %v3648_v62 = vpop.permute.xlu2 %3647 }
 0xb60   : > { %3674 = vst.msk [vmem:[#allocation2 + $0x50] sm:$0xff] %vm899_vm10, %v3648_v62 }
 0xb61   : > { %v6747_v17 = vpop.f32.mrf.mxu2 }
 0xb65   : > { %v3754_v44 = vpop.permute.xlu0 %3753  ;;  %v3684_v40 = vld [vmem:[#allocation2 + $0x38] sm:$0xff] }
 0xb66   : > { %3789 = vst.msk [vmem:[#allocation2 + $0x8] sm:$0xff] %vm1045_vm0, %v3754_v44  ;;  %3763 = vrot.lane.b32.xlu1 %v3684_v40, %s5262_s6 }
 0xb67   : > { %v3687_v56 = vld [vmem:[#allocation2 + $0x50] sm:$0xff] }
 0xb69   : > { %v6751_v3 = vpop.f32.mrf.mxu2 }
 0xb6d   : > { %v3646_v36 = vpop.permute.xlu0 %3645  ;;  %v3801_v6 = vld [vmem:[#allocation2 + $0x8] sm:$0xff] }
 0xb6e   : > { %3673 = vst.msk [vmem:[#allocation2 + $0x48] sm:$0xff] %vm899_vm10, %v3646_v36  ;;  %3717 = vrot.lane.b32.xlu1 %v3684_v40, %s5263_s7 }
 0xb6f   : > { %v3756_v14 = vpop.permute.xlu1 %3755 }
 0xb70   : > { %3790 = vst.msk [vmem:[#allocation2 + $0x10] sm:$0xff] %vm1045_vm0, %v3756_v14 }
 0xb71   : > { %v3489_v59 = vpop.f32.mrf.mxu2 }
 0xb75   : > { %v3686_v37 = vld [vmem:[#allocation2 + $0x48] sm:$0xff] }
 0xb76   : > { %3719 = vrot.lane.b32.xlu1 %v3685_v29, %s5263_s7  ;;  %3721 = vrot.lane.b32.xlu2 %v3686_v37, %s5263_s7 }
 0xb77   : > { %3767 = vrot.lane.b32.xlu0 %v3686_v37, %s5262_s6  ;;  %v3708_v30 = vpop.permute.xlu1 %3707  ;;  %v3802_v42 = vld [vmem:[#allocation2 + $0x10] sm:$0xff] }
 0xb78   : > { %3741 = vst.msk [vmem:[#allocation2 + $0x18] sm:$0xff] %vm984_vm15, %v3708_v30  ;;  %v3813_v27 = vpack.c.bf16 %v3802_v42, %v3801_v6 }
 0xb79   : > { %v6763_v52 = vpop.f32.mrf.mxu2 }
 0xb7a   : > { %4807 = vmatmul.msk.bf16.vlgmr.msra.gmra.mxu3 %vm628_vm12, %v3813_v27 }
 0xb7e   : > { %3723 = vrot.lane.b32.xlu2 %v3687_v56, %s5263_s7 }
 0xb7f   : > { %3769 = vrot.lane.b32.xlu0 %v3687_v56, %s5262_s6 }
 0xb86   : > { %3775 = vrot.lane.b32.xlu2 %v6770_v1, %s5262_s6 }
 0xb8f   : > { %v3758_v2 = vpop.permute.xlu0 %3757 }
 0xb90   : > { %3791 = vst.msk [vmem:[#allocation2 + $0x18] sm:$0xff] %vm1045_vm0, %v3758_v2 }
 0xb92   : > { %v6766_v51 = vpop.f32.mrf.mxu2 }
 0xb97   : > { %v3714_v39 = vpop.permute.xlu2 %3713  ;;  %v3650_v47 = vpop.permute.xlu0 %3649  ;;  %v3803_v25 = vld [vmem:[#allocation2 + $0x18] sm:$0xff] }
 0xb98   : > { %3744 = vst.msk [vmem:[#allocation2 + $0x30] sm:$0xff] %vm984_vm15, %v3714_v39 }
 0xb99   : > { %3675 = vst.msk [vmem:[#allocation2 + $0x58] sm:$0xff] %vm899_vm10, %v3650_v47 }
 0xb9a   : > { %v3495_v8 = vpop.f32.mrf.mxu2 }
 0xb9f   : > { %v3652_v60 = vpop.permute.xlu2 %3651  ;;  %v3762_v58 = vpop.permute.xlu0 %3761 }
 0xba0   : > { %3676 = vst.msk [vmem:[#allocation2 + $0x60] sm:$0xff] %vm899_vm10, %v3652_v60  ;;  %v3688_v9 = vld [vmem:[#allocation2 + $0x58] sm:$0xff] }
 0xba1   : > { %3725 = vrot.lane.b32.xlu0 %v3688_v9, %s5263_s7  ;;  %3771 = vrot.lane.b32.xlu1 %v3688_v9, %s5262_s6 }
 0xba7   : > { %v3716_v49 = vpop.permute.xlu0 %3715  ;;  %v3689_v43 = vld [vmem:[#allocation2 + $0x60] sm:$0xff] }
 0xba8   : > { %3745 = vst.msk [vmem:[#allocation2 + $0x38] sm:$0xff] %vm984_vm15, %v3716_v49 }
 0xba9   : > { %3773 = vrot.lane.b32.xlu1 %v3689_v43, %s5262_s6 }
 0xbaf   : > { %v3760_v7 = vpop.permute.xlu1 %3759 }
 0xbb0   : > { %3792 = vst.msk [vmem:[#allocation2 + $0x20] sm:$0xff] %vm1045_vm0, %v3760_v7  ;;  %v3766_v21 = vpop.permute.xlu2 %3765 }
 0xbb1   : > { %3795 = vst.msk [vmem:[#allocation2 + $0x38] sm:$0xff] %vm1045_vm0, %v3766_v21 }
 0xbb7   : > { %v3712_v11 = vpop.permute.xlu1 %3711  ;;  %v3804_v53 = vld [vmem:[#allocation2 + $0x20] sm:$0xff] }
 0xbb8   : > { %3743 = vst.msk [vmem:[#allocation2 + $0x28] sm:$0xff] %vm984_vm15, %v3712_v11  ;;  %v3814_v13 = vpack.c.bf16 %v3804_v53, %v3803_v25  ;;  %v3807_v0 = vld [vmem:[#allocation2 + $0x38] sm:$0xff] }
 0xbb9   : > { %3793 = vst.msk [vmem:[#allocation2 + $0x28] sm:$0xff] %vm1045_vm0, %v3762_v58 }
 0xbba   : > { %4808 = vmatmul.msk.bf16.gmra.mxu3 %vm628_vm12, %v3814_v13 }
 0xbc0   : > { %v3805_v18 = vld [vmem:[#allocation2 + $0x28] sm:$0xff] }
 0xbd0   : > { %v3722_v33 = vpop.permute.xlu2 %3721 }
 0xbd1   : > { %3748 = vst.msk [vmem:[#allocation2 + $0x50] sm:$0xff] %vm984_vm15, %v3722_v33 }
 0xbd8   : > { %v3764_v5 = vpop.permute.xlu1 %3763  ;;  %v3724_v50 = vpop.permute.xlu2 %3723 }
 0xbd9   : > { %3794 = vst.msk [vmem:[#allocation2 + $0x30] sm:$0xff] %vm1045_vm0, %v3764_v5 }
 0xbda   : > { %3749 = vst.msk [vmem:[#allocation2 + $0x58] sm:$0xff] %vm984_vm15, %v3724_v50 }
 0xbe0   : > { %v3718_v23 = vpop.permute.xlu1 %3717  ;;  %v3806_v55 = vld [vmem:[#allocation2 + $0x30] sm:$0xff]  ;;  %v3776_v60 = vpop.permute.xlu2 %3775 }
 0xbe1   : > { %3746 = vst.msk [vmem:[#allocation2 + $0x40] sm:$0xff] %vm984_vm15, %v3718_v23  ;;  %v3815_v22 = vpack.c.bf16 %v3806_v55, %v3805_v18 }
 0xbe3   : > { %4809 = vmatmul.msk.bf16.gmra.mxu3 %vm628_vm12, %v3815_v22 }
 0xbe8   : > { %v3720_v38 = vpop.permute.xlu1 %3719 }
 0xbe9   : > { %3747 = vst.msk [vmem:[#allocation2 + $0x48] sm:$0xff] %vm984_vm15, %v3720_v38  ;;  %v3768_v15 = vpop.permute.xlu0 %3767 }
 0xbea   : > { %3796 = vst.msk [vmem:[#allocation2 + $0x40] sm:$0xff] %vm1045_vm0, %v3768_v15 }
 0xbf1   : > { %v3770_v45 = vpop.permute.xlu0 %3769  ;;  %v3808_v29 = vld [vmem:[#allocation2 + $0x40] sm:$0xff] }
 0xbf2   : > { %3797 = vst.msk [vmem:[#allocation2 + $0x48] sm:$0xff] %vm1045_vm0, %v3770_v45  ;;  %v3816_v34 = vpack.c.bf16 %v3808_v29, %v3807_v0 }
 0xbf4   : > { %4810 = vmatmul.msk.bf16.gmra.mxu3 %vm628_vm12, %v3816_v34 }
 0xbf9   : > { %v3809_v53 = vld [vmem:[#allocation2 + $0x48] sm:$0xff] }
 0xbfd   : > { %v3896_v26 = vpop.f32.mrf.mxu3 }
 0xbfe   : > { %v3897_v62 = vadd.f32 %v6796_v28, %v3896_v26 }
 0xc00   : > { %v3938_v44 = vmul.f32 0.044715, %v3897_v62  ;;  %v3926_v47 = vmul.f32 0.5, %v3897_v62 }
 0xc02   : > { %v3950_v40 = vmul.f32 %v3938_v44, %v3897_v62 }
 0xc04   : > { %v3962_v36 = vmul.f32 %v3950_v40, %v3897_v62 }
 0xc05   : > { %v3898_v14 = vpop.f32.mrf.mxu3 }
 0xc06   : > { %v3974_v59 = vadd.f32 %v3962_v36, %v3897_v62  ;;  %v3899_v37 = vadd.f32 %v6796_v28, %v3898_v14 }
 0xc08   : > { %v3986_v30 = vmul.f32 0.7978846, %v3974_v59  ;;  %v3939_v6 = vmul.f32 0.044715, %v3899_v37  ;;  %v3927_v21 = vmul.f32 0.5, %v3899_v37 }
 0xc0a   : > { %v3951_v42 = vmul.f32 %v3939_v6, %v3899_v37  ;;  %5170 = vtanh.f32 %v3986_v30 }
 0xc0c   : > { %v3963_v27 = vmul.f32 %v3951_v42, %v3899_v37 }
 0xc0e   : > { %v3975_v56 = vadd.f32 %v3963_v27, %v3899_v37 }
 0xc10   : > { %v5171_v2 = vpop.eup %5170  ;;  %v3987_v39 = vmul.f32 0.7978846, %v3975_v56 }
 0xc11   : > { %v4010_v8 = vadd.f32 1.0, %v5171_v2 }
 0xc12   : > { %5172 = vtanh.f32 %v3987_v39 }
 0xc13   : > { %v3772_v58 = vpop.permute.xlu1 %3771  ;;  %v3726_v9 = vpop.permute.xlu0 %3725  ;;  %v4022_v49 = vmul.f32 %v4010_v8, %v3926_v47 }
 0xc14   : > { %3798 = vst.msk [vmem:[#allocation2 + $0x50] sm:$0xff] %vm1045_vm0, %v3772_v58 }
 0xc15   : > { %3750 = vst.msk [vmem:[#allocation2 + $0x60] sm:$0xff] %vm984_vm15, %v3726_v9  ;;  %v4034_v43 = vmul.f32 %v5462_v20, %v4022_v49 }
 0xc16   : > { %3800 = vst.msk [vmem:[#allocation2 + $0x60] sm:$0xff] %vm1045_vm0, %v3776_v60 }
 0xc17   : > { %4058 = vrot.lane.b32.xlu0 %v4034_v43, %s5262_s6 }
 0xc18   : > { %v5173_v7 = vpop.eup %5172 }
 0xc19   : > { %v4011_v11 = vadd.f32 1.0, %v5173_v7 }
 0xc1b   : > { %v3774_v25 = vpop.permute.xlu1 %3773  ;;  %v3810_v13 = vld [vmem:[#allocation2 + $0x50] sm:$0xff]  ;;  %v4023_v33 = vmul.f32 %v4011_v11, %v3927_v21 }
 0xc1c   : > { %3799 = vst.msk [vmem:[#allocation2 + $0x58] sm:$0xff] %vm1045_vm0, %v3774_v25  ;;  %v3817_v5 = vpack.c.bf16 %v3810_v13, %v3809_v53 }
 0xc1d   : > { %v4035_v50 = vmul.f32 %v5490_v46, %v4023_v33  ;;  %v3812_v23 = vld [vmem:[#allocation2 + $0x60] sm:$0xff] }
 0xc1e   : > { %4811 = vmatmul.msk.bf16.gmra.mxu3 %vm628_vm12, %v3817_v5 }
 0xc1f   : > { %4060 = vrot.lane.b32.xlu1 %v4035_v50, %s5262_s6 }
 0xc23   : > { %v3811_v20 = vld [vmem:[#allocation2 + $0x58] sm:$0xff] }
 0xc24   : > { %v3818_v18 = vpack.c.bf16 %v3812_v23, %v3811_v20 }
 0xc2e   : > { %4812 = vmatmul.msk.bf16.gmra.mxu3 %vm628_vm12, %v3818_v18 }
 0xc3d   : > { %v3901_v55 = vpop.f32.mrf.mxu3 }
 0xc3e   : > { %v3902_v22 = vadd.f32 %v6796_v28, %v3901_v55 }
 0xc40   : > { %v3940_v38 = vmul.f32 0.044715, %v3902_v22  ;;  %v3928_v59 = vmul.f32 0.5, %v3902_v22 }
 0xc42   : > { %v3952_v15 = vmul.f32 %v3940_v38, %v3902_v22 }
 0xc44   : > { %v3964_v45 = vmul.f32 %v3952_v15, %v3902_v22 }
 0xc45   : > { %v3903_v0 = vpop.f32.mrf.mxu3 }
 0xc46   : > { %v3976_v29 = vadd.f32 %v3964_v45, %v3902_v22  ;;  %v3904_v34 = vadd.f32 %v6796_v28, %v3903_v0 }
 0xc48   : > { %v3988_v46 = vmul.f32 0.7978846, %v3976_v29  ;;  %v3941_v26 = vmul.f32 0.044715, %v3904_v34  ;;  %v3929_v27 = vmul.f32 0.5, %v3904_v34 }
 0xc4a   : > { %v3953_v62 = vmul.f32 %v3941_v26, %v3904_v34  ;;  %5174 = vtanh.f32 %v3988_v46 }
 0xc4c   : > { %v3965_v44 = vmul.f32 %v3953_v62, %v3904_v34 }
 0xc4e   : > { %v3977_v40 = vadd.f32 %v3965_v44, %v3904_v34 }
 0xc50   : > { %v5175_v36 = vpop.eup %5174  ;;  %v3989_v14 = vmul.f32 0.7978846, %v3977_v40 }
 0xc51   : > { %v4012_v37 = vadd.f32 1.0, %v5175_v36 }
 0xc52   : > { %5176 = vtanh.f32 %v3989_v14 }
 0xc53   : > { %v4024_v30 = vmul.f32 %v4012_v37, %v3928_v59 }
 0xc55   : > { %v4036_v6 = vmul.f32 %v5457_v16, %v4024_v30 }
 0xc57   : > { %4062 = vrot.lane.b32.xlu2 %v4036_v6, %s5262_s6 }
 0xc58   : > { %v5177_v42 = vpop.eup %5176 }
 0xc59   : > { %v4013_v56 = vadd.f32 1.0, %v5177_v42 }
 0xc5b   : > { %v4025_v2 = vmul.f32 %v4013_v56, %v3929_v27 }
 0xc5d   : > { %v4037_v39 = vmul.f32 %v5556_v63, %v4025_v2 }
 0xc5f   : > { %4064 = vrot.lane.b32.xlu0 %v4037_v39, %s5262_s6 }
 0xc66   : > { %v3906_v47 = vpop.f32.mrf.mxu3 }
 0xc67   : > { %v3907_v8 = vadd.f32 %v6796_v28, %v3906_v47 }
 0xc69   : > { %v3942_v60 = vmul.f32 0.044715, %v3907_v8  ;;  %v3930_v20 = vmul.f32 0.5, %v3907_v8 }
 0xc6b   : > { %v3954_v58 = vmul.f32 %v3942_v60, %v3907_v8 }
 0xc6d   : > { %v3966_v9 = vmul.f32 %v3954_v58, %v3907_v8 }
 0xc6e   : > { %v3908_v49 = vpop.f32.mrf.mxu3 }
 0xc6f   : > { %v3978_v43 = vadd.f32 %v3966_v9, %v3907_v8  ;;  %v3909_v16 = vadd.f32 %v6796_v28, %v3908_v49 }
 0xc71   : > { %v3990_v7 = vmul.f32 0.7978846, %v3978_v43  ;;  %v3943_v21 = vmul.f32 0.044715, %v3909_v16  ;;  %v3931_v26 = vmul.f32 0.5, %v3909_v16 }
 0xc73   : > { %v3955_v11 = vmul.f32 %v3943_v21, %v3909_v16  ;;  %5178 = vtanh.f32 %v3990_v7 }
 0xc75   : > { %v3967_v25 = vmul.f32 %v3955_v11, %v3909_v16 }
 0xc77   : > { %v3979_v53 = vadd.f32 %v3967_v25, %v3909_v16  ;;  %v3911_v13 = vpop.f32.mrf.mxu3 }
 0xc78   : > { %v3912_v63 = vadd.f32 %v6796_v28, %v3911_v13 }
 0xc79   : > { %v5179_v33 = vpop.eup %5178  ;;  %v3991_v5 = vmul.f32 0.7978846, %v3979_v53 }
 0xc7a   : > { %v3944_v50 = vmul.f32 0.044715, %v3912_v63  ;;  %v4014_v23 = vadd.f32 1.0, %v5179_v33  ;;  %v3932_v6 = vmul.f32 0.5, %v3912_v63 }
 0xc7b   : > { %5180 = vtanh.f32 %v3991_v5 }
 0xc7c   : > { %v3956_v18 = vmul.f32 %v3944_v50, %v3912_v63  ;;  %v4026_v55 = vmul.f32 %v4014_v23, %v3930_v20 }
 0xc7e   : > { %v3968_v22 = vmul.f32 %v3956_v18, %v3912_v63  ;;  %v4038_v38 = vmul.f32 %v5511_v12, %v4026_v55 }
 0xc7f   : > { %v3913_v15 = vpop.f32.mrf.mxu3 }
 0xc80   : > { %v3980_v45 = vadd.f32 %v3968_v22, %v3912_v63  ;;  %v3914_v0 = vadd.f32 %v6796_v28, %v3913_v15  ;;  %4066 = vrot.lane.b32.xlu1 %v4038_v38, %s5262_s6 }
 0xc81   : > { %v5181_v29 = vpop.eup %5180 }
 0xc82   : > { %v3992_v34 = vmul.f32 0.7978846, %v3980_v45  ;;  %v3945_v46 = vmul.f32 0.044715, %v3914_v0  ;;  %v4015_v62 = vadd.f32 1.0, %v5181_v29 }
 0xc84   : > { %v3957_v44 = vmul.f32 %v3945_v46, %v3914_v0  ;;  %v4027_v40 = vmul.f32 %v4015_v62, %v3931_v26  ;;  %5182 = vtanh.f32 %v3992_v34 }
 0xc86   : > { %v3969_v36 = vmul.f32 %v3957_v44, %v3914_v0  ;;  %v4039_v14 = vmul.f32 %v5629_v61, %v4027_v40 }
 0xc88   : > { %v3981_v59 = vadd.f32 %v3969_v36, %v3914_v0  ;;  %4068 = vrot.lane.b32.xlu2 %v4039_v14, %s5262_s6  ;;  %4132 = vrot.lane.b32.xlu1 %v6667_v31, %s5263_s7  ;;  %v3933_v31 = vmul.f32 0.5, %v3914_v0 }
 0xc89   : > { %v4059_v12 = vpop.permute.xlu0 %4058 }
 0xc8a   : > { %v5183_v37 = vpop.eup %5182  ;;  %v3993_v30 = vmul.f32 0.7978846, %v3981_v59  ;;  %4094 = vst.msk [vmem:[#allocation2 + $0x8] sm:$0xff] %vm899_vm10, %v4059_v12 }
 0xc8b   : > { %v4016_v42 = vadd.f32 1.0, %v5183_v37 }
 0xc8c   : > { %5184 = vtanh.f32 %v3993_v30 }
 0xc8d   : > { %v4028_v27 = vmul.f32 %v4016_v42, %v3932_v6 }
 0xc8f   : > { %v4040_v56 = vmul.f32 %v5596_v35, %v4028_v27 }
 0xc91   : > { %4070 = vrot.lane.b32.xlu0 %v4040_v56, %s5262_s6  ;;  %v4061_v61 = vpop.permute.xlu1 %4060  ;;  %v4107_v2 = vld [vmem:[#allocation2 + $0x8] sm:$0xff] }
 0xc92   : > { %v5185_v39 = vpop.eup %5184  ;;  %4095 = vst.msk [vmem:[#allocation2 + $0x10] sm:$0xff] %vm899_vm10, %v4061_v61  ;;  %4134 = vrot.lane.b32.xlu2 %v4107_v2, %s5263_s7 }
 0xc93   : > { %v4017_v47 = vadd.f32 1.0, %v5185_v39 }
 0xc95   : > { %v4029_v8 = vmul.f32 %v4017_v47, %v3933_v31 }
 0xc97   : > { %v4041_v60 = vmul.f32 %v5612_v19, %v4029_v8 }
 0xc99   : > { %v4108_v58 = vld [vmem:[#allocation2 + $0x10] sm:$0xff] }
 0xc9a   : > { %4182 = vrot.lane.b32.xlu0 %v4108_v58, %s5262_s6  ;;  %4072 = vrot.lane.b32.xlu2 %v4041_v60, %s5262_s6 }
 0xca1   : > { %v3916_v35 = vpop.f32.mrf.mxu3 }
 0xca2   : > { %v3917_v9 = vadd.f32 %v6796_v28, %v3916_v35 }
 0xca4   : > { %v3946_v49 = vmul.f32 0.044715, %v3917_v9  ;;  %v3934_v23 = vmul.f32 0.5, %v3917_v9 }
 0xca6   : > { %v3958_v43 = vmul.f32 %v3946_v49, %v3917_v9 }
 0xca8   : > { %v3970_v16 = vmul.f32 %v3958_v43, %v3917_v9 }
 0xca9   : > { %v3918_v7 = vpop.f32.mrf.mxu3 }
 0xcaa   : > { %v3982_v21 = vadd.f32 %v3970_v16, %v3917_v9  ;;  %v3919_v11 = vadd.f32 %v6796_v28, %v3918_v7  ;;  %v4920_v16 = vld [vmem:[%s7038_s1 + $0x178] sm:$0xff]  ;;  %v4919_v7 = vld [vmem:[%s7038_s1 + $0x170] sm:$0xff] }
 0xcab   : > { %4318 = vmatpush.bf16.msra.mxu0 %v4920_v16 }
 0xcac   : > { %v3994_v25 = vmul.f32 0.7978846, %v3982_v21  ;;  %v3947_v53 = vmul.f32 0.044715, %v3919_v11  ;;  %v3935_v29 = vmul.f32 0.5, %v3919_v11 }
 0xcae   : > { %v3959_v13 = vmul.f32 %v3947_v53, %v3919_v11  ;;  %5186 = vtanh.f32 %v3994_v25  ;;  %v4918_v25 = vld [vmem:[%s7038_s1 + $0x168] sm:$0xff]  ;;  %v4917_v53 = vld [vmem:[%s7038_s1 + $0x160] sm:$0xff] }
 0xcaf   : > { %4319 = vmatpush.bf16.msra.mxu0 %v4919_v7 }
 0xcb0   : > { %v3971_v19 = vmul.f32 %v3959_v13, %v3919_v11 }
 0xcb1   : > { %v4063_v63 = vpop.permute.xlu2 %4062  ;;  %v3921_v20 = vpop.f32.mrf.mxu3 }
 0xcb2   : > { %v3983_v33 = vadd.f32 %v3971_v19, %v3919_v11  ;;  %4096 = vst.msk [vmem:[#allocation2 + $0x18] sm:$0xff] %vm899_vm10, %v4063_v63  ;;  %v3922_v55 = vadd.f32 %v6796_v28, %v3921_v20  ;;  %v4916_v63 = vld [vmem:[%s7038_s1 + $0x158] sm:$0xff] }
 0xcb3   : > { %4320 = vmatpush.bf16.msra.mxu0 %v4918_v25 }
 0xcb4   : > { %v5187_v5 = vpop.eup %5186  ;;  %v3995_v50 = vmul.f32 0.7978846, %v3983_v33  ;;  %v3948_v45 = vmul.f32 0.044715, %v3922_v55  ;;  %v4915_v33 = vld [vmem:[%s7038_s1 + $0x150] sm:$0xff] }
 0xcb5   : > { %v4018_v18 = vadd.f32 1.0, %v5187_v5 }
 0xcb6   : > { %5188 = vtanh.f32 %v3995_v50  ;;  %v3960_v46 = vmul.f32 %v3948_v45, %v3922_v55 }
 0xcb7   : > { %v4030_v22 = vmul.f32 %v4018_v18, %v3934_v23  ;;  %4321 = vmatpush.bf16.msra.mxu0 %v4917_v53 }
 0xcb8   : > { %v3972_v44 = vmul.f32 %v3960_v46, %v3922_v55 }
 0xcb9   : > { %v4109_v38 = vld [vmem:[#allocation2 + $0x18] sm:$0xff]  ;;  %v4042_v15 = vmul.f32 %v5622_v48, %v4030_v22  ;;  %v3923_v59 = vpop.f32.mrf.mxu3 }
 0xcba   : > { %4184 = vrot.lane.b32.xlu1 %v4109_v38, %s5262_s6  ;;  %4138 = vrot.lane.b32.xlu2 %v4109_v38, %s5263_s7  ;;  %v3984_v48 = vadd.f32 %v3972_v44, %v3922_v55  ;;  %v3924_v12 = vadd.f32 %v6796_v28, %v3923_v59 }
 0xcbb   : > { %4074 = vrot.lane.b32.xlu0 %v4042_v15, %s5262_s6  ;;  %4322 = vmatpush.bf16.msra.mxu0 %v4916_v63 }
 0xcbc   : > { %v5189_v0 = vpop.eup %5188  ;;  %v3996_v40 = vmul.f32 0.7978846, %v3984_v48  ;;  %v3949_v6 = vmul.f32 0.044715, %v3924_v12  ;;  %v3937_v49 = vmul.f32 0.5, %v3924_v12 }
 0xcbd   : > { %v4019_v34 = vadd.f32 1.0, %v5189_v0 }
 0xcbe   : > { %5190 = vtanh.f32 %v3996_v40  ;;  %v3961_v27 = vmul.f32 %v3949_v6, %v3924_v12 }
 0xcbf   : > { %v4031_v26 = vmul.f32 %v4019_v34, %v3935_v29  ;;  %4323 = vmatpush.bf16.msra.mxu0 %v4915_v33 }
 0xcc0   : > { %v3973_v2 = vmul.f32 %v3961_v27, %v3924_v12 }
 0xcc1   : > { %v4043_v62 = vmul.f32 %v5697_v32, %v4031_v26  ;;  %v3936_v32 = vmul.f32 0.5, %v3922_v55 }
 0xcc2   : > { %4136 = vrot.lane.b32.xlu1 %v4108_v58, %s5263_s7  ;;  %v3985_v39 = vadd.f32 %v3973_v2, %v3924_v12 }
 0xcc3   : > { %4076 = vrot.lane.b32.xlu2 %v4043_v62, %s5262_s6 }
 0xcc4   : > { %v5191_v14 = vpop.eup %5190  ;;  %v3997_v28 = vmul.f32 0.7978846, %v3985_v39 }
 0xcc5   : > { %v4020_v37 = vadd.f32 1.0, %v5191_v14 }
 0xcc6   : > { %5192 = vtanh.f32 %v3997_v28 }
 0xcc7   : > { %v4032_v42 = vmul.f32 %v4020_v37, %v3936_v32 }
 0xcc9   : > { %v4044_v56 = vmul.f32 %v5714_v54, %v4032_v42 }
 0xccc   : > { %v5193_v60 = vpop.eup %5192 }
 0xccd   : > { %v4021_v58 = vadd.f32 1.0, %v5193_v60 }
 0xccf   : > { %v4033_v43 = vmul.f32 %v4021_v58, %v3937_v49 }
 0xcd1   : > { %v4065_v36 = vpop.permute.xlu0 %4064  ;;  %v4045_v21 = vmul.f32 %v5723_v4, %v4033_v43 }
 0xcd2   : > { %4097 = vst.msk [vmem:[#allocation2 + $0x20] sm:$0xff] %vm899_vm10, %v4065_v36 }
 0xcd9   : > { %v4110_v30 = vld [vmem:[#allocation2 + $0x20] sm:$0xff] }
 0xcda   : > { %4186 = vrot.lane.b32.xlu0 %v4110_v30, %s5262_s6 }
 0xce2   : > { %v4069_v61 = vpop.permute.xlu2 %4068  ;;  %4078 = vrot.lane.b32.xlu0 %v4044_v56, %s5262_s6 }
 0xce3   : > { %4099 = vst.msk [vmem:[#allocation2 + $0x30] sm:$0xff] %vm899_vm10, %v4069_v61 }
 0xcea   : > { %v4112_v31 = vld [vmem:[#allocation2 + $0x30] sm:$0xff] }
 0xceb   : > { %4190 = vrot.lane.b32.xlu0 %v4112_v31, %s5262_s6 }
 0xcec   : > { %v4135_v47 = vpop.permute.xlu2 %4134 }
 0xced   : > { %4169 = vst.msk [vmem:[#allocation2 + $0x10] sm:$0xff] %vm984_vm15, %v4135_v47  ;;  %v6921_v47 = vld [vmem:[%s7039_s2 + $0xa] ss:$0 sm:$0xff] }
 0xcee   : > { %v3472_v58 = vadd.f32 %v6921_v47, %v6701_v41  ;;  %v3474_v43 = vadd.f32 %v6921_v47, %v6704_v24 }
 0xcf2   : > { %v4067_v8 = vpop.permute.xlu1 %4066 }
 0xcf3   : > { %4098 = vst.msk [vmem:[#allocation2 + $0x28] sm:$0xff] %vm899_vm10, %v4067_v8  ;;  %4144 = vrot.lane.b32.xlu0 %v4112_v31, %s5263_s7 }
 0xcf4   : > { %v4073_v54 = vpop.permute.xlu2 %4072 }
 0xcf5   : > { %4101 = vst.msk [vmem:[#allocation2 + $0x40] sm:$0xff] %vm899_vm10, %v4073_v54  ;;  %v6927_v54 = vld [vmem:[%s7039_s2 + $0x9] ss:$0 sm:$0xff] }
 0xcfa   : > { %v4111_v35 = vld [vmem:[#allocation2 + $0x28] sm:$0xff]  ;;  %v4133_v9 = vpop.permute.xlu1 %4132 }
 0xcfb   : > { %4188 = vrot.lane.b32.xlu1 %v4111_v35, %s5262_s6  ;;  %4142 = vrot.lane.b32.xlu2 %v4111_v35, %s5263_s7  ;;  %4168 = vst.msk [vmem:[#allocation2 + $0x8] sm:$0xff] %vm984_vm15, %v4133_v9 }
 0xcfc   : > { %v4114_v13 = vld [vmem:[#allocation2 + $0x40] sm:$0xff] }
 0xd03   : > { %v4071_v11 = vpop.permute.xlu0 %4070  ;;  %4080 = vrot.lane.b32.xlu2 %v4045_v21, %s5262_s6  ;;  %4140 = vrot.lane.b32.xlu1 %v4110_v30, %s5263_s7 }
 0xd04   : > { %4100 = vst.msk [vmem:[#allocation2 + $0x38] sm:$0xff] %vm899_vm10, %v4071_v11 }
 0xd0b   : > { %4194 = vrot.lane.b32.xlu2 %v4114_v13, %s5262_s6  ;;  %v4113_v4 = vld [vmem:[#allocation2 + $0x38] sm:$0xff] }
 0xd0c   : > { %4192 = vrot.lane.b32.xlu1 %v4113_v4, %s5262_s6  ;;  %v4183_v19 = vpop.permute.xlu0 %4182 }
 0xd0d   : > { %4218 = vst.msk [vmem:[#allocation2 + $0x8] sm:$0xff] %vm1045_vm0, %v4183_v19 }
 0xd14   : > { %4146 = vrot.lane.b32.xlu1 %v4113_v4, %s5263_s7  ;;  %v4139_v5 = vpop.permute.xlu2 %4138  ;;  %v4230_v55 = vld [vmem:[#allocation2 + $0x8] sm:$0xff] }
 0xd15   : > { %4171 = vst.msk [vmem:[#allocation2 + $0x20] sm:$0xff] %vm984_vm15, %v4139_v5 }
 0xd1c   : > { %4148 = vrot.lane.b32.xlu1 %v4114_v13, %s5263_s7 }
 0xd1d   : > { %v4077_v50 = vpop.permute.xlu2 %4076 }
 0xd1e   : > { %4103 = vst.msk [vmem:[#allocation2 + $0x50] sm:$0xff] %vm899_vm10, %v4077_v50 }
 0xd25   : > { %v4116_v45 = vld [vmem:[#allocation2 + $0x50] sm:$0xff] }
 0xd2c   : > { %v4185_v20 = vpop.permute.xlu1 %4184 }
 0xd2d   : > { %4219 = vst.msk [vmem:[#allocation2 + $0x10] sm:$0xff] %vm1045_vm0, %v4185_v20  ;;  %v4075_v23 = vpop.permute.xlu0 %4074 }
 0xd2e   : > { %4102 = vst.msk [vmem:[#allocation2 + $0x48] sm:$0xff] %vm899_vm10, %v4075_v23 }
 0xd34   : > { %v4137_v18 = vpop.permute.xlu1 %4136  ;;  %v4231_v22 = vld [vmem:[#allocation2 + $0x10] sm:$0xff] }
 0xd35   : > { %4170 = vst.msk [vmem:[#allocation2 + $0x18] sm:$0xff] %vm984_vm15, %v4137_v18  ;;  %v4115_v38 = vld [vmem:[#allocation2 + $0x48] sm:$0xff]  ;;  %v4242_v15 = vpack.c.bf16 %v4231_v22, %v4230_v55  ;;  %v3478_v18 = vadd.f32 %v6921_v47, %v6715_v57 }
 0xd36   : > { %4150 = vrot.lane.b32.xlu2 %v4115_v38, %s5263_s7  ;;  %4196 = vrot.lane.b32.xlu0 %v4115_v38, %s5262_s6 }
 0xd37   : > { %4837 = vmatmul.msk.bf16.vlgmr.msra.gmra.mxu0 %vm628_vm12, %v4242_v15 }
 0xd3e   : > { %4152 = vrot.lane.b32.xlu2 %v4116_v45, %s5263_s7  ;;  %4198 = vrot.lane.b32.xlu0 %v4116_v45, %s5262_s6  ;;  %v3481_v45 = vadd.f32 %v6921_v47, %v6719_v10  ;;  %v4922_v10 = vld [vmem:[%s7038_s1 + $0x198] sm:$0xff] }
 0xd3f   : > { %4425 = vmatpush.bf16.msrb.mxu1 %v4922_v10 }
 0xd46   : > { %4204 = vrot.lane.b32.xlu2 %v6770_v1, %s5262_s6 }
 0xd4c   : > { %v4187_v0 = vpop.permute.xlu0 %4186 }
 0xd4d   : > { %4220 = vst.msk [vmem:[#allocation2 + $0x18] sm:$0xff] %vm1045_vm0, %v4187_v0 }
 0xd54   : > { %v4079_v29 = vpop.permute.xlu0 %4078  ;;  %v4232_v14 = vld [vmem:[#allocation2 + $0x18] sm:$0xff] }
 0xd55   : > { %v4143_v34 = vpop.permute.xlu2 %4142  ;;  %4104 = vst.msk [vmem:[#allocation2 + $0x58] sm:$0xff] %vm899_vm10, %v4079_v29 }
 0xd56   : > { %4173 = vst.msk [vmem:[#allocation2 + $0x30] sm:$0xff] %vm984_vm15, %v4143_v34 }
 0xd5c   : > { %v4117_v46 = vld [vmem:[#allocation2 + $0x58] sm:$0xff] }
 0xd5d   : > { %v4081_v26 = vpop.permute.xlu2 %4080  ;;  %v4191_v62 = vpop.permute.xlu0 %4190  ;;  %4154 = vrot.lane.b32.xlu0 %v4117_v46, %s5263_s7  ;;  %4200 = vrot.lane.b32.xlu1 %v4117_v46, %s5262_s6 }
 0xd5e   : > { %4105 = vst.msk [vmem:[#allocation2 + $0x60] sm:$0xff] %vm899_vm10, %v4081_v26 }
 0xd65   : > { %v4195_v44 = vpop.permute.xlu2 %4194  ;;  %v4145_v1 = vpop.permute.xlu0 %4144  ;;  %v4118_v48 = vld [vmem:[#allocation2 + $0x60] sm:$0xff] }
 0xd66   : > { %4174 = vst.msk [vmem:[#allocation2 + $0x38] sm:$0xff] %vm984_vm15, %v4145_v1  ;;  %4202 = vrot.lane.b32.xlu1 %v4118_v48, %s5262_s6  ;;  %s5210_s6 = sshra.s32 %s4518_s8, 4  ;;  %s5211_s6 = int_to_ptr.hbm [resolvable:$true] %s5210_s6 }
 0xd67   : > { %4224 = vst.msk [vmem:[#allocation2 + $0x38] sm:$0xff] %vm1045_vm0, %v4195_v44  ;;  %s5212_s7 = scalar_lea.hbm %s5211_s6, 1  ;;  %p5217_p0 = scmp.lt.s32.totalorder %s5211_s6, %s7040_s3 }
 0xd68   : > { %p5213_p11 = scmp.ne.s32.totalorder %s5211_s6, %s5212_s7  ;;  %p5218_p1 = scmp.lt.s32.totalorder %s5216_s11, %s5212_s7 }
 0xd6a   : > { %p5214_p12 = pnand %p5213_p11, %p5322_p5  ;;  %p5219_p2 = por %p5218_p1, %p5217_p0 }
 0xd6c   : > { %p5215_p13 = pneg %p5214_p12 }
 0xd6d   : > { %v4189_v40 = vpop.permute.xlu1 %4188 }
 0xd6e   : > { %4221 = vst.msk [vmem:[#allocation2 + $0x20] sm:$0xff] %vm1045_vm0, %v4189_v40  ;;  %v4236_v31 = vld [vmem:[#allocation2 + $0x38] sm:$0xff]  ;;  %p5220_p3 = pnand %p5219_p2, %p5215_p13 }
 0xd75   : > { %v4141_v36 = vpop.permute.xlu1 %4140  ;;  %v4233_v59 = vld [vmem:[#allocation2 + $0x20] sm:$0xff] }
 0xd76   : > { %4172 = vst.msk [vmem:[#allocation2 + $0x28] sm:$0xff] %vm984_vm15, %v4141_v36  ;;  %v4243_v12 = vpack.c.bf16 %v4233_v59, %v4232_v14 }
 0xd77   : > { %4222 = vst.msk [vmem:[#allocation2 + $0x28] sm:$0xff] %vm1045_vm0, %v4191_v62 }
 0xd78   : > { %4838 = vmatmul.msk.bf16.gmra.mxu0 %vm628_vm12, %v4243_v12 }
 0xd7e   : > { %v4193_v37 = vpop.permute.xlu1 %4192  ;;  %v4234_v32 = vld [vmem:[#allocation2 + $0x28] sm:$0xff] }
 0xd7f   : > { %4223 = vst.msk [vmem:[#allocation2 + $0x30] sm:$0xff] %vm1045_vm0, %v4193_v37 }
 0xd86   : > { %v4147_v30 = vpop.permute.xlu1 %4146  ;;  %v4235_v6 = vld [vmem:[#allocation2 + $0x30] sm:$0xff] }
 0xd87   : > { %4175 = vst.msk [vmem:[#allocation2 + $0x40] sm:$0xff] %vm984_vm15, %v4147_v30  ;;  %v4244_v42 = vpack.c.bf16 %v4235_v6, %v4234_v32 }
 0xd89   : > { %4839 = vmatmul.msk.bf16.gmra.mxu0 %vm628_vm12, %v4244_v42 }
 0xd8e   : > { %v4149_v27 = vpop.permute.xlu1 %4148 }
 0xd8f   : > { %4176 = vst.msk [vmem:[#allocation2 + $0x48] sm:$0xff] %vm984_vm15, %v4149_v27  ;;  %v3485_v27 = vadd.f32 %v6921_v47, %v6747_v17 }
 0xd90   : > { %v4151_v56 = vpop.permute.xlu2 %4150 }
 0xd91   : > { %4177 = vst.msk [vmem:[#allocation2 + $0x50] sm:$0xff] %vm984_vm15, %v4151_v56  ;;  %v4921_v56 = vld [vmem:[%s7038_s1 + $0x190] sm:$0xff] }
 0xd92   : > { %4426 = vmatpush.bf16.msrb.mxu1 %v4921_v56 }
 0xd98   : > { %v4153_v61 = vpop.permute.xlu2 %4152 }
 0xd99   : > { %4178 = vst.msk [vmem:[#allocation2 + $0x58] sm:$0xff] %vm984_vm15, %v4153_v61 }
 0xda0   : > { %v4205_v53 = vpop.permute.xlu2 %4204 }
 0xda8   : > { %v4197_v2 = vpop.permute.xlu0 %4196 }
 0xda9   : > { %4225 = vst.msk [vmem:[#allocation2 + $0x40] sm:$0xff] %vm1045_vm0, %v4197_v2  ;;  %v3487_v2 = vadd.f32 %v6921_v47, %v6751_v3  ;;  %v4926_v3 = vld [vmem:[%s7038_s1 + $0x1b8] sm:$0xff] }
 0xdaa   : > { %4494 = vmatpush.bf16.msrb.mxu2 %v4926_v3 }
 0xdb0   : > { %v4199_v39 = vpop.permute.xlu0 %4198  ;;  %v4237_v28 = vld [vmem:[#allocation2 + $0x40] sm:$0xff] }
 0xdb1   : > { %4226 = vst.msk [vmem:[#allocation2 + $0x48] sm:$0xff] %vm1045_vm0, %v4199_v39  ;;  %v4245_v8 = vpack.c.bf16 %v4237_v28, %v4236_v31 }
 0xdb3   : > { %4840 = vmatmul.msk.bf16.gmra.mxu0 %vm628_vm12, %v4245_v8 }
 0xdb4   : > { %v4325_v60 = vpop.f32.mrf.mxu0 }
 0xdb5   : > { %v4326_v35 = vadd.f32 %v6927_v54, %v4325_v60 }
 0xdb7   : > { %v4351_v9 = vadd.f32 %v4326_v35, %v3472_v58 }
 0xdb8   : > { %v4238_v41 = vld [vmem:[#allocation2 + $0x48] sm:$0xff] }
 0xdb9   : > { %v4359_v21 = vsel %vm984_vm15, %v4351_v9, -inf }
 0xdbc   : > { %v4327_v49 = vpop.f32.mrf.mxu0 }
 0xdbd   : > { %v4328_v16 = vadd.f32 %v6927_v54, %v4327_v49 }
 0xdbf   : > { %v4352_v7 = vadd.f32 %v4328_v16, %v3474_v43 }
 0xdc1   : > { %v4360_v11 = vsel %vm984_vm15, %v4352_v7, -inf }
 0xdc2   : > { %v4361_v25 = vmax.f32 %v4359_v21, %v4360_v11 }
 0xdc4   : > { %v4362_v38 = vrot.slane %v4361_v25, 4 }
 0xdc6   : > { %v4363_v29 = vmax.f32 %v4361_v25, %v4362_v38  ;;  %v4925_v25 = vld [vmem:[%s7038_s1 + $0x1b0] sm:$0xff] }
 0xdc7   : > { %4495 = vmatpush.bf16.msrb.mxu2 %v4925_v25 }
 0xdc8   : > { %v4364_v62 = vrot.slane %v4363_v29, 2 }
 0xdca   : > { %v4365_v48 = vmax.f32 %v4363_v29, %v4364_v62 }
 0xdcc   : > { %v4366_v14 = vrot.slane %v4365_v48, 1 }
 0xdce   : > { %v4367_v37 = vmax.f32 %v4365_v48, %v4366_v14  ;;  %v4432_v48 = vld [vmem:[%s7039_s2 + $0xe] sm:$0x1] }
 0xdcf   : > { %v4201_v13 = vpop.permute.xlu1 %4200  ;;  %v4155_v4 = vpop.permute.xlu0 %4154 }
 0xdd0   : > { %4227 = vst.msk [vmem:[#allocation2 + $0x50] sm:$0xff] %vm1045_vm0, %v4201_v13  ;;  %v4924_v13 = vld [vmem:[%s7038_s1 + $0x1a8] sm:$0xff] }
 0xdd1   : > { %4179 = vst.msk [vmem:[#allocation2 + $0x60] sm:$0xff] %vm984_vm15, %v4155_v4  ;;  %v3491_v4 = vadd.f32 %v6921_v47, %v6763_v52  ;;  %4496 = vmatpush.bf16.msrb.mxu2 %v4924_v13 }
 0xdd2   : > { %4229 = vst.msk [vmem:[#allocation2 + $0x60] sm:$0xff] %vm1045_vm0, %v4205_v53 }
 0xdd7   : > { %v4239_v19 = vld [vmem:[#allocation2 + $0x50] sm:$0xff] }
 0xdd8   : > { %v4203_v24 = vpop.permute.xlu1 %4202  ;;  %v4246_v63 = vpack.c.bf16 %v4239_v19, %v4238_v41  ;;  %v3494_v19 = vadd.f32 %v6921_v47, %v6766_v51 }
 0xdd9   : > { %4228 = vst.msk [vmem:[#allocation2 + $0x58] sm:$0xff] %vm1045_vm0, %v4203_v24  ;;  %v4241_v5 = vld [vmem:[#allocation2 + $0x60] sm:$0xff] }
 0xdda   : > { %4841 = vmatmul.msk.bf16.gmra.mxu0 %vm628_vm12, %v4246_v63 }
 0xde0   : > { %v4240_v33 = vld [vmem:[#allocation2 + $0x58] sm:$0xff] }
 0xde1   : > { %v4247_v50 = vpack.c.bf16 %v4241_v5, %v4240_v33  ;;  %v4923_v33 = vld [vmem:[%s7038_s1 + $0x1a0] sm:$0xff] }
 0xde2   : > { %4497 = vmatpush.bf16.msrb.mxu2 %v4923_v33 }
 0xdea   : > { %4842 = vmatmul.msk.bf16.gmra.mxu0 %vm628_vm12, %v4247_v50 }
 0xdf5   : > { %v4330_v20 = vpop.f32.mrf.mxu0 }
 0xdfd   : > { %v4331_v23 = vpop.f32.mrf.mxu0 }
 0xdfe   : > { %v4332_v55 = vadd.f32 %v6927_v54, %v4331_v23 }
 0xe00   : > { %v4353_v22 = vadd.f32 %v4332_v55, %v3478_v18 }
 0xe02   : > { %v4368_v46 = vsel %vm984_vm15, %v4353_v22, -inf }
 0xe06   : > { %v4334_v15 = vpop.f32.mrf.mxu0 }
 0xe07   : > { %v4335_v0 = vadd.f32 %v6927_v54, %v4334_v15 }
 0xe09   : > { %v4354_v34 = vadd.f32 %v4335_v0, %v3481_v45  ;;  %v4434_v45 = vld [vmem:[%s7039_s2 + $0xf] sm:$0x1] }
 0xe0a   : > { %v4435_v0 = vadd.f32 1e-05, %v4434_v45 }
 0xe0b   : > { %v4369_v26 = vsel %vm984_vm15, %v4354_v34, -inf }
 0xe0c   : > { %v4370_v44 = vmax.f32 %v4368_v46, %v4369_v26  ;;  %5194 = vrsqrt.f32 %v4435_v0  ;;  %vm4442_vm12 = vweird.f32 %v4435_v0 }
 0xe0e   : > { %v4371_v1 = vrot.slane %v4370_v44, 4  ;;  %v4336_v57 = vpop.f32.mrf.mxu0 }
 0xe10   : > { %v4372_v40 = vmax.f32 %v4370_v44, %v4371_v1  ;;  %v4403_v44 = vld [vmem:[%s7039_s2 + $0xb] sm:$0x1] }
 0xe12   : > { %v4373_v36 = vrot.slane %v4372_v40, 2  ;;  %v5195_v29 = vpop.eup %5194 }
 0xe13   : > { %v4437_v34 = vmul.f32 %v5195_v29, %v4435_v0  ;;  %vm4443_vm10 = vweird.f32 %v5195_v29 }
 0xe14   : > { %v4374_v59 = vmax.f32 %v4372_v40, %v4373_v36  ;;  %vm4444_vm1 = vmor %vm4442_vm12, %vm4443_vm10 }
 0xe15   : > { %v4438_v46 = vmul.f32 %v5195_v29, %v4437_v34 }
 0xe16   : > { %v4375_v12 = vrot.slane %v4374_v59, 1 }
 0xe17   : > { %v4439_v26 = vmul.f32 0.5, %v4438_v46 }
 0xe18   : > { %v4376_v30 = vmax.f32 %v4374_v59, %v4375_v12  ;;  %v4447_v59 = vld [vmem:[%s7039_s2 + $0xc] sm:$0x1]  ;;  %v4449_v12 = vld [vmem:[%s7039_s2 + $0xd] sm:$0x1] }
 0xe19   : > { %v4440_v62 = vsub.f32 1.5, %v4439_v26 }
 0xe1a   : > { %v4377_v32 = vadd.f32 %v4376_v30, %v4367_v37 }
 0xe1b   : > { %v4441_v1 = vmul.f32 %v5195_v29, %v4440_v62 }
 0xe1d   : > { %v4445_v36 = vsel %vm4444_vm1, %v5195_v29, %v4441_v1 }
 0xe30   : > { %v4338_v6 = vpop.f32.mrf.mxu0 }
 0xe31   : > { %v4339_v42 = vadd.f32 %v6927_v54, %v4338_v6 }
 0xe33   : > { %v4355_v39 = vadd.f32 %v4339_v42, %v3485_v27  ;;  %v4461_v27 = vld [vmem:[%s7039_s2 + $0x10] sm:$0x1] }
 0xe35   : > { %v4378_v8 = vsel %vm984_vm15, %v4355_v39, -inf }
 0xe38   : > { %v4340_v61 = vpop.f32.mrf.mxu0 }
 0xe39   : > { %v4341_v31 = vadd.f32 %v6927_v54, %v4340_v61 }
 0xe3b   : > { %v4356_v28 = vadd.f32 %v4341_v31, %v3487_v2 }
 0xe3d   : > { %v4379_v60 = vsel %vm984_vm15, %v4356_v28, -inf }
 0xe3e   : > { %v4380_v58 = vmax.f32 %v4378_v8, %v4379_v60 }
 0xe40   : > { %v4381_v35 = vrot.slane %v4380_v58, 4 }
 0xe42   : > { %v4382_v17 = vmax.f32 %v4380_v58, %v4381_v35 }
 0xe44   : > { %v4383_v9 = vrot.slane %v4382_v17, 2 }
 0xe46   : > { %v4384_v49 = vmax.f32 %v4382_v17, %v4383_v9 }
 0xe48   : > { %v4385_v43 = vrot.slane %v4384_v49, 1 }
 0xe4a   : > { %v4386_v16 = vmax.f32 %v4384_v49, %v4385_v43 }
 0xe4c   : > { %v4387_v7 = vadd.f32 %v4386_v16, %v4377_v32 }
 0xe57   : > { %v4343_v21 = vpop.f32.mrf.mxu0 }
 0xe5f   : > { %v4344_v11 = vpop.f32.mrf.mxu0 }
 0xe60   : > { %v4345_v53 = vadd.f32 %v6927_v54, %v4344_v11 }
 0xe62   : > { %v4357_v24 = vadd.f32 %v4345_v53, %v3491_v4 }
 0xe64   : > { %v4388_v50 = vsel %vm984_vm15, %v4357_v24, -inf }
 0xe67   : > { %v4347_v41 = vpop.f32.mrf.mxu0 }
 0xe68   : > { %v4348_v63 = vadd.f32 %v6927_v54, %v4347_v41 }
 0xe6a   : > { %v4358_v5 = vadd.f32 %v4348_v63, %v3494_v19 }
 0xe6c   : > { %v4389_v20 = vsel %vm984_vm15, %v4358_v5, -inf }
 0xe6d   : > { %v4390_v23 = vmax.f32 %v4388_v50, %v4389_v20 }
 0xe6f   : > { %v4391_v52 = vrot.slane %v4390_v23, 4  ;;  %v4349_v18 = vpop.f32.mrf.mxu0 }
 0xe71   : > { %v4392_v55 = vmax.f32 %v4390_v23, %v4391_v52 }
 0xe73   : > { %v4393_v22 = vrot.slane %v4392_v55, 2 }
 0xe75   : > { %v4394_v51 = vmax.f32 %v4392_v55, %v4393_v22 }
 0xe77   : > { %v4395_v47 = vrot.slane %v4394_v51, 1 }
 0xe79   : > { %v4396_v38 = vmax.f32 %v4394_v51, %v4395_v47 }
 0xe7b   : > { %v4397_v54 = vadd.f32 %v4396_v38, %v4387_v7 }
 0xe7d   : > { %v4398_v15 = vpack.c.bf16 %v4397_v54, %v4397_v54 }
 0xe7f   : > { %4851 = vmatmul.msk.bf16.vlgmr.msrb.gmra.mxu1 %vm984_vm15, %v4398_v15 }
 0xefc   : > { %v4428_v57 = vpop.f32.mrf.mxu1 }
 0xefd   : > { %v4429_v40 = vadd.f32 %v4428_v57, %v4403_v44 }
 0xeff   : > { %v4433_v14 = vsub.f32 %v4429_v40, %v4432_v48 }
 0xf01   : > { %v4446_v10 = vmul.f32 %v4445_v36, %v4433_v14 }
 0xf03   : > { %v4448_v37 = vmul.f32 %v4447_v59, %v4446_v10 }
 0xf04   : > { %v4430_v30 = vpop.f32.mrf.mxu1 }
 0xf05   : > { %v4450_v32 = vadd.f32 %v4449_v12, %v4448_v37 }
 0xf07   : > { %v4451_v6 = vmax.f32 %v4450_v32, 0.0 }
 0xf09   : > { %v4452_v42 = vpack.c.bf16 %v4451_v6, %v4451_v6 }
 0xf0b   : > { %4868 = vmatmul.msk.bf16.vlgmr.msrb.gmra.mxu2 %vm4486_vm2, %v4452_v42 }
 0xf8e   : > { %v4499_v56 = vpop.f32.mrf.mxu2 }
 0xf8f   : > { %v4500_v61 = vadd.f32 %v4499_v56, %v4461_v27 }
 0xf91   : > { %4503 = vst [vmem:[%s163_s4] sm:$0x1] %v4500_v61 }
 0xf92   : > { %5223 = shalt.err (!%p5220_p3)
}
 0xf93   : > { %4945 = dma.vmem_to_hbm [thread:$0]  (%p5322_p5), %s4516_s5, 16, %s4518_s8, %s4505_s9  }
 0xf96   : > { %v4501_v2 = vpop.f32.mrf.mxu2 }
 0xf97 PF: > { %p4951_p4 = scmp.ge.s32.totalorder %s5258_s15, 2  ;;  %s4529_s20 = sand.u32 1, %s5246_s12  }
 0xf98   : > { %s4530_s24 = scalar_lea.sflag [#allocation4], %s4529_s20 }
 0xf99   : > { %p4948_p7 = pnand %p4951_p4, %p5326_p6 }
 0xf9b   : > { %p4949_p8 = pneg %p4948_p7 }
 0xf9d   : > { %5241 = dma.done.wait (%p4949_p8), %s4530_s24, 16  }
 0xf9e   : > { %5243 = vsyncadd (%p4949_p8), %s4530_s24, 4294967280  ;;  %p13_p9 = scmp.ge.s32.totalorder %s5309_s18, 4   ;;  %s7061_s12 = smov %s5250_s13 }
 0xf9f   : > { %s7062_s13 = smov %s5254_s14  ;;  %s7063_s14 = smov %s5320_s21 }
 0xfa0   : > { %s7064_s15 = smov %s5309_s18  ;;  %15 = sbr.rel (!%p13_p9) target bundleno = 3 (0x3), region = 67 }
 0xfa5   :  { %4535 = vsyncpa [#allocation4], 1 }
 0xfa6   :  { %4537 = vsyncpa [#allocation4 + $0x1], 1 }

</bundles_post_ra>
